<compile_context>
chip_gen: v7x
topology: tpu7x:2x2x1
jax: 0.10.0
libtpu: 0.0.40
codegen_flags: <defaults>
</compile_context>

<pallas_src>
import functools
import math

import jax
import jax.numpy as jnp
from jax.experimental import pallas as pl
from jax.experimental.pallas import tpu as pltpu


# ----------------------------- fused Pallas kernel ---------------------------

def _fused_block_kernel(x_ref, np_ref, wqkv_ref, bqkv_ref, wproj_ref, bproj_ref,
                        wm1_ref, bm1_ref, wm2_ref, bm2_ref, abias_ref, o_ref,
                        *, ws, num_heads):
    """One grid step = (batch, window-row block, window column).

    x_ref    : (RB, ws, C) bf16  activation tile: RB = row_block*ws rows of one
                                 window-column (window partition done by grid)
    np_ref   : (4, C)      f32   [norm_scale, norm_shift, rescale, rebias]
    wqkv_ref : (C, 3C)     bf16  fused Q|K|V 1x1-conv weight (q-scale folded in)
    wproj_ref: (C, C)      bf16  output-projection 1x1-conv weight
    wm1/wm2  : (C,Ch)/(Ch,C) bf16  MLP 1x1-conv weights
    abias_ref: (nH, N, N)  f32   relative-position bias (meta-MLP precomputed)
    o_ref    : (RB, ws, C) bf16  output tile
    """
    RB, _, C = x_ref.shape
    N = ws * ws
    hd = C // num_heads
    nR = RB // ws                     # windows in this step (same window column)
    P = RB * ws

    # f32 working copy; (RB, ws, C) -> (P, C) is a free leading-dim merge.
    x = x_ref[...].astype(jnp.float32).reshape(P, C)
    n_scale = np_ref[0]               # (C,)
    n_shift = np_ref[1]
    rescale = np_ref[2]
    rebias = np_ref[3]

    # RLN affine: normalized = x * (weight/std) + (bias - mean*weight/std)
    xn = x * n_scale + n_shift                                     # (P, C) f32

    # --- fused Q|K|V 1x1 convs: one (P, C) @ (C, 3C) bf16 MXU matmul ---------
    qkv = jnp.dot(xn.astype(jnp.bfloat16), wqkv_ref[...],
                  preferred_element_type=jnp.float32) + bqkv_ref[...]
    # Window partition is a free reshape: tile rows are already window-major
    # (p = window_index * N + pixel_in_window).
    qkvw = qkv.reshape(nR, N, 3 * C)

    # --- window attention: all nR windows batched per head -------------------
    abias = abias_ref[...]                                          # (nH, N, N)
    head_outs = []
    for h in range(num_heads):
        qh = qkvw[:, :, h * hd:(h + 1) * hd].astype(jnp.bfloat16)       # (nR,N,hd)
        kh = qkvw[:, :, C + h * hd:C + (h + 1) * hd].astype(jnp.bfloat16)
        vh = qkvw[:, :, 2 * C + h * hd:2 * C + (h + 1) * hd].astype(jnp.bfloat16)
        # scores (q-scale already folded into wqkv/bqkv); f32 accumulation
        s = jnp.einsum("rqd,rkd->rqk", qh, kh,
                       preferred_element_type=jnp.float32)              # (nR,N,N)
        s = s + abias[h][None, :, :]
        # softmax over keys: f32 math, EUP reciprocal instead of a divide
        s = s - jnp.max(s, axis=-1, keepdims=True)
        p = jnp.exp(s)
        p = p * pl.reciprocal(jnp.sum(p, axis=-1, keepdims=True), approx=True)
        head_outs.append(jnp.einsum("rqk,rkd->rqd", p.astype(jnp.bfloat16), vh,
                                    preferred_element_type=jnp.float32))
    # fold heads back into channels -> lane axis is C for everything below
    attn = jnp.concatenate(head_outs, axis=-1).reshape(P, C)

    # --- output projection 1x1 conv + rescale/rebias + residual 1 ------------
    proj = jnp.dot(attn.astype(jnp.bfloat16), wproj_ref[...],
                   preferred_element_type=jnp.float32) + bproj_ref[...]
    x1 = x + proj * rescale + rebias                                 # (P, C) f32

    # --- MLP (1x1 conv -> ReLU -> 1x1 conv) + residual 2 ----------------------
    h1 = jnp.dot(x1.astype(jnp.bfloat16), wm1_ref[...],
                 preferred_element_type=jnp.float32) + bm1_ref[...]
    h1 = jnp.maximum(h1, 0.0)                                        # (P, Ch)
    m = jnp.dot(h1.astype(jnp.bfloat16), wm2_ref[...],
                preferred_element_type=jnp.float32) + bm2_ref[...]

    o_ref[...] = (x1 + m).reshape(RB, ws, C).astype(o_ref.dtype)


# ------------------------- VMEM budget / tiling choice ------------------------

def _vmem_capacity_bytes():
    try:
        return int(pltpu.get_tpu_info().vmem_capacity_bytes)
    except Exception:
        return 64 * 1024 * 1024          # v7x per-TC VMEM; conservative fallback


def _estimate_step_vmem(row_block, ws, C, num_heads, hidden):
    """Rough per-step VMEM bytes: double-buffered bf16 I/O tiles, resident
    weights (x2 pipeline buffers), f32/bf16 in-kernel temporaries, per-head
    attention scores."""
    N = ws * ws
    P = row_block * N
    nR = row_block
    io = 2 * 2 * P * C * 2                                   # in + out, 2 bufs
    weights = 2 * 2 * (3 * C * C + C * C + C * hidden + hidden * C) \
        + 2 * num_heads * N * N * 4 + 2 * 4 * C * 4
    f32_live = P * 4 * (8 * C + hidden)                      # x,xn,qkv,attn,...
    bf16_live = P * 2 * (5 * C + hidden)                     # bf16 MXU operands
    attn_live = 2 * nR * N * N * 4 + 3 * nR * N * (C // num_heads) * 2
    return io + weights + f32_live + bf16_live + attn_live


def _pick_row_block(B, H, W, C, ws, num_heads, hidden, vmem_cap):
    """Largest row_block (divisor of H//ws) whose per-step working set fits a
    generation-aware budget, while keeping >= 2 total grid steps so both v7x
    TensorCores get work."""
    n_rows = H // ws
    budget = max(vmem_cap // 4, 2 << 20)      # ~16 MiB on v7x, ~32 MiB on v5e/v6e
    max_rb = n_rows if B * (W // ws) >= 2 else max(1, n_rows // 2)
    best = 1
    for rb in range(1, max_rb + 1):
        if n_rows % rb == 0 and _estimate_step_vmem(rb, ws, C, num_heads,
                                                    hidden) <= budget:
            best = rb
    return best


# ------------------------------ JAX wrapper ----------------------------------

def transformer_block_forward(x_nhwc, prep, *, num_heads, window_size, row_block,
                              vmem_limit_bytes):
    """Full TransformerBlock forward.  x_nhwc is (B, H, W, C) bf16 (NHWC).

    The block is NHWC-native: the NCHW<->NHWC layout change of the PyTorch
    reference happens once at the network boundary (see __main__), not per
    block, so no full-activation transpose round-trips HBM here."""
    B, H, W, C = x_nhwc.shape
    ws = window_size
    assert H % ws == 0 and W % ws == 0, \
        "TODO(synk): shift_size>0 / reflect-pad (check_size) path not implemented"

    # ---- RLN statistics: per-sample reduction over (H,W,C), read from bf16 --
    xf = x_nhwc.astype(jnp.float32)
    mean = jnp.mean(xf, axis=(1, 2, 3))                               # (B,)
    var = jnp.mean(jnp.square(xf - mean[:, None, None, None]), axis=(1, 2, 3))
    std = jnp.sqrt(var + 1e-5)                                        # (B,)
    n_scale = prep["ln_w"][None, :] / std[:, None]                    # (B, C)
    n_shift = prep["ln_b"][None, :] - mean[:, None] * n_scale
    rescale = prep["meta1_w"][None, :] * std[:, None] + prep["meta1_b"][None, :]
    rebias = prep["meta2_w"][None, :] * mean[:, None] + prep["meta2_b"][None, :]
    norm_params = jnp.stack([n_scale, n_shift, rescale, rebias], axis=1)  # (B,4,C)

    Ch = prep["w_mlp1"].shape[1]
    RB = row_block * ws
    nWt = W // ws
    grid = (B, H // RB, nWt)

    # 5-D view so every blocked minor dim is a full array dim (free reshape).
    x5 = x_nhwc.reshape(B, H, nWt, ws, C)

    kern = functools.partial(_fused_block_kernel, ws=ws, num_heads=num_heads)
    xmap = lambda b, r, w: (b, r, w, 0, 0)
    wmap2 = lambda b, r, w: (0, 0)
    wmap3 = lambda b, r, w: (0, 0, 0)
    # NOTE: constant-index weight specs could use pipeline_mode=pl.Buffered(1)
    # to drop their second buffer; skipped (negligible at these dims).
    out5 = pl.pallas_call(
        kern,
        out_shape=jax.ShapeDtypeStruct((B, H, nWt, ws, C), jnp.bfloat16),
        grid_spec=pltpu.PrefetchScalarGridSpec(
            num_scalar_prefetch=0,
            grid=grid,
            in_specs=[
                pl.BlockSpec((None, RB, None, ws, C), xmap),
                pl.BlockSpec((None, 4, C), lambda b, r, w: (b, 0, 0)),
                pl.BlockSpec((C, 3 * C), wmap2),           # w_qkv (VMEM resident)
                pl.BlockSpec((1, 3 * C), wmap2),           # b_qkv
                pl.BlockSpec((C, C), wmap2),               # w_proj
                pl.BlockSpec((1, C), wmap2),               # b_proj
                pl.BlockSpec((C, Ch), wmap2),              # w_mlp1
                pl.BlockSpec((1, Ch), wmap2),              # b_mlp1
                pl.BlockSpec((Ch, C), wmap2),              # w_mlp2
                pl.BlockSpec((1, C), wmap2),               # b_mlp2
                pl.BlockSpec((num_heads, ws * ws, ws * ws), wmap3),  # rel bias
            ],
            out_specs=pl.BlockSpec((None, RB, None, ws, C), xmap),
        ),
        compiler_params=pltpu.CompilerParams(
            dimension_semantics=("parallel", "parallel", "parallel"),
            vmem_limit_bytes=vmem_limit_bytes),
    )(x5, norm_params,
      prep["w_qkv"], prep["b_qkv"], prep["w_proj"], prep["b_proj"],
      prep["w_mlp1"], prep["b_mlp1"], prep["w_mlp2"], prep["b_mlp2"],
      prep["attn_bias"])

    return out5.reshape(B, H, W, C)


# ------------------------------ parameters -----------------------------------

def get_relative_positions(window_size):
    coords_h = jnp.arange(window_size)
    coords_w = jnp.arange(window_size)
    coords = jnp.stack(jnp.meshgrid(coords_h, coords_w, indexing="ij"))
    coords_flatten = coords.reshape(2, -1)
    rel = coords_flatten[:, :, None] - coords_flatten[:, None, :]
    rel = jnp.transpose(rel, (1, 2, 0)).astype(jnp.float32)           # (N, N, 2)
    return jnp.sign(rel) * jnp.log1p(jnp.abs(rel))


def init_params(key, dim, num_heads, network_depth, mlp_ratio=4.0):
    ks = jax.random.split(key, 12)
    hidden = int(dim * mlp_ratio)

    def trunc(k, shape, std):
        return std * jax.random.truncated_normal(k, -2.0, 2.0, shape, jnp.float32)

    gain = (8.0 * network_depth) ** (-1.0 / 4.0)
    std_v = gain * math.sqrt(2.0 / float(dim + dim))
    # QK conv (out_channels == 2*dim) intentionally omits the gain: matches the
    # `w_shape[0] == self.dim * 2` branch of Attention._init_weights.
    std_qk = math.sqrt(2.0 / float(dim + 2 * dim))
    std_m1 = gain * math.sqrt(2.0 / float(dim + hidden))
    std_m2 = gain * math.sqrt(2.0 / float(hidden + dim))

    return {
        # attention 1x1 convs stored as (Cin, Cout) matrices
        "w_v": trunc(ks[0], (dim, dim), std_v),
        "b_v": jnp.zeros((dim,), jnp.float32),
        "w_qk": trunc(ks[1], (dim, 2 * dim), std_qk),
        "b_qk": jnp.zeros((2 * dim,), jnp.float32),
        "w_proj": trunc(ks[2], (dim, dim), std_v),
        "b_proj": jnp.zeros((dim,), jnp.float32),
        # relative-position meta MLP: Linear(2,256) -> ReLU -> Linear(256,nH)
        "meta_w1": 0.1 * jax.random.normal(ks[3], (2, 256), jnp.float32),
        "meta_b1": 0.01 * jax.random.normal(ks[4], (256,), jnp.float32),
        "meta_w2": 0.1 * jax.random.normal(ks[5], (256, num_heads), jnp.float32),
        "meta_b2": 0.01 * jax.random.normal(ks[6], (num_heads,), jnp.float32),
        # RLN (revised LayerNorm) parameters
        "ln_w": jnp.ones((dim,), jnp.float32),
        "ln_b": jnp.zeros((dim,), jnp.float32),
        "meta1_w": trunc(ks[7], (dim,), 0.02),
        "meta1_b": jnp.ones((dim,), jnp.float32),
        "meta2_w": trunc(ks[8], (dim,), 0.02),
        "meta2_b": jnp.zeros((dim,), jnp.float32),
        # MLP 1x1 convs
        "w_mlp1": trunc(ks[9], (dim, hidden), std_m1),
        "b_mlp1": jnp.zeros((hidden,), jnp.float32),
        "w_mlp2": trunc(ks[10], (hidden, dim), std_m2),
        "b_mlp2": jnp.zeros((dim,), jnp.float32),
    }


def prepare_params(params, *, dim, num_heads, window_size):
    """Parameter-only precompute done ONCE, outside the jitted forward: fold
    the attention q-scale into the QK weight, fuse Q|K|V into one (C,3C)
    weight, run the relative-position meta-MLP, cast MXU weights to bf16."""
    hd = dim // num_heads
    qscale = hd ** (-0.5)
    w_q = params["w_qk"][:, :dim] * qscale
    b_q = params["b_qk"][:dim] * qscale
    w_qkv = jnp.concatenate([w_q, params["w_qk"][:, dim:], params["w_v"]], axis=1)
    b_qkv = jnp.concatenate([b_q, params["b_qk"][dim:], params["b_v"]], axis=0)

    rel = get_relative_positions(window_size)                         # (N, N, 2)
    h = jax.nn.relu(rel @ params["meta_w1"] + params["meta_b1"])
    bias = h @ params["meta_w2"] + params["meta_b2"]                  # (N, N, nH)
    bias = jnp.transpose(bias, (2, 0, 1))                             # (nH, N, N)

    f32 = jnp.float32
    return {
        "w_qkv": w_qkv.astype(jnp.bfloat16),
        "b_qkv": b_qkv.reshape(1, -1).astype(f32),
        "w_proj": params["w_proj"].astype(jnp.bfloat16),
        "b_proj": params["b_proj"].reshape(1, -1).astype(f32),
        "w_mlp1": params["w_mlp1"].astype(jnp.bfloat16),
        "b_mlp1": params["b_mlp1"].reshape(1, -1).astype(f32),
        "w_mlp2": params["w_mlp2"].astype(jnp.bfloat16),
        "b_mlp2": params["b_mlp2"].reshape(1, -1).astype(f32),
        "attn_bias": bias.astype(f32),
        "ln_w": params["ln_w"], "ln_b": params["ln_b"],
        "meta1_w": params["meta1_w"], "meta1_b": params["meta1_b"],
        "meta2_w": params["meta2_w"], "meta2_b": params["meta2_b"],
    }


# --------------------------------- main ---------------------------------------

if __name__ == "__main__":
    B, dim, H, W = 2, 32, 16, 16
    num_heads, window_size, network_depth, mlp_ratio = 4, 8, 4, 4.0

    key = jax.random.PRNGKey(0)
    k_x, k_p = jax.random.split(key)
    X = jax.random.normal(k_x, (B, dim, H, W), jnp.float32)      # NCHW, like PyTorch

    params = init_params(k_p, dim, num_heads, network_depth, mlp_ratio)
    prep = prepare_params(params, dim=dim, num_heads=num_heads,
                          window_size=window_size)

    hidden = int(dim * mlp_ratio)
    vmem_cap = _vmem_capacity_bytes()
    row_block = _pick_row_block(B, H, W, dim, window_size, num_heads, hidden,
                                vmem_cap)
    vmem_limit = int(vmem_cap * 3 // 4)

    # One-time layout change at the network boundary (done once per network in
    # DehazeFormer, not per block): NCHW f32 -> NHWC bf16.
    x_nhwc = jnp.transpose(X, (0, 2, 3, 1)).astype(jnp.bfloat16)

    fwd = jax.jit(functools.partial(
        transformer_block_forward, num_heads=num_heads, window_size=window_size,
        row_block=row_block, vmem_limit_bytes=vmem_limit))

    out_nhwc = jax.block_until_ready(fwd(x_nhwc, prep))
    out = jnp.transpose(out_nhwc, (0, 3, 1, 2))                  # back to NCHW
    assert out.shape == (B, dim, H, W), out.shape
    assert bool(jnp.all(jnp.isfinite(out.astype(jnp.float32))))
    print("KERNEL_OK")
</pallas_src>

<mosaic_0001>
module attributes {stable_mosaic.version = 11 : i64} {
  func.func @_fused_block_kernel(%arg0: i32, %arg1: i32, %arg2: i32, %arg3: memref<1x16x1x8x32xbf16, #tpu.memory_space<vmem>>, %arg4: memref<1x4x32xf32, #tpu.memory_space<vmem>>, %arg5: memref<32x96xbf16, #tpu.memory_space<vmem>>, %arg6: memref<1x96xf32, #tpu.memory_space<vmem>>, %arg7: memref<32x32xbf16, #tpu.memory_space<vmem>>, %arg8: memref<1x32xf32, #tpu.memory_space<vmem>>, %arg9: memref<32x128xbf16, #tpu.memory_space<vmem>>, %arg10: memref<1x128xf32, #tpu.memory_space<vmem>>, %arg11: memref<128x32xbf16, #tpu.memory_space<vmem>>, %arg12: memref<1x32xf32, #tpu.memory_space<vmem>>, %arg13: memref<4x64x64xf32, #tpu.memory_space<vmem>>, %arg14: memref<1x16x1x8x32xbf16, #tpu.memory_space<vmem>>) attributes {dimension_semantics = [#tpu.dimension_semantics<parallel>, #tpu.dimension_semantics<parallel>, #tpu.dimension_semantics<parallel>], iteration_bounds = array<i64: 2, 1, 2>, scalar_prefetch = 0 : i64, scratch_operands = 0 : i64, tpu.core_type = #tpu.core_type<tc>, window_params = [{transform_indices = @transform_0, window_bounds = array<i64: 1, 16, 1, 8, 32>}, {transform_indices = @transform_1, window_bounds = array<i64: 1, 4, 32>}, {pipeline_mode = #tpu.pipeline_mode<synchronous>, transform_indices = @transform_2, window_bounds = array<i64: 32, 96>}, {pipeline_mode = #tpu.pipeline_mode<synchronous>, transform_indices = @transform_3, window_bounds = array<i64: 1, 96>}, {pipeline_mode = #tpu.pipeline_mode<synchronous>, transform_indices = @transform_4, window_bounds = array<i64: 32, 32>}, {pipeline_mode = #tpu.pipeline_mode<synchronous>, transform_indices = @transform_5, window_bounds = array<i64: 1, 32>}, {pipeline_mode = #tpu.pipeline_mode<synchronous>, transform_indices = @transform_6, window_bounds = array<i64: 32, 128>}, {pipeline_mode = #tpu.pipeline_mode<synchronous>, transform_indices = @transform_7, window_bounds = array<i64: 1, 128>}, {pipeline_mode = #tpu.pipeline_mode<synchronous>, transform_indices = @transform_8, window_bounds = array<i64: 128, 32>}, {pipeline_mode = #tpu.pipeline_mode<synchronous>, transform_indices = @transform_9, window_bounds = array<i64: 1, 32>}, {pipeline_mode = #tpu.pipeline_mode<synchronous>, transform_indices = @transform_10, window_bounds = array<i64: 4, 64, 64>}, {transform_indices = @transform_11, window_bounds = array<i64: 1, 16, 1, 8, 32>}]} {
    %c0 = arith.constant 0 : index
    %c0_0 = arith.constant 0 : index
    %c0_1 = arith.constant 0 : index
    %c0_2 = arith.constant 0 : index
    %c0_3 = arith.constant 0 : index
    %0 = vector.load %arg3[%c0, %c0_0, %c0_1, %c0_2, %c0_3] : memref<1x16x1x8x32xbf16, #tpu.memory_space<vmem>>, vector<1x16x1x8x32xbf16>
    %1 = vector.shape_cast %0 : vector<1x16x1x8x32xbf16> to vector<16x8x32xbf16>
    %2 = arith.extf %1 : vector<16x8x32xbf16> to vector<16x8x32xf32>
    %3 = vector.shape_cast %2 : vector<16x8x32xf32> to vector<128x32xf32>
    %c0_4 = arith.constant 0 : index
    %c0_5 = arith.constant 0 : index
    %c0_6 = arith.constant 0 : index
    %4 = vector.load %arg4[%c0_4, %c0_5, %c0_6] : memref<1x4x32xf32, #tpu.memory_space<vmem>>, vector<1x1x32xf32>
    %5 = vector.shape_cast %4 : vector<1x1x32xf32> to vector<32xf32>
    %c0_7 = arith.constant 0 : index
    %c1 = arith.constant 1 : index
    %c0_8 = arith.constant 0 : index
    %6 = vector.load %arg4[%c0_7, %c1, %c0_8] : memref<1x4x32xf32, #tpu.memory_space<vmem>>, vector<1x1x32xf32>
    %7 = vector.shape_cast %6 : vector<1x1x32xf32> to vector<32xf32>
    %c0_9 = arith.constant 0 : index
    %c2 = arith.constant 2 : index
    %c0_10 = arith.constant 0 : index
    %8 = vector.load %arg4[%c0_9, %c2, %c0_10] : memref<1x4x32xf32, #tpu.memory_space<vmem>>, vector<1x1x32xf32>
    %9 = vector.shape_cast %8 : vector<1x1x32xf32> to vector<32xf32>
    %c0_11 = arith.constant 0 : index
    %c3 = arith.constant 3 : index
    %c0_12 = arith.constant 0 : index
    %10 = vector.load %arg4[%c0_11, %c3, %c0_12] : memref<1x4x32xf32, #tpu.memory_space<vmem>>, vector<1x1x32xf32>
    %11 = vector.shape_cast %10 : vector<1x1x32xf32> to vector<32xf32>
    %12 = vector.shape_cast %5 : vector<32xf32> to vector<1x32xf32>
    %13 = vector.broadcast %12 : vector<1x32xf32> to vector<128x32xf32>
    %14 = arith.mulf %3, %13 : vector<128x32xf32>
    %15 = vector.shape_cast %7 : vector<32xf32> to vector<1x32xf32>
    %16 = vector.broadcast %15 : vector<1x32xf32> to vector<128x32xf32>
    %17 = arith.addf %14, %16 : vector<128x32xf32>
    %18 = arith.truncf %17 : vector<128x32xf32> to vector<128x32xbf16>
    %c0_13 = arith.constant 0 : index
    %c0_14 = arith.constant 0 : index
    %19 = vector.load %arg5[%c0_13, %c0_14] : memref<32x96xbf16, #tpu.memory_space<vmem>>, vector<32x96xbf16>
    %cst = arith.constant dense<0.000000e+00> : vector<128x96xf32>
    %20 = tpu.matmul %18, %19, %cst {dimension_numbers = #tpu.dot_dimension_numbers<[1], [0], [0], [1], [0, 0, 1, 1], [], []>} : vector<128x32xbf16>, vector<32x96xbf16>, vector<128x96xf32> -> vector<128x96xf32>
    %c0_15 = arith.constant 0 : index
    %c0_16 = arith.constant 0 : index
    %21 = vector.load %arg6[%c0_15, %c0_16] : memref<1x96xf32, #tpu.memory_space<vmem>>, vector<1x96xf32>
    %22 = vector.broadcast %21 : vector<1x96xf32> to vector<128x96xf32>
    %23 = arith.addf %20, %22 : vector<128x96xf32>
    %24 = vector.shape_cast %23 : vector<128x96xf32> to vector<2x64x96xf32>
    %c0_17 = arith.constant 0 : index
    %c0_18 = arith.constant 0 : index
    %c0_19 = arith.constant 0 : index
    %25 = vector.load %arg13[%c0_17, %c0_18, %c0_19] : memref<4x64x64xf32, #tpu.memory_space<vmem>>, vector<4x64x64xf32>
    %26 = vector.extract_strided_slice %24 {offsets = [0, 0, 0], sizes = [2, 64, 8], strides = [1, 1, 1]} : vector<2x64x96xf32> to vector<2x64x8xf32>
    %27 = arith.truncf %26 : vector<2x64x8xf32> to vector<2x64x8xbf16>
    %28 = vector.extract_strided_slice %24 {offsets = [0, 0, 32], sizes = [2, 64, 8], strides = [1, 1, 1]} : vector<2x64x96xf32> to vector<2x64x8xf32>
    %29 = arith.truncf %28 : vector<2x64x8xf32> to vector<2x64x8xbf16>
    %30 = vector.extract_strided_slice %24 {offsets = [0, 0, 64], sizes = [2, 64, 8], strides = [1, 1, 1]} : vector<2x64x96xf32> to vector<2x64x8xf32>
    %31 = arith.truncf %30 : vector<2x64x8xf32> to vector<2x64x8xbf16>
    "tpu.trace_start"() <{level = 10 : i32, message = "rqd,rkd->rqk"}> : () -> ()
    %cst_20 = arith.constant dense<0.000000e+00> : vector<2x64x64xf32>
    %32 = tpu.matmul %27, %29, %cst_20 {dimension_numbers = #tpu.dot_dimension_numbers<[2], [2], [1], [1], [0, 0, 0, 1, 1, 1], [0], [0]>} : vector<2x64x8xbf16>, vector<2x64x8xbf16>, vector<2x64x64xf32> -> vector<2x64x64xf32>
    "tpu.trace_stop"() : () -> ()
    %33 = vector.extract_strided_slice %25 {offsets = [0, 0, 0], sizes = [1, 64, 64], strides = [1, 1, 1]} : vector<4x64x64xf32> to vector<1x64x64xf32>
    %34 = vector.shape_cast %33 : vector<1x64x64xf32> to vector<64x64xf32>
    %35 = vector.shape_cast %34 : vector<64x64xf32> to vector<1x64x64xf32>
    %36 = vector.broadcast %35 : vector<1x64x64xf32> to vector<2x64x64xf32>
    %37 = arith.addf %32, %36 : vector<2x64x64xf32>
    %cst_21 = arith.constant dense<0xFF800000> : vector<2x64xf32>
    %38 = vector.multi_reduction <maximumf>, %37, %cst_21 [2] : vector<2x64x64xf32> to vector<2x64xf32>
    %39 = vector.shape_cast %38 : vector<2x64xf32> to vector<2x64x1xf32>
    %40 = vector.broadcast %39 : vector<2x64x1xf32> to vector<2x64x64xf32>
    %41 = arith.subf %37, %40 : vector<2x64x64xf32>
    %42 = math.exp %41 : vector<2x64x64xf32>
    %cst_22 = arith.constant dense<0.000000e+00> : vector<2x64xf32>
    %43 = vector.multi_reduction <add>, %42, %cst_22 [2] : vector<2x64x64xf32> to vector<2x64xf32>
    %44 = vector.shape_cast %43 : vector<2x64xf32> to vector<2x64x1xf32>
    %45 = tpu.reciprocal %44 {approx = true} : vector<2x64x1xf32> -> vector<2x64x1xf32>
    %46 = vector.broadcast %45 : vector<2x64x1xf32> to vector<2x64x64xf32>
    %47 = arith.mulf %42, %46 : vector<2x64x64xf32>
    %48 = arith.truncf %47 : vector<2x64x64xf32> to vector<2x64x64xbf16>
    "tpu.trace_start"() <{level = 10 : i32, message = "rqk,rkd->rqd"}> : () -> ()
    %cst_23 = arith.constant dense<0.000000e+00> : vector<2x64x8xf32>
    %49 = tpu.matmul %48, %31, %cst_23 {dimension_numbers = #tpu.dot_dimension_numbers<[2], [1], [1], [2], [0, 0, 0, 1, 1, 2], [0], [0]>} : vector<2x64x64xbf16>, vector<2x64x8xbf16>, vector<2x64x8xf32> -> vector<2x64x8xf32>
    "tpu.trace_stop"() : () -> ()
    %50 = vector.extract_strided_slice %24 {offsets = [0, 0, 8], sizes = [2, 64, 8], strides = [1, 1, 1]} : vector<2x64x96xf32> to vector<2x64x8xf32>
    %51 = arith.truncf %50 : vector<2x64x8xf32> to vector<2x64x8xbf16>
    %52 = vector.extract_strided_slice %24 {offsets = [0, 0, 40], sizes = [2, 64, 8], strides = [1, 1, 1]} : vector<2x64x96xf32> to vector<2x64x8xf32>
    %53 = arith.truncf %52 : vector<2x64x8xf32> to vector<2x64x8xbf16>
    %54 = vector.extract_strided_slice %24 {offsets = [0, 0, 72], sizes = [2, 64, 8], strides = [1, 1, 1]} : vector<2x64x96xf32> to vector<2x64x8xf32>
    %55 = arith.truncf %54 : vector<2x64x8xf32> to vector<2x64x8xbf16>
    "tpu.trace_start"() <{level = 10 : i32, message = "rqd,rkd->rqk"}> : () -> ()
    %cst_24 = arith.constant dense<0.000000e+00> : vector<2x64x64xf32>
    %56 = tpu.matmul %51, %53, %cst_24 {dimension_numbers = #tpu.dot_dimension_numbers<[2], [2], [1], [1], [0, 0, 0, 1, 1, 1], [0], [0]>} : vector<2x64x8xbf16>, vector<2x64x8xbf16>, vector<2x64x64xf32> -> vector<2x64x64xf32>
    "tpu.trace_stop"() : () -> ()
    %57 = vector.extract_strided_slice %25 {offsets = [1, 0, 0], sizes = [1, 64, 64], strides = [1, 1, 1]} : vector<4x64x64xf32> to vector<1x64x64xf32>
    %58 = vector.shape_cast %57 : vector<1x64x64xf32> to vector<64x64xf32>
    %59 = vector.shape_cast %58 : vector<64x64xf32> to vector<1x64x64xf32>
    %60 = vector.broadcast %59 : vector<1x64x64xf32> to vector<2x64x64xf32>
    %61 = arith.addf %56, %60 : vector<2x64x64xf32>
    %cst_25 = arith.constant dense<0xFF800000> : vector<2x64xf32>
    %62 = vector.multi_reduction <maximumf>, %61, %cst_25 [2] : vector<2x64x64xf32> to vector<2x64xf32>
    %63 = vector.shape_cast %62 : vector<2x64xf32> to vector<2x64x1xf32>
    %64 = vector.broadcast %63 : vector<2x64x1xf32> to vector<2x64x64xf32>
    %65 = arith.subf %61, %64 : vector<2x64x64xf32>
    %66 = math.exp %65 : vector<2x64x64xf32>
    %cst_26 = arith.constant dense<0.000000e+00> : vector<2x64xf32>
    %67 = vector.multi_reduction <add>, %66, %cst_26 [2] : vector<2x64x64xf32> to vector<2x64xf32>
    %68 = vector.shape_cast %67 : vector<2x64xf32> to vector<2x64x1xf32>
    %69 = tpu.reciprocal %68 {approx = true} : vector<2x64x1xf32> -> vector<2x64x1xf32>
    %70 = vector.broadcast %69 : vector<2x64x1xf32> to vector<2x64x64xf32>
    %71 = arith.mulf %66, %70 : vector<2x64x64xf32>
    %72 = arith.truncf %71 : vector<2x64x64xf32> to vector<2x64x64xbf16>
    "tpu.trace_start"() <{level = 10 : i32, message = "rqk,rkd->rqd"}> : () -> ()
    %cst_27 = arith.constant dense<0.000000e+00> : vector<2x64x8xf32>
    %73 = tpu.matmul %72, %55, %cst_27 {dimension_numbers = #tpu.dot_dimension_numbers<[2], [1], [1], [2], [0, 0, 0, 1, 1, 2], [0], [0]>} : vector<2x64x64xbf16>, vector<2x64x8xbf16>, vector<2x64x8xf32> -> vector<2x64x8xf32>
    "tpu.trace_stop"() : () -> ()
    %74 = vector.extract_strided_slice %24 {offsets = [0, 0, 16], sizes = [2, 64, 8], strides = [1, 1, 1]} : vector<2x64x96xf32> to vector<2x64x8xf32>
    %75 = arith.truncf %74 : vector<2x64x8xf32> to vector<2x64x8xbf16>
    %76 = vector.extract_strided_slice %24 {offsets = [0, 0, 48], sizes = [2, 64, 8], strides = [1, 1, 1]} : vector<2x64x96xf32> to vector<2x64x8xf32>
    %77 = arith.truncf %76 : vector<2x64x8xf32> to vector<2x64x8xbf16>
    %78 = vector.extract_strided_slice %24 {offsets = [0, 0, 80], sizes = [2, 64, 8], strides = [1, 1, 1]} : vector<2x64x96xf32> to vector<2x64x8xf32>
    %79 = arith.truncf %78 : vector<2x64x8xf32> to vector<2x64x8xbf16>
    "tpu.trace_start"() <{level = 10 : i32, message = "rqd,rkd->rqk"}> : () -> ()
    %cst_28 = arith.constant dense<0.000000e+00> : vector<2x64x64xf32>
    %80 = tpu.matmul %75, %77, %cst_28 {dimension_numbers = #tpu.dot_dimension_numbers<[2], [2], [1], [1], [0, 0, 0, 1, 1, 1], [0], [0]>} : vector<2x64x8xbf16>, vector<2x64x8xbf16>, vector<2x64x64xf32> -> vector<2x64x64xf32>
    "tpu.trace_stop"() : () -> ()
    %81 = vector.extract_strided_slice %25 {offsets = [2, 0, 0], sizes = [1, 64, 64], strides = [1, 1, 1]} : vector<4x64x64xf32> to vector<1x64x64xf32>
    %82 = vector.shape_cast %81 : vector<1x64x64xf32> to vector<64x64xf32>
    %83 = vector.shape_cast %82 : vector<64x64xf32> to vector<1x64x64xf32>
    %84 = vector.broadcast %83 : vector<1x64x64xf32> to vector<2x64x64xf32>
    %85 = arith.addf %80, %84 : vector<2x64x64xf32>
    %cst_29 = arith.constant dense<0xFF800000> : vector<2x64xf32>
    %86 = vector.multi_reduction <maximumf>, %85, %cst_29 [2] : vector<2x64x64xf32> to vector<2x64xf32>
    %87 = vector.shape_cast %86 : vector<2x64xf32> to vector<2x64x1xf32>
    %88 = vector.broadcast %87 : vector<2x64x1xf32> to vector<2x64x64xf32>
    %89 = arith.subf %85, %88 : vector<2x64x64xf32>
    %90 = math.exp %89 : vector<2x64x64xf32>
    %cst_30 = arith.constant dense<0.000000e+00> : vector<2x64xf32>
    %91 = vector.multi_reduction <add>, %90, %cst_30 [2] : vector<2x64x64xf32> to vector<2x64xf32>
    %92 = vector.shape_cast %91 : vector<2x64xf32> to vector<2x64x1xf32>
    %93 = tpu.reciprocal %92 {approx = true} : vector<2x64x1xf32> -> vector<2x64x1xf32>
    %94 = vector.broadcast %93 : vector<2x64x1xf32> to vector<2x64x64xf32>
    %95 = arith.mulf %90, %94 : vector<2x64x64xf32>
    %96 = arith.truncf %95 : vector<2x64x64xf32> to vector<2x64x64xbf16>
    "tpu.trace_start"() <{level = 10 : i32, message = "rqk,rkd->rqd"}> : () -> ()
    %cst_31 = arith.constant dense<0.000000e+00> : vector<2x64x8xf32>
    %97 = tpu.matmul %96, %79, %cst_31 {dimension_numbers = #tpu.dot_dimension_numbers<[2], [1], [1], [2], [0, 0, 0, 1, 1, 2], [0], [0]>} : vector<2x64x64xbf16>, vector<2x64x8xbf16>, vector<2x64x8xf32> -> vector<2x64x8xf32>
    "tpu.trace_stop"() : () -> ()
    %98 = vector.extract_strided_slice %24 {offsets = [0, 0, 24], sizes = [2, 64, 8], strides = [1, 1, 1]} : vector<2x64x96xf32> to vector<2x64x8xf32>
    %99 = arith.truncf %98 : vector<2x64x8xf32> to vector<2x64x8xbf16>
    %100 = vector.extract_strided_slice %24 {offsets = [0, 0, 56], sizes = [2, 64, 8], strides = [1, 1, 1]} : vector<2x64x96xf32> to vector<2x64x8xf32>
    %101 = arith.truncf %100 : vector<2x64x8xf32> to vector<2x64x8xbf16>
    %102 = vector.extract_strided_slice %24 {offsets = [0, 0, 88], sizes = [2, 64, 8], strides = [1, 1, 1]} : vector<2x64x96xf32> to vector<2x64x8xf32>
    %103 = arith.truncf %102 : vector<2x64x8xf32> to vector<2x64x8xbf16>
    "tpu.trace_start"() <{level = 10 : i32, message = "rqd,rkd->rqk"}> : () -> ()
    %cst_32 = arith.constant dense<0.000000e+00> : vector<2x64x64xf32>
    %104 = tpu.matmul %99, %101, %cst_32 {dimension_numbers = #tpu.dot_dimension_numbers<[2], [2], [1], [1], [0, 0, 0, 1, 1, 1], [0], [0]>} : vector<2x64x8xbf16>, vector<2x64x8xbf16>, vector<2x64x64xf32> -> vector<2x64x64xf32>
    "tpu.trace_stop"() : () -> ()
    %105 = vector.extract_strided_slice %25 {offsets = [3, 0, 0], sizes = [1, 64, 64], strides = [1, 1, 1]} : vector<4x64x64xf32> to vector<1x64x64xf32>
    %106 = vector.shape_cast %105 : vector<1x64x64xf32> to vector<64x64xf32>
    %107 = vector.shape_cast %106 : vector<64x64xf32> to vector<1x64x64xf32>
    %108 = vector.broadcast %107 : vector<1x64x64xf32> to vector<2x64x64xf32>
    %109 = arith.addf %104, %108 : vector<2x64x64xf32>
    %cst_33 = arith.constant dense<0xFF800000> : vector<2x64xf32>
    %110 = vector.multi_reduction <maximumf>, %109, %cst_33 [2] : vector<2x64x64xf32> to vector<2x64xf32>
    %111 = vector.shape_cast %110 : vector<2x64xf32> to vector<2x64x1xf32>
    %112 = vector.broadcast %111 : vector<2x64x1xf32> to vector<2x64x64xf32>
    %113 = arith.subf %109, %112 : vector<2x64x64xf32>
    %114 = math.exp %113 : vector<2x64x64xf32>
    %cst_34 = arith.constant dense<0.000000e+00> : vector<2x64xf32>
    %115 = vector.multi_reduction <add>, %114, %cst_34 [2] : vector<2x64x64xf32> to vector<2x64xf32>
    %116 = vector.shape_cast %115 : vector<2x64xf32> to vector<2x64x1xf32>
    %117 = tpu.reciprocal %116 {approx = true} : vector<2x64x1xf32> -> vector<2x64x1xf32>
    %118 = vector.broadcast %117 : vector<2x64x1xf32> to vector<2x64x64xf32>
    %119 = arith.mulf %114, %118 : vector<2x64x64xf32>
    %120 = arith.truncf %119 : vector<2x64x64xf32> to vector<2x64x64xbf16>
    "tpu.trace_start"() <{level = 10 : i32, message = "rqk,rkd->rqd"}> : () -> ()
    %cst_35 = arith.constant dense<0.000000e+00> : vector<2x64x8xf32>
    %121 = tpu.matmul %120, %103, %cst_35 {dimension_numbers = #tpu.dot_dimension_numbers<[2], [1], [1], [2], [0, 0, 0, 1, 1, 2], [0], [0]>} : vector<2x64x64xbf16>, vector<2x64x8xbf16>, vector<2x64x8xf32> -> vector<2x64x8xf32>
    "tpu.trace_stop"() : () -> ()
    %122 = tpu.concatenate %49, %73, %97, %121 in 2 : vector<2x64x8xf32>, vector<2x64x8xf32>, vector<2x64x8xf32>, vector<2x64x8xf32> -> vector<2x64x32xf32>
    %123 = vector.shape_cast %122 : vector<2x64x32xf32> to vector<128x32xf32>
    %124 = arith.truncf %123 : vector<128x32xf32> to vector<128x32xbf16>
    %c0_36 = arith.constant 0 : index
    %c0_37 = arith.constant 0 : index
    %125 = vector.load %arg7[%c0_36, %c0_37] : memref<32x32xbf16, #tpu.memory_space<vmem>>, vector<32x32xbf16>
    %cst_38 = arith.constant dense<0.000000e+00> : vector<128x32xf32>
    %126 = tpu.matmul %124, %125, %cst_38 {dimension_numbers = #tpu.dot_dimension_numbers<[1], [0], [0], [1], [0, 0, 1, 1], [], []>} : vector<128x32xbf16>, vector<32x32xbf16>, vector<128x32xf32> -> vector<128x32xf32>
    %c0_39 = arith.constant 0 : index
    %c0_40 = arith.constant 0 : index
    %127 = vector.load %arg8[%c0_39, %c0_40] : memref<1x32xf32, #tpu.memory_space<vmem>>, vector<1x32xf32>
    %128 = vector.broadcast %127 : vector<1x32xf32> to vector<128x32xf32>
    %129 = arith.addf %126, %128 : vector<128x32xf32>
    %130 = vector.shape_cast %9 : vector<32xf32> to vector<1x32xf32>
    %131 = vector.broadcast %130 : vector<1x32xf32> to vector<128x32xf32>
    %132 = arith.mulf %129, %131 : vector<128x32xf32>
    %133 = arith.addf %3, %132 : vector<128x32xf32>
    %134 = vector.shape_cast %11 : vector<32xf32> to vector<1x32xf32>
    %135 = vector.broadcast %134 : vector<1x32xf32> to vector<128x32xf32>
    %136 = arith.addf %133, %135 : vector<128x32xf32>
    %137 = arith.truncf %136 : vector<128x32xf32> to vector<128x32xbf16>
    %c0_41 = arith.constant 0 : index
    %c0_42 = arith.constant 0 : index
    %138 = vector.load %arg9[%c0_41, %c0_42] : memref<32x128xbf16, #tpu.memory_space<vmem>>, vector<32x128xbf16>
    %cst_43 = arith.constant dense<0.000000e+00> : vector<128x128xf32>
    %139 = tpu.matmul %137, %138, %cst_43 {dimension_numbers = #tpu.dot_dimension_numbers<[1], [0], [0], [1], [0, 0, 1, 1], [], []>} : vector<128x32xbf16>, vector<32x128xbf16>, vector<128x128xf32> -> vector<128x128xf32>
    %c0_44 = arith.constant 0 : index
    %c0_45 = arith.constant 0 : index
    %140 = vector.load %arg10[%c0_44, %c0_45] : memref<1x128xf32, #tpu.memory_space<vmem>>, vector<1x128xf32>
    %141 = vector.broadcast %140 : vector<1x128xf32> to vector<128x128xf32>
    %142 = arith.addf %139, %141 : vector<128x128xf32>
    %cst_46 = arith.constant 0.000000e+00 : f32
    %143 = vector.broadcast %cst_46 : f32 to vector<128x128xf32>
    %144 = arith.maximumf %142, %143 : vector<128x128xf32>
    %145 = arith.truncf %144 : vector<128x128xf32> to vector<128x128xbf16>
    %c0_47 = arith.constant 0 : index
    %c0_48 = arith.constant 0 : index
    %146 = vector.load %arg11[%c0_47, %c0_48] : memref<128x32xbf16, #tpu.memory_space<vmem>>, vector<128x32xbf16>
    %cst_49 = arith.constant dense<0.000000e+00> : vector<128x32xf32>
    %147 = tpu.matmul %145, %146, %cst_49 {dimension_numbers = #tpu.dot_dimension_numbers<[1], [0], [0], [1], [0, 0, 1, 1], [], []>} : vector<128x128xbf16>, vector<128x32xbf16>, vector<128x32xf32> -> vector<128x32xf32>
    %c0_50 = arith.constant 0 : index
    %c0_51 = arith.constant 0 : index
    %148 = vector.load %arg12[%c0_50, %c0_51] : memref<1x32xf32, #tpu.memory_space<vmem>>, vector<1x32xf32>
    %149 = vector.broadcast %148 : vector<1x32xf32> to vector<128x32xf32>
    %150 = arith.addf %147, %149 : vector<128x32xf32>
    %151 = arith.addf %136, %150 : vector<128x32xf32>
    %152 = vector.shape_cast %151 : vector<128x32xf32> to vector<16x8x32xf32>
    %153 = arith.truncf %152 : vector<16x8x32xf32> to vector<16x8x32xbf16>
    %c0_52 = arith.constant 0 : index
    %c0_53 = arith.constant 0 : index
    %c0_54 = arith.constant 0 : index
    %c0_55 = arith.constant 0 : index
    %c0_56 = arith.constant 0 : index
    %154 = vector.load %arg14[%c0_52, %c0_53, %c0_54, %c0_55, %c0_56] : memref<1x16x1x8x32xbf16, #tpu.memory_space<vmem>>, vector<1x16x1x8x32xbf16>
    %155 = vector.shape_cast %154 : vector<1x16x1x8x32xbf16> to vector<16x8x32xbf16>
    %156 = vector.shape_cast %153 : vector<16x8x32xbf16> to vector<1x16x1x8x32xbf16>
    tpu.vector_store %arg14[%c0_52, %c0_53, %c0_54, %c0_55, %c0_56], %156 {strides = array<i32>} : memref<1x16x1x8x32xbf16, #tpu.memory_space<vmem>>, vector<1x16x1x8x32xbf16>,
    return
  }
  func.func @transform_0(%arg0: i32, %arg1: i32, %arg2: i32) -> (i32, i32, i32, i32, i32) {
    %c0_i32 = arith.constant 0 : i32
    %c0_i32_0 = arith.constant 0 : i32
    %c0_i32_1 = arith.constant 0 : i32
    return %arg0, %arg1, %arg2, %c0_i32, %c0_i32_0 : i32, i32, i32, i32, i32
  }
  func.func @transform_1(%arg0: i32, %arg1: i32, %arg2: i32) -> (i32, i32, i32) {
    %c0_i32 = arith.constant 0 : i32
    %c0_i32_0 = arith.constant 0 : i32
    %c0_i32_1 = arith.constant 0 : i32
    return %arg0, %c0_i32, %c0_i32_0 : i32, i32, i32
  }
  func.func @transform_2(%arg0: i32, %arg1: i32, %arg2: i32) -> (i32, i32) {
    %c0_i32 = arith.constant 0 : i32
    %c0_i32_0 = arith.constant 0 : i32
    %c0_i32_1 = arith.constant 0 : i32
    return %c0_i32, %c0_i32_0 : i32, i32
  }
  func.func @transform_3(%arg0: i32, %arg1: i32, %arg2: i32) -> (i32, i32) {
    %c0_i32 = arith.constant 0 : i32
    %c0_i32_0 = arith.constant 0 : i32
    %c0_i32_1 = arith.constant 0 : i32
    return %c0_i32, %c0_i32_0 : i32, i32
  }
  func.func @transform_4(%arg0: i32, %arg1: i32, %arg2: i32) -> (i32, i32) {
    %c0_i32 = arith.constant 0 : i32
    %c0_i32_0 = arith.constant 0 : i32
    %c0_i32_1 = arith.constant 0 : i32
    return %c0_i32, %c0_i32_0 : i32, i32
  }
  func.func @transform_5(%arg0: i32, %arg1: i32, %arg2: i32) -> (i32, i32) {
    %c0_i32 = arith.constant 0 : i32
    %c0_i32_0 = arith.constant 0 : i32
    %c0_i32_1 = arith.constant 0 : i32
    return %c0_i32, %c0_i32_0 : i32, i32
  }
  func.func @transform_6(%arg0: i32, %arg1: i32, %arg2: i32) -> (i32, i32) {
    %c0_i32 = arith.constant 0 : i32
    %c0_i32_0 = arith.constant 0 : i32
    %c0_i32_1 = arith.constant 0 : i32
    return %c0_i32, %c0_i32_0 : i32, i32
  }
  func.func @transform_7(%arg0: i32, %arg1: i32, %arg2: i32) -> (i32, i32) {
    %c0_i32 = arith.constant 0 : i32
    %c0_i32_0 = arith.constant 0 : i32
    %c0_i32_1 = arith.constant 0 : i32
    return %c0_i32, %c0_i32_0 : i32, i32
  }
  func.func @transform_8(%arg0: i32, %arg1: i32, %arg2: i32) -> (i32, i32) {
    %c0_i32 = arith.constant 0 : i32
    %c0_i32_0 = arith.constant 0 : i32
    %c0_i32_1 = arith.constant 0 : i32
    return %c0_i32, %c0_i32_0 : i32, i32
  }
  func.func @transform_9(%arg0: i32, %arg1: i32, %arg2: i32) -> (i32, i32) {
    %c0_i32 = arith.constant 0 : i32
    %c0_i32_0 = arith.constant 0 : i32
    %c0_i32_1 = arith.constant 0 : i32
    return %c0_i32, %c0_i32_0 : i32, i32
  }
  func.func @transform_10(%arg0: i32, %arg1: i32, %arg2: i32) -> (i32, i32, i32) {
    %c0_i32 = arith.constant 0 : i32
    %c0_i32_0 = arith.constant 0 : i32
    %c0_i32_1 = arith.constant 0 : i32
    %c0_i32_2 = arith.constant 0 : i32
    return %c0_i32, %c0_i32_0, %c0_i32_1 : i32, i32, i32
  }
  func.func @transform_11(%arg0: i32, %arg1: i32, %arg2: i32) -> (i32, i32, i32, i32, i32) {
    %c0_i32 = arith.constant 0 : i32
    %c0_i32_0 = arith.constant 0 : i32
    %c0_i32_1 = arith.constant 0 : i32
    return %arg0, %arg1, %arg2, %c0_i32, %c0_i32_0 : i32, i32, i32, i32, i32
  }
}

</mosaic_0001>

<bundles_post_ra>
// kernel: transformer_block_forward.1
= control target key start
LH: loop header
LB: loop body
LE: loop exit
PB: predicated region body
PF: predicated region fallthrough
CT: control target
= control target key end

     0   :  { %s7346_s0 = inlined_call_operand.vmem [shape: bf16[2,16,2,8,32], index: 0, kind: input, shape index: {}]   ;;  %s7347_s1 = inlined_call_operand.vmem [shape: f32[2,4,32], index: 1, kind: input, shape index: {}]   ;;  %s7348_s2 = inlined_call_operand.vmem [shape: bf16[32,96], index: 2, kind: input, shape index: {}]   ;;  %s7349_s3 = inlined_call_operand.vmem [shape: f32[1,96], index: 3, kind: input, shape index: {}]   ;;  %s7350_s4 = inlined_call_operand.vmem [shape: bf16[32,32], index: 4, kind: input, shape index: {}]   ;;  %s7351_s5 = inlined_call_operand.vmem [shape: f32[1,32], index: 5, kind: input, shape index: {}]   ;;  %s7352_s6 = inlined_call_operand.vmem [shape: bf16[32,128], index: 6, kind: input, shape index: {}]   ;;  %s7353_s7 = inlined_call_operand.vmem [shape: f32[1,128], index: 7, kind: input, shape index: {}]   ;;  %s7354_s8 = inlined_call_operand.vmem [shape: bf16[128,32], index: 8, kind: input, shape index: {}]   ;;  %s7355_s9 = inlined_call_operand.vmem [shape: f32[1,32], index: 9, kind: input, shape index: {}]   ;;  %s7356_s10 = inlined_call_operand.vmem [shape: f32[4,64,64], index: 10, kind: input, shape index: {}]   ;;  %s7357_s11 = inlined_call_operand.hbm [shape: bf16[2,16,2,8,32], index: 11, kind: output, shape index: {}]  }
   0x1   :  { %7406 = sst [smem:[#allocation44_spill]] %s7357_s11 }
   0x2   :  { %16 = vsyncpa [#allocation4], 0 }
   0x3   :  { %18 = vsyncpa [#allocation4 + $0x1], 0  ;;  %s5421_s17 = smov 0   ;;  %s5423_s18 = smov 0  }
   0x4   :  { %s5425_s19 = smov 0   ;;  %s5427_s20 = smov 0  }
   0x5   :  { %s5429_s21 = smov 0   ;;  %s5431_s22 = smov 0  }
   0x6   :  { %s5433_s23 = smov 0   ;;  %s5435_s24 = smov 0  }
   0x7 LB: > { %7407 = sst [smem:[#allocation6_spill]] %s5314_s17  ;;  %s4052_s25 = sadd.s32 4294967295, %s5342_s24   ;;  %s5342_s24 = sphi %s5435_s24, %s24_s24   ;;  %s5338_s23 = sphi %s5433_s23, %s7526_s23   ;;  %s5334_s22 = sphi %s5431_s22, %s7525_s22   ;;  %s5330_s21 = sphi %s5429_s21, %s7524_s21   ;;  %s5326_s20 = sphi %s5427_s20, %s7523_s20   ;;  %s5322_s19 = sphi %s5425_s19, %s7522_s19   ;;  %s5318_s18 = sphi %s5423_s18, %s7521_s18   ;;  %s5314_s17 = sphi %s5421_s17, %s7520_s17  }
   0x8   : > { %s4053_s26 = sadd.s32 4294967294, %s5342_s24   ;;  %s36_s27 = sadd.s32 1, %s5334_s22 }
   0x9   : > { %p37_p0 = scmp.ge.s32.totalorder %s36_s27, 2  ;;  %s43_s28 = sadd.s32 1, %s5338_s23 }
   0xa   : > { %p61_p1 = scmp.ne.s32.totalorder %s5322_s19, %s5318_s18  ;;  %p62_p2 = scmp.eq.s32.totalorder %s5342_s24, 0 }
   0xb   : > { %s7528_s27 = smov (%p37_p0, %s36_s27), 0  ;;  %s7530_s28 = smov (!%p37_p0, %s43_s28), %s5338_s23 }
   0xc   : > { %7408 = sst [smem:[#allocation7_spill]] %s7528_s27  ;;  %s50_s29 = ssub.s32 %s5334_s22, %s7528_s27 }
   0xd   : > { %p5473_p3 = por %p62_p2, %p61_p1  ;;  %p45_p4 = scmp.ge.s32.totalorder %s7530_s28, 2 }
   0xe   : > { %p310_p5 = scmp.eq.s32.totalorder %s4052_s25, 3  ;;  %p315_p6 = scmp.ne.s32.totalorder %s5318_s18, %s5314_s17 }
   0xf   : > { %p316_p7 = scmp.eq.s32.totalorder %s4053_s26, 3  ;;  %s7532_s28 = smov (%p45_p4, %s7530_s28), 0 }
  0x10   : > { %7410 = sst [smem:[#allocation8_spill]] %s7532_s28  ;;  %p5481_p8 = por %p310_p5, %p61_p1 }
  0x11   : > { %p5485_p9 = por %p316_p7, %p315_p6  ;;  %s47_s14 = ssub.s32 %s5338_s23, %s7532_s28 }
  0x12   : > { %s51_s15 = sor.u32 %s50_s29, %s47_s14  ;;  %s54_s16 = sadd.s32 1, %s5322_s19 }
  0x13   : > { %s7412_s13 = scalar_select %p5485_p9, 1, 0 }
  0x14   : > { %p52_p10 = scmp.eq.s32.totalorder %s51_s15, 0  ;;  %p4055_p11 = scmp.ge.s32.totalorder %s5342_s24, 4 }
  0x15   : > { %7413 = sst [smem:[#allocation9_spill]] %s7412_s13 }
  0x16   : > { %s5493_s27 = scalar_select %p52_p10, %s5322_s19, %s54_s16  }
  0x17   : > { %359 = sbr.rel (%p4055_p11) target bundleno = 46 (0x2e), region = 52 }
  0x1e   : > { %362 = sbr.rel (!%p5473_p3) target bundleno = 46 (0x2e), region = 56  ;;  %s364_s25 = sand.u32 (%p5473_p3), 1, %s5322_s19  }
  0x1f   : > { %s4057_s26 = sshll.u32 (%p5473_p3), %s5338_s23, 5  ;;  %s4056_s17 = sshll.u32 (%p5473_p3), %s364_s25, 6 }
  0x20   : > { %s371_s11 = sadd.s32 (%p5473_p3), %s5334_s22, %s4057_s26  ;;  %s366_s30 = scalar_lea.vmem (%p5473_p3), [#allocation2], %s4056_s17 }
  0x21   : > { %s4058_s13 = sshll.u32 (%p5473_p3), %s371_s11, 2 }
  0x22   : > { %s5504_s14 = scalar_lea.vmem (%p5473_p3), %s7346_s0, %s4058_s13 }
  0x23   : > { %v389_v0 = vld [vmem:[%s5504_s14] sm:$0xf] (%p5473_p3)  ;;  %v391_v1 = vld [vmem:[%s5504_s14 + $0x8] sm:$0xf] (%p5473_p3)  ;;  %v393_v2 = vld [vmem:[%s5504_s14 + $0x10] sm:$0xf] (%p5473_p3) }
  0x24   : > { %390 = vst [vmem:[%s366_s30] sm:$0xf] (%p5473_p3), %v389_v0  ;;  %392 = vst [vmem:[%s366_s30 + $0x4] sm:$0xf] (%p5473_p3), %v391_v1  ;;  %v395_v3 = vld [vmem:[%s5504_s14 + $0x18] sm:$0xf] (%p5473_p3) }
  0x25   : > { %394 = vst [vmem:[%s366_s30 + $0x8] sm:$0xf] %v393_v2  ;;  %v397_v4 = vld [vmem:[%s5504_s14 + $0x20] sm:$0xf]  ;;  %v399_v5 = vld [vmem:[%s5504_s14 + $0x28] sm:$0xf] }
  0x26   : > { %396 = vst [vmem:[%s366_s30 + $0xc] sm:$0xf] %v395_v3  ;;  %398 = vst [vmem:[%s366_s30 + $0x10] sm:$0xf] %v397_v4  ;;  %v401_v6 = vld [vmem:[%s5504_s14 + $0x30] sm:$0xf] }
  0x27   : > { %400 = vst [vmem:[%s366_s30 + $0x14] sm:$0xf] %v399_v5  ;;  %v403_v7 = vld [vmem:[%s5504_s14 + $0x38] sm:$0xf]  ;;  %v405_v8 = vld [vmem:[%s5504_s14 + $0x40] sm:$0xf] }
  0x28   : > { %402 = vst [vmem:[%s366_s30 + $0x18] sm:$0xf] %v401_v6  ;;  %404 = vst [vmem:[%s366_s30 + $0x1c] sm:$0xf] %v403_v7  ;;  %v407_v9 = vld [vmem:[%s5504_s14 + $0x48] sm:$0xf] }
  0x29   : > { %406 = vst [vmem:[%s366_s30 + $0x20] sm:$0xf] %v405_v8  ;;  %v409_v10 = vld [vmem:[%s5504_s14 + $0x50] sm:$0xf]  ;;  %v411_v11 = vld [vmem:[%s5504_s14 + $0x58] sm:$0xf] }
  0x2a   : > { %408 = vst [vmem:[%s366_s30 + $0x24] sm:$0xf] %v407_v9  ;;  %410 = vst [vmem:[%s366_s30 + $0x28] sm:$0xf] %v409_v10  ;;  %v413_v12 = vld [vmem:[%s5504_s14 + $0x60] sm:$0xf] }
  0x2b   : > { %412 = vst [vmem:[%s366_s30 + $0x2c] sm:$0xf] %v411_v11  ;;  %v415_v13 = vld [vmem:[%s5504_s14 + $0x68] sm:$0xf]  ;;  %v417_v14 = vld [vmem:[%s5504_s14 + $0x70] sm:$0xf] }
  0x2c   : > { %414 = vst [vmem:[%s366_s30 + $0x30] sm:$0xf] %v413_v12  ;;  %416 = vst [vmem:[%s366_s30 + $0x34] sm:$0xf] %v415_v13  ;;  %v419_v15 = vld [vmem:[%s5504_s14 + $0x78] sm:$0xf] }
  0x2d   : > { %418 = vst [vmem:[%s366_s30 + $0x38] sm:$0xf] %v417_v14  ;;  %420 = vst [vmem:[%s366_s30 + $0x3c] sm:$0xf] %v419_v15 }
  0x2e PF: > { %p4059_p12 = scmp.ge.s32.totalorder %s5342_s24, 1  ;;  %p481_p13 = scmp.lt.s32.totalorder %s5342_s24, 5 }
  0x30   : > { %p482_p0 = pnand %p4059_p12, %p481_p13 }
  0x32   : > { %485 = sbr.rel (%p482_p0) target bundleno = 4351 (0x10ff), region = 101 }
  0x39   : > { %v4978_v16 = vld [vmem:[%s7348_s2] sm:$0xff]   ;;  %s488_s28 = sand.u32 1, %s5318_s18   ;;  %v4979_v17 = vld [vmem:[%s7348_s2 + $0x8] sm:$0xff]   ;;  %p532_p1 = scmp.lt.s32.totalorder %s5330_s21, 1  ;;  %vm645_vm0 = vcmask 261120   ;;  %vm819_vm1 = vcmask 64512  }
  0x3a   : > { %s5533_s16 = sshll.u32 %s488_s28, 6  ;;  %4391 = vmatprep.subr.bf16.mxu0 %v4978_v16  ;;  %s5344_s15 = smov 96   ;;  %vm1010_vm2 = vcmask 523264   ;;  %vm3297_vm3 = vcmask 130048   ;;  %vm3314_vm4 = vcmask 195584   ;;  %vm3915_vm5 = vcmask 257024  }
  0x3b   : > { %4392 = vmatpush3.bf16.msra.mxu0 %v4978_v16  ;;  %s5537_s25 = scalar_lea.vmem [#allocation2], %s5533_s16  ;;  %s5347_s13 = smov 120  }
  0x3c   : > { %v5540_v18 = vld [vmem:[%s5537_s25] sm:$0xff]   ;;  %v5543_v19 = vld [vmem:[%s5537_s25 + $0x8] sm:$0xff]   ;;  %4393 = vmatprep.subr.bf16.mxu0 %v4979_v17  ;;  %v5546_v20 = vld [vmem:[%s5537_s25 + $0x10] sm:$0xff]   ;;  %s533_s26 = scalar_select %p532_p1, %s5330_s21, 1 }
  0x3d   : > { %7414 = vst [vmem:[#allocation10_spill] sm:$0xff] %v5540_v18  ;;  %7415 = vst [vmem:[#allocation11_spill] sm:$0xff] %v5543_v19  ;;  %v5550_v21 = vld [vmem:[%s5537_s25 + $0x18] sm:$0xff]   ;;  %v5553_v22 = vld [vmem:[%s5537_s25 + $0x20] sm:$0xff]   ;;  %v7379_v23 = vunpack.c.l.bf16 %v5540_v18  ;;  %v7376_v24 = vunpack.c.h.bf16 %v5540_v18  ;;  %v7378_v25 = vunpack.c.l.bf16 %v5543_v19  ;;  %v7377_v26 = vunpack.c.h.bf16 %v5543_v19  ;;  %s5351_s14 = smov 48   ;;  %s5352_s30 = smov 72  }
  0x3e   : > { %7416 = vst [vmem:[#allocation12_spill] sm:$0xff] %v5546_v20  ;;  %7417 = vst [vmem:[#allocation13_spill] sm:$0xff] %v5550_v21  ;;  %s4062_s29 = sshll.u32 %s533_s26, 2  ;;  %v7375_v27 = vunpack.c.l.bf16 %v5546_v20  ;;  %v7372_v28 = vunpack.c.h.bf16 %v5546_v20  ;;  %v7374_v31 = vunpack.c.l.bf16 %v5550_v21  ;;  %v7373_v32 = vunpack.c.h.bf16 %v5550_v21  ;;  %v5593_v53 = vld [vmem:[%s5537_s25 + $0x28] sm:$0xff]   ;;  %v5596_v55 = vld [vmem:[%s5537_s25 + $0x30] sm:$0xff]   ;;  %s5346_s26 = smov 88  }
  0x3f   : > { %7418 = vst [vmem:[#allocation14_spill] sm:$0xff] %v5553_v22  ;;  %4394 = vmatpush3.bf16.msra.mxu0 %v4979_v17  ;;  %s5564_s11 = scalar_lea.vmem %s7347_s1, %s4062_s29  ;;  %v7371_v33 = vunpack.c.l.bf16 %v5553_v22  ;;  %v7367_v34 = vunpack.c.h.bf16 %v5553_v22  ;;  %7419 = vst [vmem:[#allocation15_spill] sm:$0xff] %v5593_v53  ;;  %v7370_v58 = vunpack.c.l.bf16 %v5593_v53  ;;  %v7369_v59 = vunpack.c.h.bf16 %v5593_v53  ;;  %v5614_v6 = vld [vmem:[%s5537_s25 + $0x38] sm:$0xff]   ;;  %s7368_s25 = smov 64  }
  0x40   : > { %v4063_v29 = vld [vmem:[%s5564_s11] ss:$0 sm:$0xff]  ;;  %v4064_v30 = vld [vmem:[%s5564_s11 + $0x1] ss:$0 sm:$0xff]  ;;  %7420 = vst [vmem:[#allocation16_spill] sm:$0xff] %v5596_v55  ;;  %v7366_v62 = vunpack.c.l.bf16 %v5596_v55  ;;  %v7363_v63 = vunpack.c.h.bf16 %v5596_v55  ;;  %7421 = vst [vmem:[#allocation17_spill] sm:$0xff] %v5614_v6  ;;  %v7365_v9 = vunpack.c.l.bf16 %v5614_v6  ;;  %v7364_v10 = vunpack.c.h.bf16 %v5614_v6 }
  0x41   : > { %v578_v35 = vmul.f32 %v7379_v23, %v4063_v29  ;;  %v579_v36 = vmul.f32 %v7376_v24, %v4063_v29  ;;  %v580_v37 = vmul.f32 %v7378_v25, %v4063_v29  ;;  %v581_v38 = vmul.f32 %v7377_v26, %v4063_v29  ;;  %s5350_s29 = smov 112   ;;  %s5353_s17 = smov 104  }
  0x42   : > { %v582_v39 = vmul.f32 %v7375_v27, %v4063_v29  ;;  %v583_v40 = vmul.f32 %v7372_v28, %v4063_v29  ;;  %v584_v47 = vmul.f32 %v7374_v31, %v4063_v29  ;;  %v585_v48 = vmul.f32 %v7373_v32, %v4063_v29 }
  0x43   : > { %v598_v41 = vadd.f32 %v4064_v30, %v578_v35  ;;  %v599_v42 = vadd.f32 %v4064_v30, %v579_v36  ;;  %v600_v43 = vadd.f32 %v4064_v30, %v580_v37  ;;  %v601_v44 = vadd.f32 %v4064_v30, %v581_v38  ;;  %v4065_v38 = vld [vmem:[%s7349_s3] ss:$0 sm:$0xff] }
  0x44   : > { %v602_v45 = vadd.f32 %v4064_v30, %v582_v39  ;;  %v603_v46 = vadd.f32 %v4064_v30, %v583_v40  ;;  %v586_v51 = vmul.f32 %v7371_v33, %v4063_v29  ;;  %v587_v52 = vmul.f32 %v7367_v34, %v4063_v29 }
  0x45   : > { %v614_v49 = vpack.c.bf16 %v599_v42, %v598_v41  ;;  %v615_v50 = vpack.c.bf16 %v601_v44, %v600_v43  ;;  %v604_v56 = vadd.f32 %v4064_v30, %v584_v47  ;;  %v605_v57 = vadd.f32 %v4064_v30, %v585_v48 }
  0x46   : > { %v616_v54 = vpack.c.bf16 %v603_v46, %v602_v45  ;;  %v606_v60 = vadd.f32 %v4064_v30, %v586_v51  ;;  %v607_v61 = vadd.f32 %v4064_v30, %v587_v52  ;;  %v588_v1 = vmul.f32 %v7370_v58, %v4063_v29 }
  0x47   : > { %4395 = vmatprep.mubr.msk.bf16.mxu0 %vm645_vm0, %v614_v49  ;;  %v617_v0 = vpack.c.bf16 %v605_v57, %v604_v56  ;;  %v589_v2 = vmul.f32 %v7369_v59, %v4063_v29  ;;  %v590_v4 = vmul.f32 %v7366_v62, %v4063_v29  ;;  %v591_v5 = vmul.f32 %v7363_v63, %v4063_v29 }
  0x48   : > { %4396 = vmatmul.mubr.msk.bf16.vlgmr.msra.gmra.mrb[0].mxu0 %vm645_vm0, %v615_v50  ;;  %v618_v3 = vpack.c.bf16 %v607_v61, %v606_v60  ;;  %v608_v7 = vadd.f32 %v4064_v30, %v588_v1  ;;  %v592_v14 = vmul.f32 %v7365_v9, %v4063_v29  ;;  %v593_v15 = vmul.f32 %v7364_v10, %v4063_v29 }
  0x49   : > { %4399 = vmatprep.mubr.msk.bf16.mxu0 %vm645_vm0, %v616_v54  ;;  %v609_v8 = vadd.f32 %v4064_v30, %v589_v2  ;;  %v610_v11 = vadd.f32 %v4064_v30, %v590_v4  ;;  %v611_v12 = vadd.f32 %v4064_v30, %v591_v5 }
  0x4a   : > { %v612_v17 = vadd.f32 %v4064_v30, %v592_v14  ;;  %v613_v35 = vadd.f32 %v4064_v30, %v593_v15 }
  0x4b   : > { %v619_v13 = vpack.c.bf16 %v609_v8, %v608_v7  ;;  %v620_v16 = vpack.c.bf16 %v611_v12, %v610_v11 }
  0x4c   : > { %v621_v36 = vpack.c.bf16 %v613_v35, %v612_v17 }
  0x50   : > { %4400 = vmatmul.mubr.msk.bf16.gmra.mrb[4].mxu0 %vm645_vm0, %v617_v0 }
  0x51   : > { %4403 = vmatprep.mubr.msk.bf16.mxu0 %vm645_vm0, %v618_v3 }
  0x58   : > { %4404 = vmatmul.mubr.msk.bf16.gmra.mrb[8].mxu0 %vm645_vm0, %v619_v13 }
  0x59   : > { %4407 = vmatprep.mubr.msk.bf16.mxu0 %vm645_vm0, %v620_v16 }
  0x60   : > { %4408 = vmatmul.mubr.msk.bf16.gmra.mrb[12].mxu0 %vm645_vm0, %v621_v36 }
 0x11b   : > { %v4397_v37 = vpop.f32.mrb[0].mxu0 }
 0x11c   : > { %v704_v39 = vpop.f32.mrb[1].mxu0  ;;  %v713_v41 = vadd.f32 %v4397_v37, %v4065_v38 }
 0x11d   : > { %v4398_v40 = vpop.f32.mrb[2].mxu0  ;;  %v705_v43 = vadd.f32 %v4065_v38, %v704_v39 }
 0x11e   : > { %v716_v42 = vadd.f32 %v4398_v40, %v4065_v38  ;;  %v707_v29 = vpop.f32.mrb[3].mxu0 }
 0x11f   : > { %v708_v44 = vadd.f32 %v4065_v38, %v707_v29 }
 0x120   : > { %v5630_v45 = vpack.c.bf16 %v716_v42, %v713_v41 }
 0x121   : > { %v5632_v30 = vpack.c.bf16 %v708_v44, %v705_v43 }
 0x123   : > { %811 = vrot.lane.b32.xlu0 %v5632_v30, %s5344_s15  ;;  %4419 = vmatprep.mubr.msk.bf16.mxu1 %vm819_vm1, %v5632_v30  ;;  %v4401_v46 = vpop.f32.mrb[4].mxu0 }
 0x124   : > { %v729_v47 = vadd.f32 %v4401_v46, %v4065_v38  ;;  %v720_v48 = vpop.f32.mrb[5].mxu0 }
 0x125   : > { %v721_v49 = vadd.f32 %v4065_v38, %v720_v48  ;;  %v4402_v50 = vpop.f32.mrb[6].mxu0 }
 0x126   : > { %v732_v51 = vadd.f32 %v4402_v50, %v4065_v38  ;;  %v723_v52 = vpop.f32.mrb[7].mxu0 }
 0x127   : > { %813 = vrot.lane.b32.xlu0 %v5630_v45, %s5344_s15  ;;  %v724_v54 = vadd.f32 %v4065_v38, %v723_v52 }
 0x128   : > { %v5640_v56 = vpack.c.bf16 %v732_v51, %v729_v47 }
 0x129   : > { %v5642_v57 = vpack.c.bf16 %v724_v54, %v721_v49 }
 0x12b   : > { %v4405_v60 = vpop.f32.mrb[8].mxu0  ;;  %815 = vrot.lane.b32.xlu1 %v5642_v57, %s5344_s15  ;;  %817 = vrot.lane.b32.xlu0 %v5640_v56, %s5344_s15 }
 0x12c   : > { %v745_v61 = vadd.f32 %v4405_v60, %v4065_v38  ;;  %v736_v0 = vpop.f32.mrb[9].mxu0 }
 0x12d   : > { %v737_v1 = vadd.f32 %v4065_v38, %v736_v0  ;;  %v4406_v2 = vpop.f32.mrb[10].mxu0 }
 0x12e   : > { %v748_v3 = vadd.f32 %v4406_v2, %v4065_v38  ;;  %v739_v4 = vpop.f32.mrb[11].mxu0 }
 0x12f   : > { %v740_v5 = vadd.f32 %v4065_v38, %v739_v4 }
 0x130   : > { %v5648_v7 = vpack.c.bf16 %v748_v3, %v745_v61 }
 0x131   : > { %v5650_v8 = vpack.c.bf16 %v740_v5, %v737_v1 }
 0x133   : > { %v4409_v11 = vpop.f32.mrb[12].mxu0  ;;  %913 = vrot.lane.b32.xlu1 %v5650_v8, %s5344_s15  ;;  %4435 = vmatprep.mubr.msk.bf16.mxu0 %vm819_vm1, %v5650_v8 }
 0x134   : > { %v761_v12 = vadd.f32 %v4409_v11, %v4065_v38  ;;  %v752_v13 = vpop.f32.mrb[13].mxu0 }
 0x135   : > { %v753_v14 = vadd.f32 %v4065_v38, %v752_v13  ;;  %v4410_v15 = vpop.f32.mrb[14].mxu0 }
 0x136   : > { %v764_v16 = vadd.f32 %v4410_v15, %v4065_v38  ;;  %v755_v17 = vpop.f32.mrb[15].mxu0 }
 0x137   : > { %v756_v35 = vadd.f32 %v4065_v38, %v755_v17  ;;  %915 = vrot.lane.b32.xlu1 %v5648_v7, %s5344_s15 }
 0x138   : > { %v5658_v36 = vpack.c.bf16 %v764_v16, %v761_v12  ;;  %v769_v16 = vld [vmem:[%s7356_s10 + $0x10] sm:$0xff] }
 0x139   : > { %v5660_v37 = vpack.c.bf16 %v756_v35, %v753_v14  ;;  %v767_v35 = vld [vmem:[%s7356_s10] sm:$0xff] }
 0x13b   : > { %919 = vrot.lane.b32.xlu1 %v5658_v36, %s5344_s15  ;;  %917 = vrot.lane.b32.xlu0 %v5660_v37, %s5344_s15  ;;  %s5349_s15 = smov 80  }
 0x13f   : > { %1195 = vrot.lane.b32.xlu1 %v5632_v30, %s7368_s25  ;;  %1197 = vrot.lane.b32.xlu0 %v5630_v45, %s7368_s25 }
 0x143   : > { %1199 = vrot.lane.b32.xlu1 %v5642_v57, %s7368_s25  ;;  %1284 = vrot.lane.b32.xlu0 %v5650_v8, %s7368_s25 }
 0x147   : > { %1201 = vrot.lane.b32.xlu1 %v5640_v56, %s7368_s25 }
 0x14b   : > { %1286 = vrot.lane.b32.xlu1 %v5648_v7, %s7368_s25 }
 0x14f   : > { %1381 = vrot.lane.b32.xlu1 %v5632_v30, %s5346_s26 }
 0x153   : > { %1290 = vrot.lane.b32.xlu1 %v5658_v36, %s7368_s25 }
 0x157   : > { %1383 = vrot.lane.b32.xlu1 %v5630_v45, %s5346_s26 }
 0x15b   : > { %1385 = vrot.lane.b32.xlu1 %v5642_v57, %s5346_s26 }
 0x15f   : > { %1288 = vrot.lane.b32.xlu1 %v5660_v37, %s7368_s25  ;;  %s5348_s25 = smov 56  }
 0x195   : > { %v812_v38 = vpop.permute.xlu0 %811 }
 0x196   : > { %4739 = vmatprep.subr.msk.bf16.mxu1 %vm819_vm1, %v812_v38  ;;  %v833_v39 = vsel %vm819_vm1, %v812_v38, 0 }
 0x197   : > { %4412 = vmatpush3.bf16.xpose.msra.mxu1 %v833_v39 }
 0x199   : > { %v814_v40 = vpop.permute.xlu0 %813 }
 0x19a   : > { %4740 = vmatprep.subr.msk.bf16.mxu1 %vm819_vm1, %v814_v40  ;;  %v836_v42 = vsel %vm819_vm1, %v814_v40, 0  ;;  %v768_v40 = vld [vmem:[%s7356_s10 + $0x8] sm:$0xff] }
 0x19d   : > { %v816_v41 = vpop.permute.xlu1 %815  ;;  %v818_v46 = vpop.permute.xlu0 %817 }
 0x19e   : > { %v839_v43 = vsel %vm819_vm1, %v816_v41, 0  ;;  %v842_v50 = vsel %vm819_vm1, %v818_v46, 0 }
 0x19f   : > { %4414 = vmatpush3.bf16.xpose.msra.mxu1 %v836_v42 }
 0x1a0   : > { %4741 = vmatprep.subr.msk.bf16.mxu1 %vm819_vm1, %v816_v41 }
 0x1a5   : > { %v914_v29 = vpop.permute.xlu1 %913 }
 0x1a6   : > { %4743 = vmatprep.subr.msk.bf16.mxu0 %vm819_vm1, %v914_v29  ;;  %v934_v44 = vsel %vm819_vm1, %v914_v29, 0 }
 0x1a7   : > { %4416 = vmatpush3.bf16.xpose.msra.mxu1 %v839_v43  ;;  %4428 = vmatpush3.bf16.xpose.msra.mxu0 %v934_v44  ;;  %v770_v44 = vld [vmem:[%s7356_s10 + $0x18] sm:$0xff] }
 0x1a8   : > { %4742 = vmatprep.subr.msk.bf16.mxu1 %vm819_vm1, %v818_v46 }
 0x1a9   : > { %v916_v47 = vpop.permute.xlu1 %915 }
 0x1aa   : > { %4744 = vmatprep.subr.msk.bf16.mxu0 %vm819_vm1, %v916_v47  ;;  %v937_v48 = vsel %vm819_vm1, %v916_v47, 0 }
 0x1ad   : > { %v920_v49 = vpop.permute.xlu1 %919  ;;  %v918_v51 = vpop.permute.xlu0 %917 }
 0x1ae   : > { %v940_v54 = vsel %vm819_vm1, %v918_v51, 0  ;;  %v943_v0 = vsel %vm819_vm1, %v920_v49, 0 }
 0x1af   : > { %4418 = vmatpush3.bf16.xpose.msra.mxu1 %v842_v50  ;;  %4430 = vmatpush3.bf16.xpose.msra.mxu0 %v937_v48  ;;  %v773_v48 = vld [vmem:[%s7356_s10 + $0x30] sm:$0xff] }
 0x1b0   : > { %4745 = vmatprep.subr.msk.bf16.mxu0 %vm819_vm1, %v918_v51 }
 0x1b1   : > { %v1196_v52 = vpop.permute.xlu1 %1195  ;;  %v1198_v5 = vpop.permute.xlu0 %1197 }
 0x1b5   : > { %v1200_v60 = vpop.permute.xlu1 %1199  ;;  %v5726_v15 = vpop.permute.xlu0 %1284 }
 0x1b6   : > { %4420 = vmatmul.mubr.msk.bf16.vlgmr.msra.gmra.mrb[0].mxu1 %vm819_vm1, %v5630_v45 }
 0x1b7   : > { %4423 = vmatprep.mubr.msk.bf16.mxu1 %vm819_vm1, %v5642_v57  ;;  %4432 = vmatpush3.bf16.xpose.msra.mxu0 %v940_v54  ;;  %v774_v54 = vld [vmem:[%s7356_s10 + $0x38] sm:$0xff] }
 0x1b8   : > { %4746 = vmatprep.subr.msk.bf16.mxu0 %vm819_vm1, %v920_v49 }
 0x1b9   : > { %v1202_v61 = vpop.permute.xlu1 %1201 }
 0x1bd   : > { %v5708_v1 = vpop.permute.xlu1 %1286 }
 0x1be   : > { %4424 = vmatmul.mubr.msk.bf16.gmra.mrb[4].mxu1 %vm819_vm1, %v5640_v56 }
 0x1bf   : > { %4434 = vmatpush3.bf16.xpose.msra.mxu0 %v943_v0 }
 0x1c0   : > { %4443 = vmatprep.subr.bf16.mxu0 %v1196_v52 }
 0x1c1   : > { %v1382_v2 = vpop.permute.xlu1 %1381 }
 0x1c2   : > { %4747 = vmatprep.subr.msk.bf16.mxu1 %vm819_vm1, %v1382_v2  ;;  %v1402_v3 = vsel %vm819_vm1, %v1382_v2, 0 }
 0x1c3   : > { %4476 = vmatpush3.bf16.xpose.msra.mxu1 %v1402_v3 }
 0x1c5   : > { %v5714_v4 = vpop.permute.xlu1 %1290 }
 0x1c6   : > { %4436 = vmatmul.mubr.msk.bf16.vlgmr.msra.gmra.mrb[16].mxu0 %vm819_vm1, %v5648_v7 }
 0x1c7   : > { %4439 = vmatprep.mubr.msk.bf16.mxu0 %vm819_vm1, %v5660_v37  ;;  %4444 = vmatpush3.bf16.msra.mxu0 %v1196_v52  ;;  %v771_v52 = vld [vmem:[%s7356_s10 + $0x20] sm:$0xff] }
 0x1c8   : > { %4445 = vmatprep.subr.bf16.mxu0 %v1198_v5 }
 0x1c9   : > { %v1384_v11 = vpop.permute.xlu1 %1383 }
 0x1ca   : > { %4748 = vmatprep.subr.msk.bf16.mxu1 %vm819_vm1, %v1384_v11  ;;  %v1405_v12 = vsel %vm819_vm1, %v1384_v11, 0 }
 0x1cb   : > { %4446 = vmatpush3.bf16.msra.mxu0 %v1198_v5  ;;  %4478 = vmatpush3.bf16.xpose.msra.mxu1 %v1405_v12 }
 0x1cc   : > { %4447 = vmatprep.subr.bf16.mxu0 %v1200_v60 }
 0x1cd   : > { %v1386_v13 = vpop.permute.xlu1 %1385 }
 0x1ce   : > { %4440 = vmatmul.mubr.msk.bf16.gmra.mrb[20].mxu0 %vm819_vm1, %v5658_v36  ;;  %4749 = vmatprep.subr.msk.bf16.mxu1 %vm819_vm1, %v1386_v13  ;;  %v1408_v14 = vsel %vm819_vm1, %v1386_v13, 0  ;;  %v772_v13 = vld [vmem:[%s7356_s10 + $0x28] sm:$0xff] }
 0x1cf   : > { %4448 = vmatpush3.bf16.msra.mxu0 %v1200_v60 }
 0x1d0   : > { %4449 = vmatprep.subr.bf16.mxu0 %v1202_v61 }
 0x1d3   : > { %4450 = vmatpush3.bf16.msra.mxu0 %v1202_v61  ;;  %4480 = vmatpush3.bf16.xpose.msra.mxu1 %v1408_v14 }
 0x1d4   : > { %4459 = vmatprep.subr.bf16.mxu0 %v5726_v15 }
 0x289   : > { %v4421_v17 = vpop.f32.mrb[0].mxu1 }
 0x28a   : > { %v5735_v38 = vadd.f32 %v4421_v17, %v769_v16  ;;  %v878_v39 = vpop.f32.mrb[1].mxu1 }
 0x28b   : > { %v4422_v41 = vpop.f32.mrb[2].mxu1  ;;  %v5740_v42 = vadd.f32 %v878_v39, %v767_v35 }
 0x28c   : > { %v881_v29 = vpop.f32.mrb[3].mxu1  ;;  %v1017_v43 = vsel %vm1010_vm2, %v5735_v38, -inf  ;;  %v5754_v49 = vadd.f32 %v4422_v41, %v770_v44 }
 0x28d   : > { %v5747_v46 = vadd.f32 %v881_v29, %v768_v40  ;;  %1018 = vmax.xlane.f32.xlu0 %v1017_v43  ;;  %v1011_v50 = vsel %vm1010_vm2, %v5740_v42, -inf }
 0x28e   : > { %v1020_v12 = vsel %vm1010_vm2, %v5754_v49, -inf }
 0x28f   : > { %v1014_v47 = vsel %vm1010_vm2, %v5747_v46, -inf }
 0x290   : > { %1015 = vmax.xlane.f32.xlu1 %v1014_v47 }
 0x291   : > { %v4425_v51 = vpop.f32.mrb[4].mxu1  ;;  %1012 = vmax.xlane.f32.xlu0 %v1011_v50 }
 0x292   : > { %v5764_v60 = vadd.f32 %v4425_v51, %v773_v48  ;;  %v894_v61 = vpop.f32.mrb[5].mxu1 }
 0x293   : > { %v4426_v0 = vpop.f32.mrb[6].mxu1  ;;  %v5766_v2 = vadd.f32 %v894_v61, %v771_v52 }
 0x294   : > { %v5768_v3 = vadd.f32 %v4426_v0, %v774_v54  ;;  %v897_v5 = vpop.f32.mrb[7].mxu1  ;;  %v1029_v11 = vsel %vm1010_vm2, %v5764_v60, -inf }
 0x295   : > { %1030 = vmax.xlane.f32.xlu1 %v1029_v11  ;;  %1021 = vmax.xlane.f32.xlu0 %v1020_v12  ;;  %v5777_v14 = vadd.f32 %v897_v5, %v772_v13  ;;  %v1023_v17 = vsel %vm1010_vm2, %v5766_v2, -inf }
 0x296   : > { %v1032_v39 = vsel %vm1010_vm2, %v5768_v3, -inf }
 0x297   : > { %v1026_v5 = vsel %vm1010_vm2, %v5777_v14, -inf }
 0x299   : > { %v4437_v41 = vpop.f32.mrb[16].mxu0  ;;  %1024 = vmax.xlane.f32.xlu1 %v1023_v17  ;;  %1033 = vmax.xlane.f32.xlu0 %v1032_v39 }
 0x29a   : > { %v5783_v29 = vadd.f32 %v4437_v41, %v769_v16  ;;  %v979_v43 = vpop.f32.mrb[17].mxu0 }
 0x29b   : > { %v4438_v47 = vpop.f32.mrb[18].mxu0  ;;  %v5785_v50 = vadd.f32 %v979_v43, %v767_v35 }
 0x29c   : > { %v5787_v51 = vadd.f32 %v4438_v47, %v770_v44  ;;  %v982_v61 = vpop.f32.mrb[19].mxu0  ;;  %v1041_v0 = vsel %vm1010_vm2, %v5783_v29, -inf }
 0x29d   : > { %1042 = vmax.xlane.f32.xlu1 %v1041_v0  ;;  %1027 = vmax.xlane.f32.xlu0 %v1026_v5  ;;  %v5793_v11 = vadd.f32 %v982_v61, %v768_v40  ;;  %v1035_v16 = vsel %vm1010_vm2, %v5785_v50, -inf  ;;  %v5823_v0 = vpop.permute.xlu1 %1288 }
 0x29e   : > { %v1044_v35 = vsel %vm1010_vm2, %v5787_v51, -inf }
 0x29f   : > { %v1038_v40 = vsel %vm1010_vm2, %v5793_v11, -inf }
 0x2a1   : > { %v4441_v12 = vpop.f32.mrb[20].mxu0  ;;  %1036 = vmax.xlane.f32.xlu1 %v1035_v16  ;;  %1045 = vmax.xlane.f32.xlu0 %v1044_v35 }
 0x2a2   : > { %v5799_v44 = vadd.f32 %v4441_v12, %v773_v48  ;;  %v995_v17 = vpop.f32.mrb[21].mxu0 }
 0x2a3   : > { %v5801_v39 = vadd.f32 %v995_v17, %v771_v52  ;;  %v4442_v41 = vpop.f32.mrb[22].mxu0 }
 0x2a4   : > { %v5803_v43 = vadd.f32 %v4442_v41, %v774_v54  ;;  %v998_v47 = vpop.f32.mrb[23].mxu0  ;;  %v1053_v48 = vsel %vm1010_vm2, %v5799_v44, -inf }
 0x2a5   : > { %v5807_v61 = vadd.f32 %v998_v47, %v772_v13  ;;  %1039 = vmax.xlane.f32.xlu0 %v1038_v40  ;;  %v1047_v52 = vsel %vm1010_vm2, %v5801_v39, -inf }
 0x2a6   : > { %v1056_v54 = vsel %vm1010_vm2, %v5803_v43, -inf }
 0x2a7   : > { %v1050_v13 = vsel %vm1010_vm2, %v5807_v61, -inf }
 0x2b2   : > { %1387 = vrot.lane.b32.xlu1 %v5640_v56, %s5346_s26 }
 0x2bb   : > { %1486 = vrot.lane.b32.xlu0 %v5650_v8, %s5346_s26 }
 0x2d6   : > { %1054 = vmax.xlane.f32.xlu1 %v1053_v48 }
 0x2da   : > { %1048 = vmax.xlane.f32.xlu1 %v1047_v52  ;;  %1057 = vmax.xlane.f32.xlu0 %v1056_v54 }
 0x2de   : > { %1051 = vmax.xlane.f32.xlu0 %v1050_v13 }
 0x2eb   : > { %1488 = vrot.lane.b32.xlu1 %v5648_v7, %s5346_s26 }
 0x31a   : > { %v1019_v5 = vpop.xlane.xlu0 %1018 }
 0x31b   : > { %v1061_v16 = vsub.f32 %v5735_v38, %v1019_v5 }
 0x31d   : > { %v1079_v35 = vmul.f32 1.442695, %v1061_v16  ;;  %v1016_v12 = vpop.xlane.xlu1 %1015 }
 0x31e   : > { %v1013_v17 = vpop.xlane.xlu0 %1012  ;;  %v1060_v40 = vsub.f32 %v5747_v46, %v1016_v12 }
 0x31f   : > { %4992 = vpow2.f32 %v1079_v35  ;;  %v1059_v41 = vsub.f32 %v5740_v42, %v1013_v17 }
 0x320   : > { %v1077_v63 = vmul.f32 1.442695, %v1060_v40 }
 0x321   : > { %v1075_v47 = vmul.f32 1.442695, %v1059_v41 }
 0x322   : > { %v1031_v48 = vpop.xlane.xlu1 %1030  ;;  %v1022_v52 = vpop.xlane.xlu0 %1021 }
 0x323   : > { %4994 = vpow2.f32 %v1075_v47  ;;  %v1062_v54 = vsub.f32 %v5754_v49, %v1022_v52  ;;  %v1065_v10 = vsub.f32 %v5764_v60, %v1031_v48 }
 0x325   : > { %v1081_v13 = vmul.f32 1.442695, %v1062_v54  ;;  %v1087_v35 = vmul.f32 1.442695, %v1065_v10 }
 0x326   : > { %v1025_v9 = vpop.xlane.xlu1 %1024  ;;  %v1034_v38 = vpop.xlane.xlu0 %1033 }
 0x327   : > { %v1063_v5 = vsub.f32 %v5766_v2, %v1025_v9  ;;  %4996 = vpow2.f32 %v1081_v13  ;;  %v1066_v46 = vsub.f32 %v5768_v3, %v1034_v38 }
 0x328   : > { %4998 = vpow2.f32 %v1077_v63 }
 0x329   : > { %v5831_v16 = vpop.eup %4992  ;;  %v1083_v42 = vmul.f32 1.442695, %v1063_v5  ;;  %v1089_v41 = vmul.f32 1.442695, %v1066_v46 }
 0x32a   : > { %v1043_v12 = vpop.xlane.xlu1 %1042  ;;  %v1113_v49 = vsel %vm1010_vm2, %v5831_v16, 0.0  ;;  %v1028_v17 = vpop.xlane.xlu0 %1027 }
 0x32b   : > { %5000 = vpow2.f32 %v1083_v42  ;;  %1114 = vadd.xlane.f32.xlu1 %v1113_v49  ;;  %v1064_v9 = vsub.f32 %v5777_v14, %v1028_v17  ;;  %v1069_v48 = vsub.f32 %v5783_v29, %v1043_v12 }
 0x32c   : > { %5002 = vpow2.f32 %v1087_v35 }
 0x32d   : > { %v5836_v60 = vpop.eup %4994  ;;  %5004 = vpow2.f32 %v1089_v41  ;;  %v1085_v52 = vmul.f32 1.442695, %v1064_v9  ;;  %v1095_v5 = vmul.f32 1.442695, %v1069_v48 }
 0x32e   : > { %v1037_v2 = vpop.xlane.xlu1 %1036  ;;  %v1107_v63 = vsel %vm1010_vm2, %v5836_v60, 0.0  ;;  %v1046_v47 = vpop.xlane.xlu0 %1045 }
 0x32f   : > { %v1067_v10 = vsub.f32 %v5785_v50, %v1037_v2  ;;  %1108 = vadd.xlane.f32.xlu1 %v1107_v63  ;;  %v1070_v29 = vsub.f32 %v5787_v51, %v1046_v47 }
 0x331   : > { %v1091_v3 = vmul.f32 1.442695, %v1067_v10  ;;  %v5842_v40 = vpop.eup %4996  ;;  %v1097_v49 = vmul.f32 1.442695, %v1070_v29 }
 0x332   : > { %v1388_v54 = vpop.permute.xlu1 %1387  ;;  %v1116_v14 = vsel %vm1010_vm2, %v5842_v40, 0.0  ;;  %v5849_v38 = vpop.eup %4998 }
 0x333   : > { %5006 = vpow2.f32 %v1091_v3  ;;  %4750 = vmatprep.subr.msk.bf16.mxu1 %vm819_vm1, %v1388_v54  ;;  %v1411_v13 = vsel %vm819_vm1, %v1388_v54, 0  ;;  %1117 = vadd.xlane.f32.xlu0 %v1116_v14  ;;  %v1040_v35 = vpop.xlane.xlu0 %1039  ;;  %v1110_v46 = vsel %vm1010_vm2, %v5849_v38, 0.0 }
 0x334   : > { %4482 = vmatpush3.bf16.xpose.msra.mxu1 %v1411_v13  ;;  %5008 = vpow2.f32 %v1085_v52  ;;  %v1068_v17 = vsub.f32 %v5793_v11, %v1040_v35 }
 0x335   : > { %v5851_v50 = vpop.eup %5000  ;;  %5010 = vpow2.f32 %v1095_v5 }
 0x336   : > { %v1119_v42 = vsel %vm1010_vm2, %v5851_v50, 0.0  ;;  %v5858_v12 = vpop.eup %5002  ;;  %5012 = vpow2.f32 %v1097_v49  ;;  %v1093_v2 = vmul.f32 1.442695, %v1068_v17 }
 0x337   : > { %1120 = vadd.xlane.f32.xlu1 %v1119_v42  ;;  %1111 = vadd.xlane.f32.xlu0 %v1110_v46  ;;  %v1125_v41 = vsel %vm1010_vm2, %v5858_v12, 0.0  ;;  %v5863_v9 = vpop.eup %5004  ;;  %v5889_v5 = vpop.permute.xlu0 %1486 }
 0x338   : > { %v1128_v10 = vsel %vm1010_vm2, %v5863_v9, 0.0  ;;  %5014 = vpow2.f32 %v1093_v2 }
 0x33b   : > { %1126 = vadd.xlane.f32.xlu0 %v1125_v41 }
 0x33d   : > { %v5865_v51 = vpop.eup %5006 }
 0x33e   : > { %v1131_v63 = vsel %vm1010_vm2, %v5865_v51, 0.0  ;;  %v5871_v3 = vpop.eup %5008 }
 0x33f   : > { %1132 = vadd.xlane.f32.xlu1 %v1131_v63  ;;  %1129 = vadd.xlane.f32.xlu0 %v1128_v10  ;;  %v1122_v11 = vsel %vm1010_vm2, %v5871_v3, 0.0  ;;  %v5875_v47 = vpop.eup %5010 }
 0x340   : > { %v1137_v48 = vsel %vm1010_vm2, %v5875_v47, 0.0  ;;  %v5879_v52 = vpop.eup %5012 }
 0x341   : > { %v1140_v54 = vsel %vm1010_vm2, %v5879_v52, 0.0 }
 0x342   : > { %v5883_v14 = vpop.eup %5014 }
 0x343   : > { %1123 = vadd.xlane.f32.xlu0 %v1122_v11  ;;  %v1134_v13 = vsel %vm1010_vm2, %v5883_v14, 0.0 }
 0x347   : > { %1138 = vadd.xlane.f32.xlu0 %v1137_v48 }
 0x34b   : > { %1141 = vadd.xlane.f32.xlu0 %v1140_v54 }
 0x34f   : > { %1135 = vadd.xlane.f32.xlu0 %v1134_v13 }
 0x350   : > { %1375 = vrot.lane.b32.xlu1 %v5630_v45, %s5347_s13 }
 0x363   : > { %v1055_v42 = vpop.xlane.xlu1 %1054 }
 0x364   : > { %v1073_v17 = vsub.f32 %v5799_v44, %v1055_v42 }
 0x365   : > { %1373 = vrot.lane.b32.xlu0 %v5632_v30, %s5347_s13 }
 0x366   : > { %v1103_v2 = vmul.f32 1.442695, %v1073_v17 }
 0x367   : > { %v1058_v29 = vpop.xlane.xlu0 %1057  ;;  %v1049_v41 = vpop.xlane.xlu1 %1048 }
 0x368   : > { %v1071_v63 = vsub.f32 %v5801_v39, %v1049_v41  ;;  %v1074_v11 = vsub.f32 %v5803_v43, %v1058_v29 }
 0x36a   : > { %v1099_v10 = vmul.f32 1.442695, %v1071_v63  ;;  %v1105_v54 = vmul.f32 1.442695, %v1074_v11 }
 0x36b   : > { %v1052_v35 = vpop.xlane.xlu0 %1051 }
 0x36c   : > { %v1072_v46 = vsub.f32 %v5807_v61, %v1052_v35  ;;  %v5929_v35 = vpop.permute.xlu1 %1488 }
 0x36e   : > { %v1101_v49 = vmul.f32 1.442695, %v1072_v46 }
 0x370   : > { %5016 = vpow2.f32 %v1101_v49 }
 0x371   : > { %5018 = vpow2.f32 %v1103_v2 }
 0x372   : > { %5020 = vpow2.f32 %v1099_v10 }
 0x373   : > { %5022 = vpow2.f32 %v1105_v54 }
 0x37a   : > { %v5897_v48 = vpop.eup %5016 }
 0x37b   : > { %v1146_v13 = vsel %vm1010_vm2, %v5897_v48, 0.0  ;;  %v5901_v61 = vpop.eup %5018 }
 0x37c   : > { %1147 = vadd.xlane.f32.xlu1 %v1146_v13  ;;  %v1149_v44 = vsel %vm1010_vm2, %v5901_v61, 0.0  ;;  %v5905_v42 = vpop.eup %5020 }
 0x37d   : > { %v1143_v39 = vsel %vm1010_vm2, %v5905_v42, 0.0  ;;  %v5909_v43 = vpop.eup %5022 }
 0x37e   : > { %v1152_v29 = vsel %vm1010_vm2, %v5909_v43, 0.0 }
 0x384   : > { %1150 = vadd.xlane.f32.xlu0 %v1149_v44 }
 0x388   : > { %1144 = vadd.xlane.f32.xlu0 %v1143_v39 }
 0x38c   : > { %1153 = vadd.xlane.f32.xlu0 %v1152_v29 }
 0x38d   : > { %1492 = vrot.lane.b32.xlu1 %v5658_v36, %s5346_s26 }
 0x391   : > { %1480 = vrot.lane.b32.xlu1 %v5648_v7, %s5347_s13 }
 0x395   : > { %1379 = vrot.lane.b32.xlu1 %v5640_v56, %s5347_s13 }
 0x399   : > { %1484 = vrot.lane.b32.xlu1 %v5658_v36, %s5347_s13 }
 0x3a2   : > { %1490 = vrot.lane.b32.xlu0 %v5660_v37, %s5346_s26  ;;  %s5355_s26 = smov 8  }
 0x3a6   : > { %1478 = vrot.lane.b32.xlu0 %v5650_v8, %s5347_s13 }
 0x3aa   : > { %1377 = vrot.lane.b32.xlu0 %v5642_v57, %s5347_s13 }
 0x3ae   : > { %1482 = vrot.lane.b32.xlu0 %v5660_v37, %s5347_s13  ;;  %s5354_s13 = smov 40  }
 0x3b8   : > { %v1115_v46 = vpop.xlane.xlu1 %1114 }
 0x3bc   : > { %v1109_v49 = vpop.xlane.xlu1 %1108 }
 0x3c0   : > { %v1118_v17 = vpop.xlane.xlu0 %1117 }
 0x3c1   : > { %5024 = vrcp.f32 %v1118_v17 }
 0x3c2   : > { %5026 = vrcp.f32 %v1109_v49 }
 0x3c3   : > { %5028 = vrcp.f32 %v1115_v46 }
 0x3c4   : > { %v1112_v41 = vpop.xlane.xlu0 %1111  ;;  %v1121_v10 = vpop.xlane.xlu1 %1120 }
 0x3c5   : > { %5030 = vrcp.f32 %v1112_v41 }
 0x3c8   : > { %v1127_v2 = vpop.xlane.xlu0 %1126 }
 0x3cb   : > { %v5025_v63 = vpop.eup %5024 }
 0x3cc   : > { %v1130_v11 = vpop.xlane.xlu0 %1129  ;;  %v5027_v54 = vpop.eup %5026  ;;  %v1174_v39 = vmul.f32 %v5025_v63, %v5842_v40 }
 0x3cd   : > { %v5029_v13 = vpop.eup %5028  ;;  %5032 = vrcp.f32 %v1130_v11  ;;  %v1171_v62 = vmul.f32 %v5027_v54, %v5836_v60 }
 0x3ce   : > { %5034 = vrcp.f32 %v1121_v10  ;;  %v1173_v46 = vmul.f32 %v5029_v13, %v5831_v16 }
 0x3cf   : > { %v5031_v44 = vpop.eup %5030  ;;  %5036 = vrcp.f32 %v1127_v2  ;;  %v1133_v2 = vpop.xlane.xlu1 %1132 }
 0x3d0   : > { %v1124_v29 = vpop.xlane.xlu0 %1123  ;;  %v1172_v49 = vmul.f32 %v5031_v44, %v5849_v38  ;;  %v1188_v41 = vpack.c.bf16 %v1174_v39, %v1173_v46 }
 0x3d1   : > { %5038 = vrcp.f32 %v1124_v29 }
 0x3d2   : > { %v1187_v17 = vpack.c.bf16 %v1172_v49, %v1171_v62 }
 0x3d3   : > { %v1376_v39 = vpop.permute.xlu1 %1375 }
 0x3d4   : > { %4451 = vmatprep.mubr.msk.bf16.mxu0 %vm1010_vm2, %v1187_v17  ;;  %v1139_v34 = vpop.xlane.xlu0 %1138 }
 0x3d5   : > { %4452 = vmatmul.mubr.msk.bf16.vlgmr.msra.gmra.mrb[24].mxu0 %vm1010_vm2, %v1188_v41 }
 0x3d6   : > { %4460 = vmatpush3.bf16.msra.mxu0 %v5726_v15 }
 0x3d7   : > { %4461 = vmatprep.subr.bf16.mxu0 %v5708_v1  ;;  %v5033_v40 = vpop.eup %5032 }
 0x3d8   : > { %v1142_v63 = vpop.xlane.xlu0 %1141  ;;  %v5035_v60 = vpop.eup %5034  ;;  %v1178_v62 = vmul.f32 %v5033_v40, %v5863_v9 }
 0x3d9   : > { %v5037_v10 = vpop.eup %5036  ;;  %5040 = vrcp.f32 %v1142_v63  ;;  %v1175_v15 = vmul.f32 %v5035_v60, %v5851_v50 }
 0x3da   : > { %4462 = vmatpush3.bf16.msra.mxu0 %v5708_v1  ;;  %5042 = vrcp.f32 %v1133_v2  ;;  %v1177_v54 = vmul.f32 %v5037_v10, %v5858_v12 }
 0x3db   : > { %v5039_v16 = vpop.eup %5038  ;;  %4463 = vmatprep.subr.bf16.mxu0 %v5823_v0  ;;  %5044 = vrcp.f32 %v1139_v34 }
 0x3dc   : > { %v1136_v38 = vpop.xlane.xlu0 %1135  ;;  %v1176_v11 = vmul.f32 %v5039_v16, %v5871_v3  ;;  %v1190_v1 = vpack.c.bf16 %v1178_v62, %v1177_v54 }
 0x3dd   : > { %5046 = vrcp.f32 %v1136_v38 }
 0x3de   : > { %4464 = vmatpush3.bf16.msra.mxu0 %v5823_v0  ;;  %v1189_v13 = vpack.c.bf16 %v1176_v11, %v1175_v15 }
 0x3df   : > { %4465 = vmatprep.subr.bf16.mxu0 %v5714_v4 }
 0x3e0   : > { %4455 = vmatprep.mubr.msk.bf16.mxu0 %vm1010_vm2, %v1189_v13  ;;  %v1374_v44 = vpop.permute.xlu0 %1373 }
 0x3e1   : > { %4456 = vmatmul.mubr.msk.bf16.gmra.mrb[28].mxu0 %vm1010_vm2, %v1190_v1  ;;  %4483 = vmatprep.mubr.msk.bf16.mxu1 %vm819_vm1, %v1374_v44 }
 0x3e2   : > { %4466 = vmatpush3.bf16.msra.mxu0 %v5714_v4  ;;  %4484 = vmatmul.mubr.msk.bf16.vlgmr.msra.gmra.mrb[8].mxu1 %vm819_vm1, %v1376_v39  ;;  %v1507_v4 = vsel %vm819_vm1, %v5889_v5, 0 }
 0x3e3   : > { %4751 = vmatprep.subr.msk.bf16.mxu0 %vm819_vm1, %v5889_v5  ;;  %v5041_v34 = vpop.eup %5040 }
 0x3e4   : > { %v5043_v0 = vpop.eup %5042  ;;  %v1182_v9 = vmul.f32 %v5041_v34, %v5879_v52 }
 0x3e5   : > { %v5045_v50 = vpop.eup %5044  ;;  %v1179_v3 = vmul.f32 %v5043_v0, %v5865_v51  ;;  %v1510_v51 = vsel %vm819_vm1, %v5929_v35, 0 }
 0x3e6   : > { %v1181_v49 = vmul.f32 %v5045_v50, %v5875_v47 }
 0x3e7   : > { %v5047_v12 = vpop.eup %5046 }
 0x3e8   : > { %v1180_v29 = vmul.f32 %v5047_v12, %v5883_v14  ;;  %v1192_v17 = vpack.c.bf16 %v1182_v9, %v1181_v49  ;;  %v5995_v9 = vld [vmem:[%s7356_s10 + $0x40] sm:$0xff]  ;;  %v6002_v49 = vld [vmem:[%s7356_s10 + $0x50] sm:$0xff] }
 0x3ea   : > { %v1191_v46 = vpack.c.bf16 %v1180_v29, %v1179_v3 }
 0x3ec   : > { %4467 = vmatprep.mubr.msk.bf16.mxu0 %vm1010_vm2, %v1191_v46 }
 0x3ed   : > { %4468 = vmatmul.mubr.msk.bf16.vlgmr.msra.gmra.mrb[32].mxu0 %vm1010_vm2, %v1192_v17 }
 0x3ee   : > { %4492 = vmatpush3.bf16.xpose.msra.mxu0 %v1507_v4  ;;  %v6009_v4 = vld [vmem:[%s7356_s10 + $0x48] sm:$0xff] }
 0x3ef   : > { %4752 = vmatprep.subr.msk.bf16.mxu0 %vm819_vm1, %v5929_v35 }
 0x3f6   : > { %4494 = vmatpush3.bf16.xpose.msra.mxu0 %v1510_v51 }
 0x409   : > { %v1148_v52 = vpop.xlane.xlu1 %1147 }
 0x40a   : > { %5048 = vrcp.f32 %v1148_v52 }
 0x40d   : > { %v1493_v40 = vpop.permute.xlu1 %1492 }
 0x40e   : > { %v1516_v39 = vsel %vm819_vm1, %v1493_v40, 0 }
 0x411   : > { %v1151_v14 = vpop.xlane.xlu0 %1150  ;;  %v1481_v10 = vpop.permute.xlu1 %1480 }
 0x414   : > { %v5049_v63 = vpop.eup %5048 }
 0x415   : > { %v1145_v47 = vpop.xlane.xlu0 %1144  ;;  %v1184_v62 = vmul.f32 %v5049_v63, %v5897_v48  ;;  %v1380_v44 = vpop.permute.xlu1 %1379  ;;  %v6027_v63 = vld [vmem:[%s7356_s10 + $0x58] sm:$0xff] }
 0x416   : > { %5050 = vrcp.f32 %v1145_v47 }
 0x417   : > { %5052 = vrcp.f32 %v1151_v14 }
 0x419   : > { %v1154_v41 = vpop.xlane.xlu0 %1153 }
 0x41a   : > { %5054 = vrcp.f32 %v1154_v41 }
 0x41d   : > { %v1491_v2 = vpop.permute.xlu0 %1490 }
 0x41e   : > { %4753 = vmatprep.subr.msk.bf16.mxu0 %vm819_vm1, %v1491_v2  ;;  %v1513_v5 = vsel %vm819_vm1, %v1491_v2, 0 }
 0x41f   : > { %4496 = vmatpush3.bf16.xpose.msra.mxu0 %v1513_v5 }
 0x420   : > { %v5051_v60 = vpop.eup %5050  ;;  %4754 = vmatprep.subr.msk.bf16.mxu0 %vm819_vm1, %v1493_v40 }
 0x421   : > { %v1479_v35 = vpop.permute.xlu0 %1478  ;;  %v1183_v16 = vmul.f32 %v5051_v60, %v5905_v42  ;;  %v5053_v38 = vpop.eup %5052 }
 0x422   : > { %v1185_v13 = vmul.f32 %v5053_v38, %v5901_v61  ;;  %v1485_v61 = vpop.permute.xlu1 %1484 }
 0x423   : > { %v1193_v15 = vpack.c.bf16 %v1184_v62, %v1183_v16 }
 0x424   : > { %v5055_v11 = vpop.eup %5054 }
 0x425   : > { %4471 = vmatprep.mubr.msk.bf16.mxu0 %vm1010_vm2, %v1193_v15  ;;  %v1378_v54 = vpop.permute.xlu0 %1377  ;;  %v1186_v1 = vmul.f32 %v5055_v11, %v5909_v43  ;;  %v779_v11 = vld [vmem:[%s7356_s10 + $0x60] sm:$0xff] }
 0x426   : > { %4487 = vmatprep.mubr.msk.bf16.mxu1 %vm819_vm1, %v1378_v54 }
 0x427   : > { %4488 = vmatmul.mubr.msk.bf16.gmra.mrb[12].mxu1 %vm819_vm1, %v1380_v44  ;;  %4498 = vmatpush3.bf16.xpose.msra.mxu0 %v1516_v39  ;;  %v1194_v42 = vpack.c.bf16 %v1186_v1, %v1185_v13  ;;  %v781_v13 = vld [vmem:[%s7356_s10 + $0x70] sm:$0xff]  ;;  %v780_v44 = vld [vmem:[%s7356_s10 + $0x68] sm:$0xff] }
 0x429   : > { %4472 = vmatmul.mubr.msk.bf16.gmra.mrb[36].mxu0 %vm1010_vm2, %v1194_v42  ;;  %v1483_v48 = vpop.permute.xlu0 %1482 }
 0x42a   : > { %4499 = vmatprep.mubr.msk.bf16.mxu0 %vm819_vm1, %v1479_v35 }
 0x431   : > { %4500 = vmatmul.mubr.msk.bf16.vlgmr.msra.gmra.mrb[40].mxu0 %vm819_vm1, %v1481_v10 }
 0x432   : > { %4503 = vmatprep.mubr.msk.bf16.mxu0 %vm819_vm1, %v1483_v48 }
 0x439   : > { %4504 = vmatmul.mubr.msk.bf16.gmra.mrb[44].mxu0 %vm819_vm1, %v1485_v61  ;;  %v782_v61 = vld [vmem:[%s7356_s10 + $0x78] sm:$0xff] }
 0x4a8   : > { %v5982_v43 = vpop.f32.mrb[24].mxu0 }
 0x4a9   : > { %7422 = vst [vmem:[#allocation18_spill] sm:$0xff] %v5982_v43  ;;  %v5984_v34 = vpop.f32.mrb[25].mxu0 }
 0x4aa   : > { %7423 = vst [vmem:[#allocation19_spill] sm:$0xff] %v5984_v34  ;;  %v5986_v0 = vpop.f32.mrb[26].mxu0 }
 0x4ab   : > { %7424 = vst [vmem:[#allocation20_spill] sm:$0xff] %v5986_v0  ;;  %v5988_v50 = vpop.f32.mrb[27].mxu0 }
 0x4ac   : > { %7425 = vst [vmem:[#allocation21_spill] sm:$0xff] %v5988_v50 }
 0x4b4   : > { %v5990_v12 = vpop.f32.mrb[28].mxu0 }
 0x4b5   : > { %7426 = vst [vmem:[#allocation22_spill] sm:$0xff] %v5990_v12  ;;  %v5997_v3 = vpop.f32.mrb[29].mxu0  ;;  %v4485_v29 = vpop.f32.mrb[8].mxu1 }
 0x4b6   : > { %7427 = vst [vmem:[#allocation23_spill] sm:$0xff] %v5997_v3  ;;  %v6004_v46 = vpop.f32.mrb[30].mxu0  ;;  %v1447_v17 = vpop.f32.mrb[9].mxu1  ;;  %v6017_v41 = vadd.f32 %v4485_v29, %v6002_v49 }
 0x4b7   : > { %7428 = vst [vmem:[#allocation24_spill] sm:$0xff] %v6004_v46  ;;  %v6012_v51 = vadd.f32 %v1447_v17, %v5995_v9  ;;  %v6014_v52 = vpop.f32.mrb[31].mxu0  ;;  %v4486_v14 = vpop.f32.mrb[10].mxu1 }
 0x4b8   : > { %7429 = vst [vmem:[#allocation25_spill] sm:$0xff] %v6014_v52  ;;  %v1450_v47 = vpop.f32.mrb[11].mxu1  ;;  %v6032_v60 = vadd.f32 %v4486_v14, %v6027_v63  ;;  %v1589_v10 = vsel %vm1010_vm2, %v6017_v41, -inf }
 0x4b9   : > { %v6020_v40 = vadd.f32 %v1450_v47, %v6009_v4  ;;  %v1583_v2 = vsel %vm1010_vm2, %v6012_v51, -inf }
 0x4ba   : > { %1584 = vmax.xlane.f32.xlu0 %v1583_v2  ;;  %v1592_v62 = vsel %vm1010_vm2, %v6032_v60, -inf }
 0x4bb   : > { %v1586_v5 = vsel %vm1010_vm2, %v6020_v40, -inf }
 0x4bc   : > { %1587 = vmax.xlane.f32.xlu1 %v1586_v5 }
 0x4be   : > { %1590 = vmax.xlane.f32.xlu0 %v1589_v10 }
 0x4c0   : > { %v6036_v35 = vpop.f32.mrb[32].mxu0 }
 0x4c1   : > { %7430 = vst [vmem:[#allocation26_spill] sm:$0xff] %v6036_v35  ;;  %v6038_v16 = vpop.f32.mrb[33].mxu0 }
 0x4c2   : > { %7431 = vst [vmem:[#allocation27_spill] sm:$0xff] %v6038_v16  ;;  %v6042_v38 = vpop.f32.mrb[34].mxu0  ;;  %1593 = vmax.xlane.f32.xlu0 %v1592_v62 }
 0x4c3   : > { %7432 = vst [vmem:[#allocation28_spill] sm:$0xff] %v6042_v38  ;;  %v6044_v15 = vpop.f32.mrb[35].mxu0 }
 0x4c4   : > { %7433 = vst [vmem:[#allocation29_spill] sm:$0xff] %v6044_v15 }
 0x4fa   : > { %v4489_v54 = vpop.f32.mrb[12].mxu1 }
 0x4fb   : > { %v1463_v1 = vpop.f32.mrb[13].mxu1  ;;  %v6064_v14 = vadd.f32 %v4489_v54, %v781_v13 }
 0x4fc   : > { %v6055_v39 = vadd.f32 %v1463_v1, %v779_v11  ;;  %v6057_v42 = vpop.f32.mrb[36].mxu0  ;;  %v4490_v48 = vpop.f32.mrb[14].mxu1 }
 0x4fd   : > { %7434 = vst [vmem:[#allocation30_spill] sm:$0xff] %v6057_v42  ;;  %v6062_v29 = vpop.f32.mrb[37].mxu0  ;;  %v1466_v17 = vpop.f32.mrb[15].mxu1  ;;  %v6074_v62 = vadd.f32 %v4490_v48, %v782_v61  ;;  %v1601_v54 = vsel %vm1010_vm2, %v6064_v14, -inf }
 0x4fe   : > { %7435 = vst [vmem:[#allocation31_spill] sm:$0xff] %v6062_v29  ;;  %v6066_v47 = vadd.f32 %v1466_v17, %v780_v44  ;;  %v6068_v2 = vpop.f32.mrb[38].mxu0  ;;  %v1595_v5 = vsel %vm1010_vm2, %v6055_v39, -inf }
 0x4ff   : > { %7436 = vst [vmem:[#allocation32_spill] sm:$0xff] %v6068_v2  ;;  %v6072_v10 = vpop.f32.mrb[39].mxu0  ;;  %1596 = vmax.xlane.f32.xlu1 %v1595_v5  ;;  %v1604_v59 = vsel %vm1010_vm2, %v6074_v62, -inf }
 0x500   : > { %7437 = vst [vmem:[#allocation33_spill] sm:$0xff] %v6072_v10  ;;  %v1598_v1 = vsel %vm1010_vm2, %v6066_v47, -inf }
 0x501   : > { %1599 = vmax.xlane.f32.xlu0 %v1598_v1 }
 0x503   : > { %1602 = vmax.xlane.f32.xlu1 %v1601_v54 }
 0x504   : > { %v6080_v17 = vpop.f32.mrb[40].mxu0 }
 0x505   : > { %v6084_v58 = vpop.f32.mrb[41].mxu0  ;;  %1605 = vmax.xlane.f32.xlu0 %v1604_v59 }
 0x506   : > { %v6086_v33 = vpop.f32.mrb[42].mxu0 }
 0x507   : > { %v6088_v48 = vpop.f32.mrb[43].mxu0 }
 0x50c   : > { %v4505_v5 = vpop.f32.mrb[44].mxu0 }
 0x50d   : > { %v6090_v28 = vadd.f32 %v4505_v5, %v781_v13  ;;  %v1568_v1 = vpop.f32.mrb[45].mxu0 }
 0x50e   : > { %v6092_v32 = vadd.f32 %v1568_v1, %v779_v11  ;;  %v4506_v31 = vpop.f32.mrb[46].mxu0 }
 0x50f   : > { %v6094_v54 = vadd.f32 %v4506_v31, %v782_v61  ;;  %v1571_v27 = vpop.f32.mrb[47].mxu0 }
 0x510   : > { %v6096_v24 = vadd.f32 %v1571_v27, %v780_v44 }
 0x514   : > { %1767 = vrot.lane.b32.xlu1 %v5632_v30, %s5348_s25 }
 0x518   : > { %1771 = vrot.lane.b32.xlu1 %v5642_v57, %s5348_s25 }
 0x51b   : > { %1769 = vrot.lane.b32.xlu0 %v5630_v45, %s5348_s25 }
 0x51c   : > { %1856 = vrot.lane.b32.xlu1 %v5650_v8, %s5348_s25 }
 0x51f   : > { %1773 = vrot.lane.b32.xlu0 %v5640_v56, %s5348_s25 }
 0x520   : > { %1953 = vrot.lane.b32.xlu1 %v5632_v30, %s5349_s15 }
 0x523   : > { %1858 = vrot.lane.b32.xlu0 %v5648_v7, %s5348_s25 }
 0x524   : > { %1860 = vrot.lane.b32.xlu1 %v5660_v37, %s5348_s25 }
 0x527   : > { %1862 = vrot.lane.b32.xlu0 %v5658_v36, %s5348_s25  ;;  %s5356_s25 = smov 16  }
 0x528   : > { %1955 = vrot.lane.b32.xlu1 %v5630_v45, %s5349_s15 }
 0x52c   : > { %1957 = vrot.lane.b32.xlu1 %v5642_v57, %s5349_s15 }
 0x547   : > { %v1585_v27 = vpop.xlane.xlu0 %1584 }
 0x548   : > { %v1631_v31 = vsub.f32 %v6012_v51, %v1585_v27 }
 0x549   : > { %v1588_v59 = vpop.xlane.xlu1 %1587 }
 0x54a   : > { %v1647_v44 = vmul.f32 1.442695, %v1631_v31  ;;  %v1632_v61 = vsub.f32 %v6020_v40, %v1588_v59 }
 0x54b   : > { %v1591_v11 = vpop.xlane.xlu0 %1590 }
 0x54c   : > { %v1633_v13 = vsub.f32 %v6017_v41, %v1591_v11  ;;  %v1649_v25 = vmul.f32 1.442695, %v1632_v61 }
 0x54e   : > { %v1651_v5 = vmul.f32 1.442695, %v1633_v13 }
 0x54f   : > { %v1594_v1 = vpop.xlane.xlu0 %1593 }
 0x550   : > { %5056 = vpow2.f32 %v1651_v5  ;;  %v1634_v26 = vsub.f32 %v6032_v60, %v1594_v1 }
 0x551   : > { %5058 = vpow2.f32 %v1647_v44 }
 0x552   : > { %v1653_v23 = vmul.f32 1.442695, %v1634_v26 }
 0x554   : > { %5060 = vpow2.f32 %v1653_v23 }
 0x555   : > { %5062 = vpow2.f32 %v1649_v25 }
 0x55a   : > { %v6116_v6 = vpop.eup %5056 }
 0x55b   : > { %v1685_v51 = vsel %vm1010_vm2, %v6116_v6, 0.0  ;;  %v6120_v27 = vpop.eup %5058 }
 0x55c   : > { %1686 = vadd.xlane.f32.xlu1 %v1685_v51  ;;  %v1679_v40 = vsel %vm1010_vm2, %v6120_v27, 0.0 }
 0x55e   : > { %v6122_v41 = vpop.eup %5060 }
 0x55f   : > { %v1688_v60 = vsel %vm1010_vm2, %v6122_v41, 0.0  ;;  %v6128_v31 = vpop.eup %5062 }
 0x560   : > { %1680 = vadd.xlane.f32.xlu1 %v1679_v40  ;;  %1689 = vadd.xlane.f32.xlu0 %v1688_v60  ;;  %v1682_v23 = vsel %vm1010_vm2, %v6128_v31, 0.0 }
 0x564   : > { %1683 = vadd.xlane.f32.xlu0 %v1682_v23 }
 0x58c   : > { %v1597_v25 = vpop.xlane.xlu1 %1596 }
 0x58d   : > { %v1635_v59 = vsub.f32 %v6055_v39, %v1597_v25 }
 0x58e   : > { %v1600_v26 = vpop.xlane.xlu0 %1599 }
 0x58f   : > { %v1636_v11 = vsub.f32 %v6066_v47, %v1600_v26  ;;  %v1655_v1 = vmul.f32 1.442695, %v1635_v59 }
 0x590   : > { %v1603_v13 = vpop.xlane.xlu1 %1602 }
 0x591   : > { %v1657_v44 = vmul.f32 1.442695, %v1636_v11  ;;  %v1637_v61 = vsub.f32 %v6064_v14, %v1603_v13 }
 0x592   : > { %v1606_v5 = vpop.xlane.xlu0 %1605 }
 0x593   : > { %5064 = vpow2.f32 %v1657_v44  ;;  %v1659_v51 = vmul.f32 1.442695, %v1637_v61  ;;  %v1638_v40 = vsub.f32 %v6074_v62, %v1606_v5  ;;  %v6140_v62 = vadd.f32 %v6086_v33, %v6027_v63 }
 0x594   : > { %v1768_v60 = vpop.permute.xlu1 %1767  ;;  %v6152_v33 = vadd.f32 %v6088_v48, %v6009_v4  ;;  %v6165_v48 = vadd.f32 %v6080_v17, %v6002_v49  ;;  %v1622_v49 = vsel %vm1010_vm2, %v6096_v24, -inf }
 0x595   : > { %5066 = vpow2.f32 %v1659_v51  ;;  %4507 = vmatprep.subr.bf16.mxu1 %v1768_v60  ;;  %v1661_v55 = vmul.f32 1.442695, %v1638_v40  ;;  %v1616_v63 = vsel %vm1010_vm2, %v6140_v62, -inf }
 0x596   : > { %4508 = vmatpush3.bf16.msra.mxu1 %v1768_v60  ;;  %v1770_v23 = vpop.permute.xlu0 %1769  ;;  %5068 = vpow2.f32 %v1655_v1  ;;  %v1610_v4 = vsel %vm1010_vm2, %v6152_v33, -inf  ;;  %v1628_v60 = vsel %vm1010_vm2, %v6094_v54, -inf }
 0x597   : > { %4509 = vmatprep.subr.bf16.mxu1 %v1770_v23  ;;  %5070 = vpow2.f32 %v1661_v55 }
 0x598   : > { %v1772_v39 = vpop.permute.xlu1 %1771 }
 0x59a   : > { %4510 = vmatpush3.bf16.msra.mxu1 %v1770_v23  ;;  %v1774_v47 = vpop.permute.xlu0 %1773  ;;  %v6173_v23 = vadd.f32 %v6084_v58, %v5995_v9  ;;  %v1619_v58 = vsel %vm1010_vm2, %v6092_v32, -inf }
 0x59b   : > { %4511 = vmatprep.subr.bf16.mxu1 %v1772_v39 }
 0x59c   : > { %v1857_v14 = vpop.permute.xlu1 %1856  ;;  %v1607_v17 = vsel %vm1010_vm2, %v6173_v23, -inf }
 0x59d   : > { %v6136_v25 = vpop.eup %5064  ;;  %4523 = vmatprep.subr.bf16.mxu0 %v1857_v14 }
 0x59e   : > { %4512 = vmatpush3.bf16.msra.mxu1 %v1772_v39  ;;  %4524 = vmatpush3.bf16.msra.mxu0 %v1857_v14  ;;  %v1859_v26 = vpop.permute.xlu0 %1858  ;;  %v1694_v59 = vsel %vm1010_vm2, %v6136_v25, 0.0  ;;  %v1613_v39 = vsel %vm1010_vm2, %v6165_v48, -inf }
 0x59f   : > { %v6144_v11 = vpop.eup %5066  ;;  %1695 = vadd.xlane.f32.xlu0 %v1694_v59  ;;  %4513 = vmatprep.subr.bf16.mxu1 %v1774_v47 }
 0x5a0   : > { %4525 = vmatprep.subr.bf16.mxu0 %v1859_v26  ;;  %v1954_v55 = vpop.permute.xlu1 %1953  ;;  %v1697_v13 = vsel %vm1010_vm2, %v6144_v11, 0.0  ;;  %v6148_v44 = vpop.eup %5068 }
 0x5a1   : > { %1698 = vadd.xlane.f32.xlu1 %v1697_v13  ;;  %v1691_v5 = vsel %vm1010_vm2, %v6148_v44, 0.0  ;;  %v6159_v1 = vpop.eup %5070 }
 0x5a2   : > { %4514 = vmatpush3.bf16.msra.mxu1 %v1774_v47  ;;  %4526 = vmatpush3.bf16.msra.mxu0 %v1859_v26  ;;  %v1863_v51 = vpop.permute.xlu0 %1862  ;;  %v1700_v40 = vsel %vm1010_vm2, %v6159_v1, 0.0  ;;  %v1625_v47 = vsel %vm1010_vm2, %v6090_v28, -inf }
 0x5a3   : > { %1617 = vmax.xlane.f32.xlu0 %v1616_v63  ;;  %4755 = vmatprep.subr.msk.bf16.mxu1 %vm819_vm1, %v1954_v55 }
 0x5a4   : > { %v1861_v61 = vpop.permute.xlu1 %1860 }
 0x5a5   : > { %1692 = vadd.xlane.f32.xlu1 %v1691_v5  ;;  %4527 = vmatprep.subr.bf16.mxu0 %v1861_v61 }
 0x5a6   : > { %4528 = vmatpush3.bf16.msra.mxu0 %v1861_v61 }
 0x5a7   : > { %1611 = vmax.xlane.f32.xlu0 %v1610_v4  ;;  %4529 = vmatprep.subr.bf16.mxu0 %v1863_v51 }
 0x5a8   : > { %v1956_v9 = vpop.permute.xlu1 %1955 }
 0x5a9   : > { %1701 = vadd.xlane.f32.xlu1 %v1700_v40 }
 0x5aa   : > { %4530 = vmatpush3.bf16.msra.mxu0 %v1863_v51 }
 0x5ab   : > { %1629 = vmax.xlane.f32.xlu0 %v1628_v60 }
 0x5ac   : > { %v1958_v14 = vpop.permute.xlu1 %1957 }
 0x5ad   : > { %1614 = vmax.xlane.f32.xlu1 %v1613_v39 }
 0x5af   : > { %1623 = vmax.xlane.f32.xlu0 %v1622_v49 }
 0x5b1   : > { %1608 = vmax.xlane.f32.xlu1 %v1607_v17 }
 0x5b5   : > { %1626 = vmax.xlane.f32.xlu1 %v1625_v47 }
 0x5b9   : > { %1620 = vmax.xlane.f32.xlu1 %v1619_v58  ;;  %v1974_v58 = vsel %vm819_vm1, %v1954_v55, 0 }
 0x5c5   : > { %2058 = vrot.lane.b32.xlu0 %v5650_v8, %s5349_s15 }
 0x5ca   : > { %1959 = vrot.lane.b32.xlu1 %v5640_v56, %s5349_s15 }
 0x5ce   : > { %2060 = vrot.lane.b32.xlu1 %v5648_v7, %s5349_s15 }
 0x5e9   : > { %v1687_v26 = vpop.xlane.xlu1 %1686 }
 0x5ed   : > { %v1681_v59 = vpop.xlane.xlu1 %1680  ;;  %v1690_v13 = vpop.xlane.xlu0 %1689 }
 0x5ee   : > { %5072 = vrcp.f32 %v1690_v13 }
 0x5ef   : > { %5074 = vrcp.f32 %v1681_v59 }
 0x5f0   : > { %5076 = vrcp.f32 %v1687_v26  ;;  %v1977_v26 = vsel %vm819_vm1, %v1956_v9, 0 }
 0x5f1   : > { %v1684_v63 = vpop.xlane.xlu0 %1683 }
 0x5f2   : > { %5078 = vrcp.f32 %v1684_v63 }
 0x5f8   : > { %v5073_v61 = vpop.eup %5072 }
 0x5f9   : > { %v5075_v5 = vpop.eup %5074  ;;  %v1746_v40 = vmul.f32 %v5073_v61, %v6122_v41 }
 0x5fa   : > { %v5077_v51 = vpop.eup %5076  ;;  %v1743_v60 = vmul.f32 %v5075_v5, %v6120_v27  ;;  %v1980_v27 = vsel %vm819_vm1, %v1958_v14, 0 }
 0x5fb   : > { %v1745_v49 = vmul.f32 %v5077_v51, %v6116_v6 }
 0x5fc   : > { %v5079_v4 = vpop.eup %5078 }
 0x5fd   : > { %v1744_v39 = vmul.f32 %v5079_v4, %v6128_v31  ;;  %v1760_v47 = vpack.c.bf16 %v1746_v40, %v1745_v49 }
 0x5ff   : > { %v1759_v17 = vpack.c.bf16 %v1744_v39, %v1743_v60 }
 0x601   : > { %4515 = vmatprep.mubr.msk.bf16.mxu1 %vm1010_vm2, %v1759_v17 }
 0x602   : > { %4516 = vmatmul.mubr.msk.bf16.vlgmr.msra.gmra.mrb[16].mxu1 %vm1010_vm2, %v1760_v47 }
 0x603   : > { %4540 = vmatpush3.bf16.xpose.msra.mxu1 %v1974_v58 }
 0x604   : > { %4756 = vmatprep.subr.msk.bf16.mxu1 %vm819_vm1, %v1956_v9 }
 0x60b   : > { %4542 = vmatpush3.bf16.xpose.msra.mxu1 %v1977_v26 }
 0x60c   : > { %4757 = vmatprep.subr.msk.bf16.mxu1 %vm819_vm1, %v1958_v14 }
 0x613   : > { %4544 = vmatpush3.bf16.xpose.msra.mxu1 %v1980_v27 }
 0x62c   : > { %v1696_v6 = vpop.xlane.xlu0 %1695 }
 0x62d   : > { %5080 = vrcp.f32 %v1696_v6 }
 0x62e   : > { %v1699_v41 = vpop.xlane.xlu1 %1698 }
 0x630   : > { %v1618_v31 = vpop.xlane.xlu0 %1617 }
 0x631   : > { %v1642_v61 = vsub.f32 %v6140_v62, %v1618_v31 }
 0x632   : > { %v1693_v59 = vpop.xlane.xlu1 %1692 }
 0x633   : > { %5082 = vrcp.f32 %v1693_v59  ;;  %v1669_v40 = vmul.f32 1.442695, %v1642_v61 }
 0x634   : > { %v1612_v13 = vpop.xlane.xlu0 %1611  ;;  %5084 = vrcp.f32 %v1699_v41 }
 0x635   : > { %v1640_v60 = vsub.f32 %v6152_v33, %v1612_v13 }
 0x636   : > { %v1702_v55 = vpop.xlane.xlu1 %1701 }
 0x637   : > { %5086 = vrcp.f32 %v1702_v55  ;;  %v5081_v5 = vpop.eup %5080 }
 0x638   : > { %v1630_v63 = vpop.xlane.xlu0 %1629  ;;  %v1748_v47 = vmul.f32 %v5081_v5, %v6136_v25 }
 0x63a   : > { %v1615_v9 = vpop.xlane.xlu1 %1614 }
 0x63b   : > { %v1641_v51 = vsub.f32 %v6165_v48, %v1615_v9  ;;  %v1665_v48 = vmul.f32 1.442695, %v1640_v60 }
 0x63c   : > { %v1624_v4 = vpop.xlane.xlu0 %1623 }
 0x63d   : > { %v5083_v14 = vpop.eup %5082  ;;  %v1667_v39 = vmul.f32 1.442695, %v1641_v51 }
 0x63e   : > { %v1609_v49 = vpop.xlane.xlu1 %1608  ;;  %v1747_v17 = vmul.f32 %v5083_v14, %v6148_v44  ;;  %v5085_v58 = vpop.eup %5084 }
 0x63f   : > { %5088 = vpow2.f32 %v1667_v39  ;;  %v1639_v26 = vsub.f32 %v6173_v23, %v1609_v49  ;;  %v1749_v44 = vmul.f32 %v5085_v58, %v6144_v11 }
 0x640   : > { %v6208_v62 = vpop.permute.xlu0 %2058  ;;  %v1761_v27 = vpack.c.bf16 %v1748_v47, %v1747_v17  ;;  %5090 = vpow2.f32 %v1669_v40  ;;  %v1644_v40 = vsub.f32 %v6096_v24, %v1624_v4  ;;  %v1646_v47 = vsub.f32 %v6094_v54, %v1630_v63 }
 0x641   : > { %v5087_v6 = vpop.eup %5086  ;;  %v1663_v41 = vmul.f32 1.442695, %v1639_v26  ;;  %4759 = vmatprep.subr.msk.bf16.mxu0 %vm819_vm1, %v6208_v62 }
 0x642   : > { %v1627_v33 = vpop.xlane.xlu1 %1626  ;;  %4519 = vmatprep.mubr.msk.bf16.mxu1 %vm1010_vm2, %v1761_v27  ;;  %v1750_v25 = vmul.f32 %v5087_v6, %v6159_v1  ;;  %v1673_v60 = vmul.f32 1.442695, %v1644_v40  ;;  %v1677_v26 = vmul.f32 1.442695, %v1646_v47 }
 0x643   : > { %5092 = vpow2.f32 %v1663_v41  ;;  %v1645_v39 = vsub.f32 %v6090_v28, %v1627_v33 }
 0x644   : > { %v1762_v31 = vpack.c.bf16 %v1750_v25, %v1749_v44  ;;  %5094 = vpow2.f32 %v1665_v48 }
 0x645   : > { %5096 = vpow2.f32 %v1673_v60  ;;  %v1675_v49 = vmul.f32 1.442695, %v1645_v39 }
 0x646   : > { %v1621_v23 = vpop.xlane.xlu1 %1620  ;;  %4520 = vmatmul.mubr.msk.bf16.gmra.mrb[20].mxu1 %vm1010_vm2, %v1762_v31 }
 0x647   : > { %v1643_v17 = vsub.f32 %v6092_v32, %v1621_v23  ;;  %5098 = vpow2.f32 %v1675_v49 }
 0x649   : > { %v6216_v59 = vpop.eup %5088  ;;  %v1671_v58 = vmul.f32 1.442695, %v1643_v17 }
 0x64a   : > { %v1960_v13 = vpop.permute.xlu1 %1959  ;;  %v1709_v55 = vsel %vm1010_vm2, %v6216_v59, 0.0  ;;  %v6220_v61 = vpop.eup %5090 }
 0x64b   : > { %1710 = vadd.xlane.f32.xlu0 %v1709_v55  ;;  %4758 = vmatprep.subr.msk.bf16.mxu1 %vm819_vm1, %v1960_v13  ;;  %v1983_v11 = vsel %vm819_vm1, %v1960_v13, 0  ;;  %v1712_v5 = vsel %vm1010_vm2, %v6220_v61, 0.0  ;;  %5100 = vpow2.f32 %v1671_v58 }
 0x64c   : > { %4546 = vmatpush3.bf16.xpose.msra.mxu1 %v1983_v11  ;;  %5102 = vpow2.f32 %v1677_v26 }
 0x64d   : > { %v6224_v1 = vpop.eup %5092 }
 0x64e   : > { %v1703_v9 = vsel %vm1010_vm2, %v6224_v1, 0.0  ;;  %v6230_v51 = vpop.eup %5094  ;;  %v2061_v33 = vpop.permute.xlu1 %2060 }
 0x64f   : > { %1704 = vadd.xlane.f32.xlu1 %v1703_v9  ;;  %1713 = vadd.xlane.f32.xlu0 %v1712_v5  ;;  %v1706_v14 = vsel %vm1010_vm2, %v6230_v51, 0.0  ;;  %v6242_v27 = vpop.eup %5096 }
 0x650   : > { %v1718_v6 = vsel %vm1010_vm2, %v6242_v27, 0.0 }
 0x651   : > { %v6246_v24 = vpop.eup %5098 }
 0x652   : > { %v1721_v28 = vsel %vm1010_vm2, %v6246_v24, 0.0 }
 0x653   : > { %1707 = vadd.xlane.f32.xlu0 %v1706_v14 }
 0x655   : > { %v6250_v4 = vpop.eup %5100 }
 0x656   : > { %v1715_v32 = vsel %vm1010_vm2, %v6250_v4, 0.0  ;;  %v6254_v54 = vpop.eup %5102 }
 0x657   : > { %v1724_v63 = vsel %vm1010_vm2, %v6254_v54, 0.0 }
 0x660   : > { %1947 = vrot.lane.b32.xlu1 %v5630_v45, %s5350_s29 }
 0x669   : > { %1945 = vrot.lane.b32.xlu0 %v5632_v30, %s5350_s29 }
 0x684   : > { %1719 = vadd.xlane.f32.xlu1 %v1718_v6 }
 0x688   : > { %1722 = vadd.xlane.f32.xlu0 %v1721_v28 }
 0x68c   : > { %1716 = vadd.xlane.f32.xlu0 %v1715_v32  ;;  %v2079_v32 = vsel %vm819_vm1, %v6208_v62, 0 }
 0x690   : > { %1725 = vadd.xlane.f32.xlu0 %v1724_v63 }
 0x695   : > { %2064 = vrot.lane.b32.xlu1 %v5658_v36, %s5349_s15 }
 0x699   : > { %2052 = vrot.lane.b32.xlu1 %v5648_v7, %s5350_s29 }
 0x69d   : > { %1951 = vrot.lane.b32.xlu1 %v5640_v56, %s5350_s29 }
 0x6a1   : > { %2056 = vrot.lane.b32.xlu1 %v5658_v36, %s5350_s29 }
 0x6a6   : > { %2062 = vrot.lane.b32.xlu0 %v5660_v37, %s5349_s15 }
 0x6aa   : > { %2050 = vrot.lane.b32.xlu0 %v5650_v8, %s5350_s29 }
 0x6ae   : > { %1949 = vrot.lane.b32.xlu0 %v5642_v57, %s5350_s29 }
 0x6b2   : > { %2054 = vrot.lane.b32.xlu0 %v5660_v37, %s5350_s29  ;;  %s7514_s29 = sld [smem:[#allocation44_spill]] }
 0x6d5   : > { %v6274_v48 = vpop.f32.mrb[16].mxu1 }
 0x6d6   : > { %v6276_v41 = vpop.f32.mrb[17].mxu1 }
 0x6d7   : > { %v6278_v44 = vpop.f32.mrb[18].mxu1 }
 0x6d8   : > { %v6282_v31 = vpop.f32.mrb[19].mxu1  ;;  %v1711_v23 = vpop.xlane.xlu0 %1710 }
 0x6dc   : > { %v1705_v55 = vpop.xlane.xlu1 %1704  ;;  %v1714_v11 = vpop.xlane.xlu0 %1713 }
 0x6dd   : > { %5104 = vrcp.f32 %v1714_v11 }
 0x6de   : > { %5106 = vrcp.f32 %v1705_v55 }
 0x6df   : > { %5108 = vrcp.f32 %v1711_v23 }
 0x6e0   : > { %v1708_v9 = vpop.xlane.xlu0 %1707  ;;  %v1948_v14 = vpop.permute.xlu1 %1947 }
 0x6e1   : > { %5110 = vrcp.f32 %v1708_v9 }
 0x6e4   : > { %v1946_v5 = vpop.permute.xlu0 %1945 }
 0x6e5   : > { %4547 = vmatprep.mubr.msk.bf16.mxu1 %vm819_vm1, %v1946_v5 }
 0x6e6   : > { %4548 = vmatmul.mubr.msk.bf16.vlgmr.msra.gmra.mrb[24].mxu1 %vm819_vm1, %v1948_v14 }
 0x6e7   : > { %v5105_v40 = vpop.eup %5104 }
 0x6e8   : > { %v5107_v60 = vpop.eup %5106  ;;  %v1754_v17 = vmul.f32 %v5105_v40, %v6220_v61  ;;  %v2082_v61 = vsel %vm819_vm1, %v2061_v33, 0 }
 0x6e9   : > { %v5109_v39 = vpop.eup %5108  ;;  %v1751_v47 = vmul.f32 %v5107_v60, %v6224_v1 }
 0x6ea   : > { %v1753_v26 = vmul.f32 %v5109_v39, %v6216_v59 }
 0x6eb   : > { %v5111_v49 = vpop.eup %5110 }
 0x6ec   : > { %v1752_v58 = vmul.f32 %v5111_v49, %v6230_v51  ;;  %v1764_v28 = vpack.c.bf16 %v1754_v17, %v1753_v26 }
 0x6ee   : > { %v1763_v6 = vpack.c.bf16 %v1752_v58, %v1751_v47 }
 0x6f0   : > { %4531 = vmatprep.mubr.msk.bf16.mxu0 %vm1010_vm2, %v1763_v6 }
 0x6f1   : > { %4532 = vmatmul.mubr.msk.bf16.vlgmr.msra.gmra.mrb[48].mxu0 %vm1010_vm2, %v1764_v28 }
 0x6f2   : > { %4556 = vmatpush3.bf16.xpose.msra.mxu0 %v2079_v32 }
 0x6f3   : > { %4760 = vmatprep.subr.msk.bf16.mxu0 %vm819_vm1, %v2061_v33 }
 0x6fa   : > { %4558 = vmatpush3.bf16.xpose.msra.mxu0 %v2082_v61 }
 0x711   : > { %v1720_v63 = vpop.xlane.xlu1 %1719 }
 0x712   : > { %5112 = vrcp.f32 %v1720_v63 }
 0x715   : > { %v1723_v1 = vpop.xlane.xlu0 %1722  ;;  %v2065_v5 = vpop.permute.xlu1 %2064 }
 0x719   : > { %v6298_v51 = vpop.f32.mrb[20].mxu1  ;;  %v1717_v59 = vpop.xlane.xlu0 %1716 }
 0x71a   : > { %v6300_v23 = vpop.f32.mrb[21].mxu1  ;;  %5114 = vrcp.f32 %v1717_v59  ;;  %v2053_v49 = vpop.permute.xlu1 %2052  ;;  %v2088_v59 = vsel %vm819_vm1, %v2065_v5, 0 }
 0x71b   : > { %v6302_v55 = vpop.f32.mrb[22].mxu1  ;;  %5116 = vrcp.f32 %v1723_v1 }
 0x71c   : > { %v6306_v11 = vpop.f32.mrb[23].mxu1  ;;  %v5113_v40 = vpop.eup %5112 }
 0x71d   : > { %v1726_v9 = vpop.xlane.xlu0 %1725  ;;  %v1756_v58 = vmul.f32 %v5113_v40, %v6242_v27  ;;  %v6339_v40 = vld [vmem:[%s7356_s10 + $0x88] sm:$0xff] }
 0x71e   : > { %5118 = vrcp.f32 %v1726_v9  ;;  %v1952_v63 = vpop.permute.xlu1 %1951 }
 0x721   : > { %v2063_v14 = vpop.permute.xlu0 %2062 }
 0x722   : > { %4761 = vmatprep.subr.msk.bf16.mxu0 %vm819_vm1, %v2063_v14  ;;  %v2085_v60 = vsel %vm819_vm1, %v2063_v14, 0 }
 0x723   : > { %4560 = vmatpush3.bf16.xpose.msra.mxu0 %v2085_v60 }
 0x724   : > { %v5115_v39 = vpop.eup %5114  ;;  %4762 = vmatprep.subr.msk.bf16.mxu0 %vm819_vm1, %v2065_v5  ;;  %v6334_v5 = vld [vmem:[%s7356_s10 + $0x90] sm:$0xff] }
 0x725   : > { %v2051_v17 = vpop.permute.xlu0 %2050  ;;  %v1755_v47 = vmul.f32 %v5115_v39, %v6250_v4  ;;  %v5117_v26 = vpop.eup %5116 }
 0x726   : > { %v1757_v61 = vmul.f32 %v5117_v26, %v6246_v24  ;;  %v2057_v24 = vpop.permute.xlu1 %2056  ;;  %v6355_v26 = vld [vmem:[%s7356_s10 + $0x98] sm:$0xff] }
 0x727   : > { %v1765_v6 = vpack.c.bf16 %v1756_v58, %v1755_v47 }
 0x728   : > { %v5119_v28 = vpop.eup %5118 }
 0x729   : > { %4535 = vmatprep.mubr.msk.bf16.mxu0 %vm1010_vm2, %v1765_v6  ;;  %v1950_v32 = vpop.permute.xlu0 %1949  ;;  %v1758_v1 = vmul.f32 %v5119_v28, %v6254_v54  ;;  %v6329_v54 = vld [vmem:[%s7356_s10 + $0x80] sm:$0xff] }
 0x72a   : > { %4551 = vmatprep.mubr.msk.bf16.mxu1 %vm819_vm1, %v1950_v32 }
 0x72b   : > { %4552 = vmatmul.mubr.msk.bf16.gmra.mrb[28].mxu1 %vm819_vm1, %v1952_v63  ;;  %4562 = vmatpush3.bf16.xpose.msra.mxu0 %v2088_v59  ;;  %v1766_v4 = vpack.c.bf16 %v1758_v1, %v1757_v61 }
 0x72d   : > { %4536 = vmatmul.mubr.msk.bf16.gmra.mrb[52].mxu0 %vm1010_vm2, %v1766_v4  ;;  %v2055_v27 = vpop.permute.xlu0 %2054 }
 0x72e   : > { %4563 = vmatprep.mubr.msk.bf16.mxu0 %vm819_vm1, %v2051_v17 }
 0x735   : > { %4564 = vmatmul.mubr.msk.bf16.vlgmr.msra.gmra.mrb[56].mxu0 %vm819_vm1, %v2053_v49 }
 0x736   : > { %4567 = vmatprep.mubr.msk.bf16.mxu0 %vm819_vm1, %v2055_v27 }
 0x73d   : > { %4568 = vmatmul.mubr.msk.bf16.gmra.mrb[60].mxu0 %vm819_vm1, %v2057_v24  ;;  %v790_v24 = vld [vmem:[%s7356_s10 + $0xb8] sm:$0xff] }
 0x7b9   : > { %v4549_v9 = vpop.f32.mrb[24].mxu1 }
 0x7ba   : > { %v2019_v14 = vpop.f32.mrb[25].mxu1  ;;  %v6345_v17 = vadd.f32 %v4549_v9, %v6334_v5  ;;  %v787_v9 = vld [vmem:[%s7356_s10 + $0xa0] sm:$0xff] }
 0x7bb   : > { %v6342_v60 = vadd.f32 %v2019_v14, %v6329_v54  ;;  %v4550_v39 = vpop.f32.mrb[26].mxu1 }
 0x7bc   : > { %v2022_v49 = vpop.f32.mrb[27].mxu1  ;;  %v6360_v28 = vadd.f32 %v4550_v39, %v6355_v26  ;;  %v2161_v32 = vsel %vm1010_vm2, %v6345_v17, -inf  ;;  %v789_v39 = vld [vmem:[%s7356_s10 + $0xb0] sm:$0xff] }
 0x7bd   : > { %v6348_v47 = vadd.f32 %v2022_v49, %v6339_v40  ;;  %v2155_v58 = vsel %vm1010_vm2, %v6342_v60, -inf }
 0x7be   : > { %2156 = vmax.xlane.f32.xlu0 %v2155_v58  ;;  %v2164_v63 = vsel %vm1010_vm2, %v6360_v28, -inf  ;;  %v788_v58 = vld [vmem:[%s7356_s10 + $0xa8] sm:$0xff] }
 0x7bf   : > { %v2158_v6 = vsel %vm1010_vm2, %v6348_v47, -inf }
 0x7c0   : > { %2159 = vmax.xlane.f32.xlu1 %v2158_v6 }
 0x7c2   : > { %2162 = vmax.xlane.f32.xlu0 %v2161_v32 }
 0x7c4   : > { %v6364_v61 = vpop.f32.mrb[48].mxu0 }
 0x7c5   : > { %v6366_v1 = vpop.f32.mrb[49].mxu0 }
 0x7c6   : > { %v6370_v59 = vpop.f32.mrb[50].mxu0  ;;  %2165 = vmax.xlane.f32.xlu0 %v2164_v63 }
 0x7c7   : > { %v6374_v27 = vpop.f32.mrb[51].mxu0 }
 0x7fe   : > { %v4553_v14 = vpop.f32.mrb[28].mxu1 }
 0x7ff   : > { %v2035_v49 = vpop.f32.mrb[29].mxu1  ;;  %v6396_v62 = vadd.f32 %v4553_v14, %v789_v39 }
 0x800   : > { %v6387_v6 = vadd.f32 %v2035_v49, %v787_v9  ;;  %v6389_v32 = vpop.f32.mrb[52].mxu0  ;;  %v4554_v63 = vpop.f32.mrb[30].mxu1 }
 0x801   : > { %7438 = vst [vmem:[#allocation34_spill] sm:$0xff] %v6389_v32  ;;  %v6394_v4 = vpop.f32.mrb[53].mxu0  ;;  %v2038_v33 = vpop.f32.mrb[31].mxu1  ;;  %v6408_v21 = vadd.f32 %v4554_v63, %v790_v24  ;;  %v2173_v14 = vsel %vm1010_vm2, %v6396_v62, -inf }
 0x802   : > { %7439 = vst [vmem:[#allocation35_spill] sm:$0xff] %v6394_v4  ;;  %v6398_v25 = vadd.f32 %v2038_v33, %v788_v58  ;;  %v6400_v13 = vpop.f32.mrb[54].mxu0  ;;  %v2167_v49 = vsel %vm1010_vm2, %v6387_v6, -inf }
 0x803   : > { %7440 = vst [vmem:[#allocation36_spill] sm:$0xff] %v6400_v13  ;;  %v6406_v22 = vpop.f32.mrb[55].mxu0  ;;  %2168 = vmax.xlane.f32.xlu1 %v2167_v49  ;;  %v2176_v53 = vsel %vm1010_vm2, %v6408_v21, -inf }
 0x804   : > { %7441 = vst [vmem:[#allocation37_spill] sm:$0xff] %v6406_v22  ;;  %v2170_v33 = vsel %vm1010_vm2, %v6398_v25, -inf }
 0x805   : > { %2171 = vmax.xlane.f32.xlu0 %v2170_v33 }
 0x807   : > { %2174 = vmax.xlane.f32.xlu1 %v2173_v14 }
 0x808   : > { %v6416_v19 = vpop.f32.mrb[56].mxu0 }
 0x809   : > { %v6420_v18 = vpop.f32.mrb[57].mxu0  ;;  %2177 = vmax.xlane.f32.xlu0 %v2176_v53 }
 0x80a   : > { %v6422_v63 = vpop.f32.mrb[58].mxu0 }
 0x80b   : > { %v6424_v49 = vpop.f32.mrb[59].mxu0 }
 0x810   : > { %v4569_v20 = vpop.f32.mrb[60].mxu0 }
 0x811   : > { %v6426_v29 = vadd.f32 %v4569_v20, %v789_v39  ;;  %v2140_v33 = vpop.f32.mrb[61].mxu0 }
 0x812   : > { %v6428_v10 = vadd.f32 %v2140_v33, %v787_v9  ;;  %v4570_v42 = vpop.f32.mrb[62].mxu0 }
 0x813   : > { %v6430_v14 = vadd.f32 %v4570_v42, %v790_v24  ;;  %v2143_v2 = vpop.f32.mrb[63].mxu0 }
 0x814   : > { %v6432_v16 = vadd.f32 %v2143_v2, %v788_v58 }
 0x818   : > { %2339 = vrot.lane.b32.xlu1 %v5632_v30, %s5351_s14 }
 0x81c   : > { %2343 = vrot.lane.b32.xlu1 %v5642_v57, %s5351_s14 }
 0x81f   : > { %2341 = vrot.lane.b32.xlu0 %v5630_v45, %s5351_s14 }
 0x820   : > { %2428 = vrot.lane.b32.xlu1 %v5650_v8, %s5351_s14 }
 0x823   : > { %2345 = vrot.lane.b32.xlu0 %v5640_v56, %s5351_s14 }
 0x824   : > { %2525 = vrot.lane.b32.xlu1 %v5632_v30, %s5352_s30 }
 0x827   : > { %2430 = vrot.lane.b32.xlu0 %v5648_v7, %s5351_s14 }
 0x828   : > { %2432 = vrot.lane.b32.xlu1 %v5660_v37, %s5351_s14 }
 0x82b   : > { %2434 = vrot.lane.b32.xlu0 %v5658_v36, %s5351_s14  ;;  %s7293_s14 = scalar_lea.sflag [#allocation4], %s488_s28 }
 0x82c   : > { %2527 = vrot.lane.b32.xlu1 %v5630_v45, %s5352_s30 }
 0x82f   : > { %2630 = vrot.lane.b32.xlu0 %v5650_v8, %s5352_s30 }
 0x830   : > { %2529 = vrot.lane.b32.xlu1 %v5642_v57, %s5352_s30 }
 0x834   : > { %2531 = vrot.lane.b32.xlu1 %v5640_v56, %s5352_s30 }
 0x838   : > { %2632 = vrot.lane.b32.xlu1 %v5648_v7, %s5352_s30 }
 0x84b   : > { %v2157_v20 = vpop.xlane.xlu0 %2156 }
 0x84c   : > { %v2203_v53 = vsub.f32 %v6342_v60, %v2157_v20 }
 0x84d   : > { %v2160_v42 = vpop.xlane.xlu1 %2159 }
 0x84e   : > { %v2219_v9 = vmul.f32 1.442695, %v2203_v53  ;;  %v2204_v39 = vsub.f32 %v6348_v47, %v2160_v42 }
 0x84f   : > { %v2163_v2 = vpop.xlane.xlu0 %2162 }
 0x850   : > { %v2205_v24 = vsub.f32 %v6345_v17, %v2163_v2  ;;  %v2221_v35 = vmul.f32 1.442695, %v2204_v39 }
 0x852   : > { %v2223_v58 = vmul.f32 1.442695, %v2205_v24 }
 0x853   : > { %v2166_v33 = vpop.xlane.xlu0 %2165 }
 0x854   : > { %5120 = vpow2.f32 %v2223_v58  ;;  %v2206_v15 = vsub.f32 %v6360_v28, %v2166_v33 }
 0x855   : > { %5122 = vpow2.f32 %v2219_v9 }
 0x856   : > { %v2225_v38 = vmul.f32 1.442695, %v2206_v15 }
 0x858   : > { %5124 = vpow2.f32 %v2225_v38 }
 0x859   : > { %5126 = vpow2.f32 %v2221_v35 }
 0x85e   : > { %v6458_v3 = vpop.eup %5120 }
 0x85f   : > { %v2257_v60 = vsel %vm1010_vm2, %v6458_v3, 0.0  ;;  %v6462_v20 = vpop.eup %5122 }
 0x860   : > { %2258 = vadd.xlane.f32.xlu1 %v2257_v60  ;;  %v2251_v47 = vsel %vm1010_vm2, %v6462_v20, 0.0 }
 0x862   : > { %v6464_v17 = vpop.eup %5124 }
 0x863   : > { %v2260_v28 = vsel %vm1010_vm2, %v6464_v17, 0.0  ;;  %v6470_v53 = vpop.eup %5126 }
 0x864   : > { %2252 = vadd.xlane.f32.xlu1 %v2251_v47  ;;  %2261 = vadd.xlane.f32.xlu0 %v2260_v28  ;;  %v2254_v35 = vsel %vm1010_vm2, %v6470_v53, 0.0 }
 0x868   : > { %2255 = vadd.xlane.f32.xlu0 %v2254_v35 }
 0x890   : > { %v2169_v38 = vpop.xlane.xlu1 %2168 }
 0x891   : > { %v2207_v42 = vsub.f32 %v6387_v6, %v2169_v38 }
 0x892   : > { %v2172_v15 = vpop.xlane.xlu0 %2171 }
 0x893   : > { %v2208_v2 = vsub.f32 %v6398_v25, %v2172_v15  ;;  %v2227_v33 = vmul.f32 1.442695, %v2207_v42 }
 0x894   : > { %v2175_v24 = vpop.xlane.xlu1 %2174 }
 0x895   : > { %v2229_v9 = vmul.f32 1.442695, %v2208_v2  ;;  %v2209_v39 = vsub.f32 %v6396_v62, %v2175_v24 }
 0x896   : > { %v2178_v58 = vpop.xlane.xlu0 %2177 }
 0x897   : > { %5128 = vpow2.f32 %v2229_v9  ;;  %v2231_v60 = vmul.f32 1.442695, %v2209_v39  ;;  %v2210_v47 = vsub.f32 %v6408_v21, %v2178_v58  ;;  %v6482_v21 = vadd.f32 %v6422_v63, %v6355_v26 }
 0x898   : > { %v2340_v28 = vpop.permute.xlu1 %2339  ;;  %v6496_v26 = vadd.f32 %v6424_v49, %v6339_v40  ;;  %v6510_v49 = vadd.f32 %v6416_v19, %v6334_v5  ;;  %v2194_v5 = vsel %vm1010_vm2, %v6432_v16, -inf }
 0x899   : > { %5130 = vpow2.f32 %v2231_v60  ;;  %4571 = vmatprep.subr.bf16.mxu1 %v2340_v28  ;;  %v2233_v52 = vmul.f32 1.442695, %v2210_v47  ;;  %v2188_v63 = vsel %vm1010_vm2, %v6482_v21, -inf }
 0x89a   : > { %4572 = vmatpush3.bf16.msra.mxu1 %v2340_v28  ;;  %v2342_v35 = vpop.permute.xlu0 %2341  ;;  %5132 = vpow2.f32 %v2227_v33  ;;  %v2182_v40 = vsel %vm1010_vm2, %v6496_v26, -inf  ;;  %v2185_v19 = vsel %vm1010_vm2, %v6510_v49, -inf }
 0x89b   : > { %4573 = vmatprep.subr.bf16.mxu1 %v2342_v35  ;;  %5134 = vpow2.f32 %v2233_v52 }
 0x89c   : > { %v2344_v6 = vpop.permute.xlu1 %2343 }
 0x89e   : > { %4574 = vmatpush3.bf16.msra.mxu1 %v2342_v35  ;;  %v2346_v25 = vpop.permute.xlu0 %2345  ;;  %v2200_v35 = vsel %vm1010_vm2, %v6430_v14, -inf }
 0x89f   : > { %4575 = vmatprep.subr.bf16.mxu1 %v2344_v6 }
 0x8a0   : > { %v2429_v62 = vpop.permute.xlu1 %2428 }
 0x8a1   : > { %v6478_v38 = vpop.eup %5128  ;;  %4587 = vmatprep.subr.bf16.mxu0 %v2429_v62 }
 0x8a2   : > { %4576 = vmatpush3.bf16.msra.mxu1 %v2344_v6  ;;  %4588 = vmatpush3.bf16.msra.mxu0 %v2429_v62  ;;  %v2431_v15 = vpop.permute.xlu0 %2430  ;;  %v2266_v42 = vsel %vm1010_vm2, %v6478_v38, 0.0  ;;  %v6522_v6 = vadd.f32 %v6420_v18, %v6329_v54  ;;  %v2197_v62 = vsel %vm1010_vm2, %v6426_v29, -inf  ;;  %v2191_v18 = vsel %vm1010_vm2, %v6428_v10, -inf }
 0x8a3   : > { %v6486_v2 = vpop.eup %5130  ;;  %2267 = vadd.xlane.f32.xlu0 %v2266_v42  ;;  %4577 = vmatprep.subr.bf16.mxu1 %v2346_v25 }
 0x8a4   : > { %4589 = vmatprep.subr.bf16.mxu0 %v2431_v15  ;;  %v6488_v52 = vpop.permute.xlu1 %2525  ;;  %v2269_v24 = vsel %vm1010_vm2, %v6486_v2, 0.0  ;;  %v6492_v9 = vpop.eup %5132 }
 0x8a5   : > { %2270 = vadd.xlane.f32.xlu1 %v2269_v24  ;;  %v2263_v33 = vsel %vm1010_vm2, %v6492_v9, 0.0  ;;  %v6504_v60 = vpop.eup %5134 }
 0x8a6   : > { %4578 = vmatpush3.bf16.msra.mxu1 %v2346_v25  ;;  %4590 = vmatpush3.bf16.msra.mxu0 %v2431_v15  ;;  %v2435_v39 = vpop.permute.xlu0 %2434  ;;  %v2272_v47 = vsel %vm1010_vm2, %v6504_v60, 0.0  ;;  %v2179_v25 = vsel %vm1010_vm2, %v6522_v6, -inf }
 0x8a7   : > { %2189 = vmax.xlane.f32.xlu0 %v2188_v63  ;;  %4763 = vmatprep.subr.msk.bf16.mxu1 %vm819_vm1, %v6488_v52 }
 0x8a8   : > { %v2433_v58 = vpop.permute.xlu1 %2432 }
 0x8a9   : > { %2264 = vadd.xlane.f32.xlu1 %v2263_v33  ;;  %4591 = vmatprep.subr.bf16.mxu0 %v2433_v58 }
 0x8aa   : > { %4592 = vmatpush3.bf16.msra.mxu0 %v2433_v58  ;;  %v6514_v28 = vpop.permute.xlu0 %2630 }
 0x8ab   : > { %2183 = vmax.xlane.f32.xlu0 %v2182_v40  ;;  %4593 = vmatprep.subr.bf16.mxu0 %v2435_v39 }
 0x8ac   : > { %v2528_v54 = vpop.permute.xlu1 %2527 }
 0x8ad   : > { %2273 = vadd.xlane.f32.xlu1 %v2272_v47 }
 0x8ae   : > { %4594 = vmatpush3.bf16.msra.mxu0 %v2435_v39 }
 0x8af   : > { %2201 = vmax.xlane.f32.xlu0 %v2200_v35  ;;  %4767 = vmatprep.subr.msk.bf16.mxu0 %vm819_vm1, %v6514_v28 }
 0x8b0   : > { %v2530_v15 = vpop.permute.xlu1 %2529 }
 0x8b1   : > { %2186 = vmax.xlane.f32.xlu1 %v2185_v19 }
 0x8b3   : > { %2195 = vmax.xlane.f32.xlu0 %v2194_v5 }
 0x8b4   : > { %v2532_v42 = vpop.permute.xlu1 %2531 }
 0x8b5   : > { %2180 = vmax.xlane.f32.xlu1 %v2179_v25 }
 0x8b8   : > { %v6538_v24 = vpop.permute.xlu1 %2632 }
 0x8b9   : > { %2198 = vmax.xlane.f32.xlu1 %v2197_v62 }
 0x8bd   : > { %2192 = vmax.xlane.f32.xlu1 %v2191_v18 }
 0x8c9   : > { %2517 = vrot.lane.b32.xlu0 %v5632_v30, %s5353_s17 }
 0x8ce   : > { %2519 = vrot.lane.b32.xlu1 %v5630_v45, %s5353_s17 }
 0x8ed   : > { %v2259_v63 = vpop.xlane.xlu1 %2258 }
 0x8f1   : > { %v2253_v39 = vpop.xlane.xlu1 %2252  ;;  %v2262_v58 = vpop.xlane.xlu0 %2261 }
 0x8f2   : > { %5136 = vrcp.f32 %v2262_v58 }
 0x8f3   : > { %5138 = vrcp.f32 %v2253_v39 }
 0x8f4   : > { %5140 = vrcp.f32 %v2259_v63  ;;  %v2546_v63 = vsel %vm819_vm1, %v6488_v52, 0 }
 0x8f5   : > { %v2256_v33 = vpop.xlane.xlu0 %2255 }
 0x8f6   : > { %5142 = vrcp.f32 %v2256_v33 }
 0x8fc   : > { %v5137_v40 = vpop.eup %5136 }
 0x8fd   : > { %v5139_v47 = vpop.eup %5138  ;;  %v2318_v5 = vmul.f32 %v5137_v40, %v6464_v17  ;;  %v2549_v17 = vsel %vm819_vm1, %v2528_v54, 0 }
 0x8fe   : > { %v5141_v35 = vpop.eup %5140  ;;  %v2315_v25 = vmul.f32 %v5139_v47, %v6462_v20  ;;  %v2552_v20 = vsel %vm819_vm1, %v2530_v15, 0 }
 0x8ff   : > { %v2317_v18 = vmul.f32 %v5141_v35, %v6458_v3 }
 0x900   : > { %v5143_v19 = vpop.eup %5142 }
 0x901   : > { %v2316_v62 = vmul.f32 %v5143_v19, %v6470_v53  ;;  %v2332_v46 = vpack.c.bf16 %v2318_v5, %v2317_v18 }
 0x903   : > { %v2331_v12 = vpack.c.bf16 %v2316_v62, %v2315_v25 }
 0x905   : > { %4579 = vmatprep.mubr.msk.bf16.mxu1 %vm1010_vm2, %v2331_v12  ;;  %v2555_v12 = vsel %vm819_vm1, %v2532_v42, 0 }
 0x906   : > { %4580 = vmatmul.mubr.msk.bf16.vlgmr.msra.gmra.mrb[32].mxu1 %vm1010_vm2, %v2332_v46 }
 0x907   : > { %4604 = vmatpush3.bf16.xpose.msra.mxu1 %v2546_v63 }
 0x908   : > { %4764 = vmatprep.subr.msk.bf16.mxu1 %vm819_vm1, %v2528_v54 }
 0x90f   : > { %4606 = vmatpush3.bf16.xpose.msra.mxu1 %v2549_v17 }
 0x910   : > { %4765 = vmatprep.subr.msk.bf16.mxu1 %vm819_vm1, %v2530_v15 }
 0x917   : > { %4608 = vmatpush3.bf16.xpose.msra.mxu1 %v2552_v20 }
 0x918   : > { %4766 = vmatprep.subr.msk.bf16.mxu1 %vm819_vm1, %v2532_v42 }
 0x91f   : > { %4610 = vmatpush3.bf16.xpose.msra.mxu1 %v2555_v12 }
 0x930   : > { %v2268_v3 = vpop.xlane.xlu0 %2267 }
 0x931   : > { %5144 = vrcp.f32 %v2268_v3 }
 0x932   : > { %v2271_v46 = vpop.xlane.xlu1 %2270 }
 0x934   : > { %v2190_v53 = vpop.xlane.xlu0 %2189 }
 0x935   : > { %v2214_v58 = vsub.f32 %v6482_v21, %v2190_v53 }
 0x936   : > { %v2265_v52 = vpop.xlane.xlu1 %2264 }
 0x937   : > { %5146 = vrcp.f32 %v2265_v52  ;;  %v2241_v42 = vmul.f32 1.442695, %v2214_v58 }
 0x938   : > { %v2184_v39 = vpop.xlane.xlu0 %2183  ;;  %5148 = vrcp.f32 %v2271_v46 }
 0x939   : > { %v2212_v19 = vsub.f32 %v6496_v26, %v2184_v39 }
 0x93a   : > { %v2274_v54 = vpop.xlane.xlu1 %2273 }
 0x93b   : > { %5150 = vrcp.f32 %v2274_v54  ;;  %v5145_v40 = vpop.eup %5144  ;;  %v2237_v3 = vmul.f32 1.442695, %v2212_v19 }
 0x93c   : > { %v2202_v33 = vpop.xlane.xlu0 %2201  ;;  %v2320_v18 = vmul.f32 %v5145_v40, %v6478_v38 }
 0x93e   : > { %v2187_v15 = vpop.xlane.xlu1 %2186 }
 0x93f   : > { %v2213_v47 = vsub.f32 %v6510_v49, %v2187_v15 }
 0x940   : > { %v2196_v21 = vpop.xlane.xlu0 %2195 }
 0x941   : > { %v5147_v35 = vpop.eup %5146  ;;  %v2239_v5 = vmul.f32 1.442695, %v2213_v47 }
 0x942   : > { %v2181_v25 = vpop.xlane.xlu1 %2180  ;;  %v2319_v62 = vmul.f32 %v5147_v35, %v6492_v9  ;;  %v5149_v63 = vpop.eup %5148  ;;  %v2216_v35 = vsub.f32 %v6432_v16, %v2196_v21 }
 0x943   : > { %5152 = vpow2.f32 %v2239_v5  ;;  %v2211_v17 = vsub.f32 %v6522_v6, %v2181_v25  ;;  %v2321_v26 = vmul.f32 %v5149_v63, %v6486_v2 }
 0x944   : > { %v2333_v20 = vpack.c.bf16 %v2320_v18, %v2319_v62  ;;  %5154 = vpow2.f32 %v2241_v42  ;;  %v2518_v38 = vpop.permute.xlu0 %2517  ;;  %v2245_v42 = vmul.f32 1.442695, %v2216_v35  ;;  %v2218_v62 = vsub.f32 %v6430_v14, %v2202_v33 }
 0x945   : > { %v5151_v12 = vpop.eup %5150  ;;  %v2235_v49 = vmul.f32 1.442695, %v2211_v17 }
 0x946   : > { %v2199_v46 = vpop.xlane.xlu1 %2198  ;;  %4583 = vmatprep.mubr.msk.bf16.mxu1 %vm1010_vm2, %v2333_v20  ;;  %v2322_v53 = vmul.f32 %v5151_v12, %v6504_v60  ;;  %v2249_v63 = vmul.f32 1.442695, %v2218_v62 }
 0x947   : > { %5156 = vpow2.f32 %v2235_v49  ;;  %v2217_v19 = vsub.f32 %v6426_v29, %v2199_v46 }
 0x948   : > { %v2334_v9 = vpack.c.bf16 %v2322_v53, %v2321_v26  ;;  %5158 = vpow2.f32 %v2237_v3 }
 0x949   : > { %5160 = vpow2.f32 %v2245_v42  ;;  %v2247_v5 = vmul.f32 1.442695, %v2217_v19 }
 0x94a   : > { %4584 = vmatmul.mubr.msk.bf16.gmra.mrb[36].mxu1 %vm1010_vm2, %v2334_v9  ;;  %v2193_v6 = vpop.xlane.xlu1 %2192 }
 0x94b   : > { %4611 = vmatprep.mubr.msk.bf16.mxu1 %vm819_vm1, %v2518_v38  ;;  %v2215_v25 = vsub.f32 %v6428_v10, %v2193_v6  ;;  %5162 = vpow2.f32 %v2247_v5 }
 0x94d   : > { %v6565_v52 = vpop.eup %5152  ;;  %v2243_v18 = vmul.f32 1.442695, %v2215_v25 }
 0x94e   : > { %v2281_v39 = vsel %vm1010_vm2, %v6565_v52, 0.0  ;;  %v6569_v54 = vpop.eup %5154  ;;  %v2520_v60 = vpop.permute.xlu1 %2519 }
 0x94f   : > { %2282 = vadd.xlane.f32.xlu0 %v2281_v39  ;;  %v2284_v15 = vsel %vm1010_vm2, %v6569_v54, 0.0  ;;  %5164 = vpow2.f32 %v2243_v18 }
 0x950   : > { %5166 = vpow2.f32 %v2249_v63  ;;  %v2651_v63 = vsel %vm819_vm1, %v6514_v28, 0 }
 0x951   : > { %v6571_v2 = vpop.eup %5156 }
 0x952   : > { %4612 = vmatmul.mubr.msk.bf16.vlgmr.msra.gmra.mrb[40].mxu1 %vm819_vm1, %v2520_v60  ;;  %v2275_v58 = vsel %vm1010_vm2, %v6571_v2, 0.0  ;;  %v5159_v40 = vpop.eup %5158 }
 0x953   : > { %2276 = vadd.xlane.f32.xlu1 %v2275_v58  ;;  %2285 = vadd.xlane.f32.xlu0 %v2284_v15  ;;  %v2278_v47 = vsel %vm1010_vm2, %v5159_v40, 0.0  ;;  %v6587_v17 = vpop.eup %5160 }
 0x954   : > { %v2290_v20 = vsel %vm1010_vm2, %v6587_v17, 0.0 }
 0x955   : > { %v6591_v16 = vpop.eup %5162 }
 0x956   : > { %v2293_v29 = vsel %vm1010_vm2, %v6591_v16, 0.0 }
 0x957   : > { %2279 = vadd.xlane.f32.xlu0 %v2278_v47 }
 0x959   : > { %v6595_v21 = vpop.eup %5164 }
 0x95a   : > { %v2287_v10 = vsel %vm1010_vm2, %v6595_v21, 0.0  ;;  %v6599_v14 = vpop.eup %5166 }
 0x95b   : > { %v2296_v33 = vsel %vm1010_vm2, %v6599_v14, 0.0 }
 0x964   : > { %2521 = vrot.lane.b32.xlu1 %v5642_v57, %s5353_s17 }
 0x96d   : > { %2634 = vrot.lane.b32.xlu0 %v5660_v37, %s5352_s30 }
 0x988   : > { %2291 = vadd.xlane.f32.xlu1 %v2290_v20 }
 0x98c   : > { %2294 = vadd.xlane.f32.xlu0 %v2293_v29 }
 0x990   : > { %2288 = vadd.xlane.f32.xlu0 %v2287_v10 }
 0x994   : > { %2297 = vadd.xlane.f32.xlu0 %v2296_v33 }
 0x999   : > { %2636 = vrot.lane.b32.xlu1 %v5658_v36, %s5352_s30  ;;  %s5358_s30 = smov [#allocation3]  }
 0x99d   : > { %2624 = vrot.lane.b32.xlu1 %v5648_v7, %s5353_s17 }
 0x9a1   : > { %2628 = vrot.lane.b32.xlu1 %v5658_v36, %s5353_s17 }
 0x9aa   : > { %2523 = vrot.lane.b32.xlu0 %v5640_v56, %s5353_s17 }
 0x9ae   : > { %2622 = vrot.lane.b32.xlu0 %v5650_v8, %s5353_s17 }
 0x9b2   : > { %2626 = vrot.lane.b32.xlu0 %v5660_v37, %s5353_s17  ;;  %s5357_s17 = smov 24  }
 0x9d9   : > { %v6615_v12 = vpop.f32.mrb[32].mxu1 }
 0x9da   : > { %v6617_v3 = vpop.f32.mrb[33].mxu1 }
 0x9db   : > { %v6619_v49 = vpop.f32.mrb[34].mxu1 }
 0x9dc   : > { %v6623_v26 = vpop.f32.mrb[35].mxu1  ;;  %v2283_v9 = vpop.xlane.xlu0 %2282 }
 0x9e0   : > { %v2277_v38 = vpop.xlane.xlu1 %2276  ;;  %v2286_v6 = vpop.xlane.xlu0 %2285 }
 0x9e1   : > { %5168 = vrcp.f32 %v2286_v6 }
 0x9e2   : > { %5170 = vrcp.f32 %v2277_v38 }
 0x9e3   : > { %5172 = vrcp.f32 %v2283_v9 }
 0x9e4   : > { %v2522_v39 = vpop.permute.xlu1 %2521  ;;  %v2280_v60 = vpop.xlane.xlu0 %2279 }
 0x9e5   : > { %5174 = vrcp.f32 %v2280_v60  ;;  %4615 = vmatprep.mubr.msk.bf16.mxu1 %vm819_vm1, %v2522_v39 }
 0x9eb   : > { %v5169_v58 = vpop.eup %5168 }
 0x9ec   : > { %v5171_v15 = vpop.eup %5170  ;;  %v2326_v42 = vmul.f32 %v5169_v58, %v6569_v54  ;;  %v2654_v54 = vsel %vm819_vm1, %v6538_v24, 0  ;;  %v6658_v58 = vld [vmem:[%s7356_s10 + $0xc0] sm:$0xff] }
 0x9ed   : > { %v5173_v47 = vpop.eup %5172  ;;  %v2323_v19 = vmul.f32 %v5171_v15, %v6571_v2  ;;  %v2635_v2 = vpop.permute.xlu0 %2634 }
 0x9ee   : > { %v2325_v25 = vmul.f32 %v5173_v47, %v6565_v52  ;;  %v2657_v52 = vsel %vm819_vm1, %v2635_v2, 0  ;;  %v6663_v47 = vld [vmem:[%s7356_s10 + $0xd0] sm:$0xff] }
 0x9ef   : > { %v5175_v35 = vpop.eup %5174 }
 0x9f0   : > { %v2324_v5 = vmul.f32 %v5175_v35, %v5159_v40  ;;  %v2336_v18 = vpack.c.bf16 %v2326_v42, %v2325_v25 }
 0x9f2   : > { %v2335_v62 = vpack.c.bf16 %v2324_v5, %v2323_v19  ;;  %v6668_v19 = vld [vmem:[%s7356_s10 + $0xc8] sm:$0xff] }
 0x9f4   : > { %4595 = vmatprep.mubr.msk.bf16.mxu0 %vm1010_vm2, %v2335_v62 }
 0x9f5   : > { %4596 = vmatmul.mubr.msk.bf16.vlgmr.msra.gmra.mrb[64].mxu0 %vm1010_vm2, %v2336_v18 }
 0x9f6   : > { %4620 = vmatpush3.bf16.xpose.msra.mxu0 %v2651_v63 }
 0x9f7   : > { %4768 = vmatprep.subr.msk.bf16.mxu0 %vm819_vm1, %v6538_v24 }
 0x9fe   : > { %4622 = vmatpush3.bf16.xpose.msra.mxu0 %v2654_v54 }
 0x9ff   : > { %4769 = vmatprep.subr.msk.bf16.mxu0 %vm819_vm1, %v2635_v2 }
 0xa06   : > { %4624 = vmatpush3.bf16.xpose.msra.mxu0 %v2657_v52 }
 0xa15   : > { %v2292_v40 = vpop.xlane.xlu1 %2291 }
 0xa16   : > { %5176 = vrcp.f32 %v2292_v40  ;;  %v6683_v40 = vld [vmem:[%s7356_s10 + $0xd8] sm:$0xff] }
 0xa19   : > { %v2637_v20 = vpop.permute.xlu1 %2636  ;;  %v2295_v29 = vpop.xlane.xlu0 %2294 }
 0xa1a   : > { %v2660_v10 = vsel %vm819_vm1, %v2637_v20, 0  ;;  %4770 = vmatprep.subr.msk.bf16.mxu0 %vm819_vm1, %v2637_v20 }
 0xa1b   : > { %4626 = vmatpush3.bf16.xpose.msra.mxu0 %v2660_v10 }
 0xa1d   : > { %v6643_v28 = vpop.f32.mrb[36].mxu1  ;;  %v2289_v33 = vpop.xlane.xlu0 %2288 }
 0xa1e   : > { %v6645_v24 = vpop.f32.mrb[37].mxu1  ;;  %5178 = vrcp.f32 %v2289_v33 }
 0xa1f   : > { %v6647_v9 = vpop.f32.mrb[38].mxu1  ;;  %5180 = vrcp.f32 %v2295_v29 }
 0xa20   : > { %v6651_v6 = vpop.f32.mrb[39].mxu1  ;;  %v5177_v5 = vpop.eup %5176 }
 0xa21   : > { %v2298_v60 = vpop.xlane.xlu0 %2297  ;;  %v2328_v29 = vmul.f32 %v5177_v5, %v6587_v17 }
 0xa22   : > { %5182 = vrcp.f32 %v2298_v60 }
 0xa25   : > { %v4613_v15 = vpop.f32.mrb[40].mxu1  ;;  %v2524_v35 = vpop.permute.xlu0 %2523 }
 0xa26   : > { %v2591_v42 = vpop.f32.mrb[41].mxu1  ;;  %4616 = vmatmul.mubr.msk.bf16.gmra.mrb[44].mxu1 %vm819_vm1, %v2524_v35  ;;  %v6675_v54 = vadd.f32 %v4613_v15, %v6663_v47 }
 0xa27   : > { %v6671_v25 = vadd.f32 %v2591_v42, %v6658_v58  ;;  %v4614_v62 = vpop.f32.mrb[42].mxu1 }
 0xa28   : > { %v2594_v18 = vpop.f32.mrb[43].mxu1  ;;  %v5179_v63 = vpop.eup %5178  ;;  %v2603_v35 = vadd.f32 %v4614_v62, %v6683_v40  ;;  %v2733_v42 = vsel %vm1010_vm2, %v6675_v54, -inf }
 0xa29   : > { %v2595_v2 = vadd.f32 %v2594_v18, %v6668_v19  ;;  %v2727_v52 = vsel %vm1010_vm2, %v6671_v25, -inf  ;;  %v2327_v20 = vmul.f32 %v5179_v63, %v6595_v21  ;;  %v5181_v10 = vpop.eup %5180  ;;  %v2623_v5 = vpop.permute.xlu0 %2622 }
 0xa2a   : > { %2728 = vmax.xlane.f32.xlu0 %v2727_v52  ;;  %v2329_v18 = vmul.f32 %v5181_v10, %v6591_v16  ;;  %v2736_v17 = vsel %vm1010_vm2, %v2603_v35, -inf  ;;  %v2625_v62 = vpop.permute.xlu1 %2624  ;;  %v797_v10 = vld [vmem:[%s7356_s10 + $0xf0] sm:$0xff] }
 0xa2b   : > { %v2730_v33 = vsel %vm1010_vm2, %v2595_v2, -inf  ;;  %v2337_v60 = vpack.c.bf16 %v2328_v29, %v2327_v20 }
 0xa2c   : > { %2731 = vmax.xlane.f32.xlu1 %v2730_v33  ;;  %v5183_v15 = vpop.eup %5182 }
 0xa2d   : > { %4599 = vmatprep.mubr.msk.bf16.mxu0 %vm1010_vm2, %v2337_v60  ;;  %v2330_v21 = vmul.f32 %v5183_v15, %v6599_v14  ;;  %v2627_v52 = vpop.permute.xlu0 %2626  ;;  %v796_v60 = vld [vmem:[%s7356_s10 + $0xe8] sm:$0xff] }
 0xa2e   : > { %2734 = vmax.xlane.f32.xlu0 %v2733_v42  ;;  %v2629_v20 = vpop.permute.xlu1 %2628 }
 0xa2f   : > { %v2338_v63 = vpack.c.bf16 %v2330_v21, %v2329_v18 }
 0xa31   : > { %4600 = vmatmul.mubr.msk.bf16.gmra.mrb[68].mxu0 %vm1010_vm2, %v2338_v63 }
 0xa32   : > { %2737 = vmax.xlane.f32.xlu0 %v2736_v17  ;;  %4627 = vmatprep.mubr.msk.bf16.mxu0 %vm819_vm1, %v2623_v5 }
 0xa39   : > { %4628 = vmatmul.mubr.msk.bf16.vlgmr.msra.gmra.mrb[72].mxu0 %vm819_vm1, %v2625_v62  ;;  %v795_v62 = vld [vmem:[%s7356_s10 + $0xe0] sm:$0xff] }
 0xa3a   : > { %4631 = vmatprep.mubr.msk.bf16.mxu0 %vm819_vm1, %v2627_v52 }
 0xa41   : > { %4632 = vmatmul.mubr.msk.bf16.gmra.mrb[76].mxu0 %vm819_vm1, %v2629_v20 }
 0xab7   : > { %v2729_v15 = vpop.xlane.xlu0 %2728 }
 0xab8   : > { %v2775_v13 = vsub.f32 %v6671_v25, %v2729_v15 }
 0xab9   : > { %v2732_v63 = vpop.xlane.xlu1 %2731 }
 0xaba   : > { %v2776_v17 = vsub.f32 %v2595_v2, %v2732_v63  ;;  %v798_v2 = vld [vmem:[%s7356_s10 + $0xf8] sm:$0xff] }
 0xabb   : > { %v2735_v42 = vpop.xlane.xlu0 %2734 }
 0xabc   : > { %v2793_v20 = vmul.f32 1.442695, %v2776_v17 }
 0xabf   : > { %v2738_v18 = vpop.xlane.xlu0 %2737 }
 0xac0   : > { %v2778_v21 = vsub.f32 %v2603_v35, %v2738_v18 }
 0xac2   : > { %v2797_v5 = vmul.f32 1.442695, %v2778_v21 }
 0xac4   : > { %5184 = vpow2.f32 %v2797_v5 }
 0xac5   : > { %5186 = vpow2.f32 %v2793_v20 }
 0xac8   : > { %v6700_v16 = vpop.f32.mrb[64].mxu0 }
 0xac9   : > { %v6702_v14 = vpop.f32.mrb[65].mxu0 }
 0xaca   : > { %7442 = vst [vmem:[#allocation38_spill] sm:$0xff] %v6702_v14  ;;  %v6704_v29 = vpop.f32.mrb[66].mxu0 }
 0xacb   : > { %v6708_v33 = vpop.f32.mrb[67].mxu0 }
 0xacc   : > { %7443 = vst [vmem:[#allocation39_spill] sm:$0xff] %v6708_v33  ;;  %v2791_v33 = vmul.f32 1.442695, %v2775_v13 }
 0xace   : > { %v6728_v43 = vpop.eup %5184 }
 0xaf9   : > { %v4617_v52 = vpop.f32.mrb[44].mxu1 }
 0xafa   : > { %v2607_v39 = vpop.f32.mrb[45].mxu1  ;;  %v2616_v63 = vadd.f32 %v4617_v52, %v797_v10 }
 0xafb   : > { %v2608_v35 = vadd.f32 %v2607_v39, %v795_v62  ;;  %v4618_v18 = vpop.f32.mrb[46].mxu1 }
 0xafc   : > { %v2610_v21 = vpop.f32.mrb[47].mxu1  ;;  %v2619_v5 = vadd.f32 %v4618_v18, %v798_v2  ;;  %v2745_v53 = vsel %vm1010_vm2, %v2616_v63, -inf }
 0xafd   : > { %v2611_v38 = vadd.f32 %v2610_v21, %v796_v60  ;;  %v2739_v17 = vsel %vm1010_vm2, %v2608_v35, -inf }
 0xafe   : > { %2740 = vmax.xlane.f32.xlu1 %v2739_v17  ;;  %v2748_v39 = vsel %vm1010_vm2, %v2619_v5, -inf }
 0xaff   : > { %v2742_v46 = vsel %vm1010_vm2, %v2611_v38, -inf }
 0xb00   : > { %2743 = vmax.xlane.f32.xlu0 %v2742_v46  ;;  %v2832_v46 = vsel %vm1010_vm2, %v6728_v43, 0.0 }
 0xb02   : > { %2746 = vmax.xlane.f32.xlu1 %v2745_v53  ;;  %v6742_v53 = vpop.eup %5186 }
 0xb04   : > { %v6730_v0 = vpop.f32.mrb[68].mxu0  ;;  %2749 = vmax.xlane.f32.xlu0 %v2748_v39  ;;  %v2826_v39 = vsel %vm1010_vm2, %v6742_v53, 0.0 }
 0xb05   : > { %7444 = vst [vmem:[#allocation40_spill] sm:$0xff] %v6730_v0  ;;  %v6732_v52 = vpop.f32.mrb[69].mxu0 }
 0xb06   : > { %7445 = vst [vmem:[#allocation41_spill] sm:$0xff] %v6732_v52  ;;  %v6734_v21 = vpop.f32.mrb[70].mxu0 }
 0xb07   : > { %7446 = vst [vmem:[#allocation42_spill] sm:$0xff] %v6734_v21  ;;  %v6738_v18 = vpop.f32.mrb[71].mxu0 }
 0xb08   : > { %7447 = vst [vmem:[#allocation43_spill] sm:$0xff] %v6738_v18  ;;  %2833 = vadd.xlane.f32.xlu0 %v2832_v46 }
 0xb0c   : > { %v4629_v34 = vpop.f32.mrb[72].mxu0  ;;  %2827 = vadd.xlane.f32.xlu0 %v2826_v39  ;;  %v2777_v39 = vsub.f32 %v6675_v54, %v2735_v42 }
 0xb0d   : > { %v2696_v50 = vpop.f32.mrb[73].mxu0 }
 0xb0e   : > { %v4630_v4 = vpop.f32.mrb[74].mxu0  ;;  %v2795_v14 = vmul.f32 1.442695, %v2777_v39 }
 0xb0f   : > { %v2699_v22 = vpop.f32.mrb[75].mxu0 }
 0xb10   : > { %5188 = vpow2.f32 %v2795_v14 }
 0xb11   : > { %5190 = vpow2.f32 %v2791_v33 }
 0xb13   : > { %2911 = vrot.lane.b32.xlu1 %v5632_v30, %s5354_s13 }
 0xb14   : > { %v4633_v20 = vpop.f32.mrb[76].mxu0 }
 0xb15   : > { %v6750_v0 = vadd.f32 %v4633_v20, %v797_v10  ;;  %v2712_v21 = vpop.f32.mrb[77].mxu0 }
 0xb16   : > { %v6752_v32 = vadd.f32 %v2712_v21, %v795_v62  ;;  %v4634_v17 = vpop.f32.mrb[78].mxu0 }
 0xb17   : > { %v6754_v46 = vadd.f32 %v4634_v17, %v798_v2  ;;  %v2715_v52 = vpop.f32.mrb[79].mxu0 }
 0xb18   : > { %v6756_v18 = vadd.f32 %v2715_v52, %v796_v60 }
 0xb1a   : > { %v6760_v30 = vpop.eup %5188 }
 0xb1b   : > { %v2829_v10 = vsel %vm1010_vm2, %v6760_v30, 0.0  ;;  %v6764_v62 = vpop.eup %5190 }
 0xb1c   : > { %v2823_v60 = vsel %vm1010_vm2, %v6764_v62, 0.0 }
 0xb37   : > { %2830 = vadd.xlane.f32.xlu1 %v2829_v10 }
 0xb3b   : > { %2824 = vadd.xlane.f32.xlu1 %v2823_v60 }
 0xb8b   : > { %v2741_v2 = vpop.xlane.xlu1 %2740 }
 0xb8c   : > { %v2779_v54 = vsub.f32 %v2608_v35, %v2741_v2  ;;  %v2705_v2 = vadd.f32 %v4629_v34, %v6663_v47 }
 0xb8d   : > { %v2744_v42 = vpop.xlane.xlu0 %2743 }
 0xb8e   : > { %v2780_v15 = vsub.f32 %v2611_v38, %v2744_v42  ;;  %v2799_v14 = vmul.f32 1.442695, %v2779_v54  ;;  %v2708_v42 = vadd.f32 %v4630_v4, %v6683_v40  ;;  %v2769_v4 = vsel %vm1010_vm2, %v6750_v0, -inf }
 0xb8f   : > { %v2747_v25 = vpop.xlane.xlu1 %2746 }
 0xb90   : > { %v2781_v13 = vsub.f32 %v2616_v63, %v2747_v25  ;;  %v2801_v17 = vmul.f32 1.442695, %v2780_v15  ;;  %v2697_v15 = vadd.f32 %v2696_v50, %v6658_v58  ;;  %v2772_v50 = vsel %vm1010_vm2, %v6754_v46, -inf }
 0xb91   : > { %v2750_v33 = vpop.xlane.xlu0 %2749  ;;  %v2766_v58 = vsel %vm1010_vm2, %v6756_v18, -inf }
 0xb92   : > { %v2803_v52 = vmul.f32 1.442695, %v2781_v13  ;;  %v2782_v21 = vsub.f32 %v2619_v5, %v2750_v33  ;;  %v2757_v13 = vsel %vm1010_vm2, %v2705_v2, -inf  ;;  %v2760_v33 = vsel %vm1010_vm2, %v2708_v42, -inf }
 0xb93   : > { %v2912_v20 = vpop.permute.xlu1 %2911  ;;  %v2751_v34 = vsel %vm1010_vm2, %v2697_v15, -inf }
 0xb94   : > { %5192 = vpow2.f32 %v2803_v52  ;;  %v2805_v39 = vmul.f32 1.442695, %v2782_v21  ;;  %4635 = vmatprep.subr.bf16.mxu1 %v2912_v20 }
 0xb95   : > { %5194 = vpow2.f32 %v2799_v14  ;;  %4636 = vmatpush3.bf16.msra.mxu1 %v2912_v20  ;;  %v2700_v14 = vadd.f32 %v2699_v22, %v6668_v19  ;;  %v2763_v22 = vsel %vm1010_vm2, %v6752_v32, -inf  ;;  %v2834_v19 = vpop.xlane.xlu0 %2833 }
 0xb96   : > { %5196 = vpow2.f32 %v2805_v39 }
 0xb97   : > { %5198 = vpow2.f32 %v2801_v17  ;;  %v2754_v47 = vsel %vm1010_vm2, %v2700_v14, -inf }
 0xb98   : > { %5200 = vrcp.f32 %v2834_v19 }
 0xb99   : > { %v2828_v40 = vpop.xlane.xlu0 %2827 }
 0xb9e   : > { %v6768_v10 = vpop.eup %5192 }
 0xb9f   : > { %v6770_v35 = vpop.eup %5194  ;;  %v2841_v38 = vsel %vm1010_vm2, %v6768_v10, 0.0 }
 0xba0   : > { %v6774_v63 = vpop.eup %5196  ;;  %2842 = vadd.xlane.f32.xlu1 %v2841_v38  ;;  %v2835_v54 = vsel %vm1010_vm2, %v6770_v35, 0.0 }
 0xba1   : > { %v2844_v5 = vsel %vm1010_vm2, %v6774_v63, 0.0  ;;  %v6778_v60 = vpop.eup %5198 }
 0xba2   : > { %2845 = vadd.xlane.f32.xlu0 %v2844_v5  ;;  %v2838_v25 = vsel %vm1010_vm2, %v6778_v60, 0.0  ;;  %v5201_v20 = vpop.eup %5200 }
 0xba3   : > { %v6807_v39 = vmul.f32 %v5201_v20, %v6728_v43 }
 0xba4   : > { %2836 = vadd.xlane.f32.xlu1 %v2835_v54 }
 0xba6   : > { %2839 = vadd.xlane.f32.xlu0 %v2838_v25 }
 0xba8   : > { %2758 = vmax.xlane.f32.xlu1 %v2757_v13 }
 0xbaa   : > { %2761 = vmax.xlane.f32.xlu0 %v2760_v33 }
 0xbac   : > { %2752 = vmax.xlane.f32.xlu1 %v2751_v34 }
 0xbae   : > { %2755 = vmax.xlane.f32.xlu0 %v2754_v47 }
 0xbb0   : > { %2770 = vmax.xlane.f32.xlu1 %v2769_v4 }
 0xbb2   : > { %2773 = vmax.xlane.f32.xlu0 %v2772_v50 }
 0xbb4   : > { %2764 = vmax.xlane.f32.xlu1 %v2763_v22 }
 0xbb6   : > { %2767 = vmax.xlane.f32.xlu0 %v2766_v58 }
 0xbc4   : > { %v2831_v52 = vpop.xlane.xlu1 %2830 }
 0xbc5   : > { %5202 = vrcp.f32 %v2831_v52  ;;  %2913 = vrot.lane.b32.xlu1 %v5630_v45, %s5354_s13 }
 0xbc6   : > { %5204 = vrcp.f32 %v2828_v40 }
 0xbc8   : > { %v2825_v21 = vpop.xlane.xlu1 %2824 }
 0xbc9   : > { %5206 = vrcp.f32 %v2825_v21  ;;  %2917 = vrot.lane.b32.xlu1 %v5640_v56, %s5354_s13 }
 0xbcc   : > { %2915 = vrot.lane.b32.xlu0 %v5642_v57, %s5354_s13 }
 0xbcf   : > { %v5203_v17 = vpop.eup %5202 }
 0xbd0   : > { %v6810_v38 = vmul.f32 %v5203_v17, %v6760_v30  ;;  %v5205_v5 = vpop.eup %5204 }
 0xbd1   : > { %v2888_v56 = vmul.f32 %v5205_v5, %v6742_v53 }
 0xbd2   : > { %v2904_v45 = vpack.c.bf16 %v6807_v39, %v6810_v38 }
 0xbd3   : > { %v5207_v54 = vpop.eup %5206 }
 0xbd4   : > { %v2887_v25 = vmul.f32 %v5207_v54, %v6764_v62 }
 0xbd6   : > { %v2903_v13 = vpack.c.bf16 %v2888_v56, %v2887_v25 }
 0xbd8   : > { %4643 = vmatprep.mubr.msk.bf16.mxu1 %vm1010_vm2, %v2903_v13 }
 0xc2d   : > { %v2843_v57 = vpop.xlane.xlu1 %2842 }
 0xc2f   : > { %v2846_v33 = vpop.xlane.xlu0 %2845 }
 0xc31   : > { %v2837_v34 = vpop.xlane.xlu1 %2836 }
 0xc33   : > { %v2840_v43 = vpop.xlane.xlu0 %2839 }
 0xc35   : > { %v2759_v47 = vpop.xlane.xlu1 %2758 }
 0xc36   : > { %v2785_v4 = vsub.f32 %v2705_v2, %v2759_v47 }
 0xc37   : > { %v2762_v30 = vpop.xlane.xlu0 %2761 }
 0xc38   : > { %v2811_v50 = vmul.f32 1.442695, %v2785_v4  ;;  %v2786_v22 = vsub.f32 %v2708_v42, %v2762_v30 }
 0xc39   : > { %v2753_v58 = vpop.xlane.xlu1 %2752 }
 0xc3a   : > { %5208 = vpow2.f32 %v2811_v50  ;;  %v2783_v19 = vsub.f32 %v2697_v15, %v2753_v58  ;;  %v2813_v52 = vmul.f32 1.442695, %v2786_v22 }
 0xc3b   : > { %v2756_v40 = vpop.xlane.xlu0 %2755 }
 0xc3c   : > { %v2807_v62 = vmul.f32 1.442695, %v2783_v19  ;;  %v2784_v21 = vsub.f32 %v2700_v14, %v2756_v40 }
 0xc3d   : > { %v2771_v53 = vpop.xlane.xlu1 %2770 }
 0xc3e   : > { %5210 = vpow2.f32 %v2807_v62  ;;  %v2789_v20 = vsub.f32 %v6750_v0, %v2771_v53  ;;  %v2809_v5 = vmul.f32 1.442695, %v2784_v21 }
 0xc3f   : > { %v2774_v17 = vpop.xlane.xlu0 %2773  ;;  %5212 = vpow2.f32 %v2813_v52 }
 0xc40   : > { %v2819_v54 = vmul.f32 1.442695, %v2789_v20  ;;  %v2790_v2 = vsub.f32 %v6754_v46, %v2774_v17  ;;  %5214 = vrcp.f32 %v2840_v43 }
 0xc41   : > { %v2765_v25 = vpop.xlane.xlu1 %2764 }
 0xc42   : > { %5216 = vpow2.f32 %v2819_v54  ;;  %v2787_v42 = vsub.f32 %v6752_v32, %v2765_v25  ;;  %v2821_v15 = vmul.f32 1.442695, %v2790_v2 }
 0xc43   : > { %5218 = vrcp.f32 %v2837_v34  ;;  %v2768_v56 = vpop.xlane.xlu0 %2767 }
 0xc44   : > { %v6820_v13 = vpop.eup %5208  ;;  %5220 = vpow2.f32 %v2809_v5  ;;  %v2815_v14 = vmul.f32 1.442695, %v2787_v42  ;;  %v2788_v0 = vsub.f32 %v6756_v18, %v2768_v56 }
 0xc45   : > { %5222 = vrcp.f32 %v2846_v33  ;;  %v2914_v47 = vpop.permute.xlu1 %2913  ;;  %v2853_v4 = vsel %vm1010_vm2, %v6820_v13, 0.0 }
 0xc46   : > { %5224 = vpow2.f32 %v2815_v14  ;;  %v2817_v46 = vmul.f32 1.442695, %v2788_v0  ;;  %4637 = vmatprep.subr.bf16.mxu1 %v2914_v47  ;;  %2854 = vadd.xlane.f32.xlu0 %v2853_v4 }
 0xc47   : > { %5226 = vpow2.f32 %v2821_v15  ;;  %4638 = vmatpush3.bf16.msra.mxu1 %v2914_v47  ;;  %v2916_v32 = vpop.permute.xlu0 %2915 }
 0xc48   : > { %v6825_v34 = vpop.eup %5210  ;;  %5228 = vpow2.f32 %v2817_v46  ;;  %4639 = vmatprep.subr.bf16.mxu1 %v2916_v32 }
 0xc49   : > { %v2847_v43 = vsel %vm1010_vm2, %v6825_v34, 0.0  ;;  %v6829_v18 = vpop.eup %5212  ;;  %5230 = vrcp.f32 %v2843_v57  ;;  %v2918_v30 = vpop.permute.xlu1 %2917 }
 0xc4a   : > { %2848 = vadd.xlane.f32.xlu0 %v2847_v43  ;;  %v5215_v33 = vpop.eup %5214  ;;  %v2856_v19 = vsel %vm1010_vm2, %v6829_v18, 0.0 }
 0xc4b   : > { %4640 = vmatpush3.bf16.msra.mxu1 %v2916_v32  ;;  %v2892_v52 = vmul.f32 %v5215_v33, %v6778_v60 }
 0xc4c   : > { %v6831_v50 = vpop.eup %5216  ;;  %4641 = vmatprep.subr.bf16.mxu1 %v2918_v30 }
 0xc4d   : > { %v5219_v22 = vpop.eup %5218  ;;  %v2865_v58 = vsel %vm1010_vm2, %v6831_v50, 0.0 }
 0xc4e   : > { %v5221_v40 = vpop.eup %5220  ;;  %2866 = vadd.xlane.f32.xlu1 %v2865_v58  ;;  %2857 = vadd.xlane.f32.xlu0 %v2856_v19  ;;  %v2891_v21 = vmul.f32 %v5219_v22, %v6770_v35 }
 0xc4f   : > { %v5223_v57 = vpop.eup %5222  ;;  %4642 = vmatpush3.bf16.msra.mxu1 %v2918_v30  ;;  %v2850_v17 = vsel %vm1010_vm2, %v5221_v40, 0.0 }
 0xc50   : > { %v6838_v62 = vpop.eup %5224  ;;  %v2905_v54 = vpack.c.bf16 %v2892_v52, %v2891_v21  ;;  %v2894_v25 = vmul.f32 %v5223_v57, %v6774_v63  ;;  %v7449_v63 = vpack.i.bf16 %v6278_v44, %v6274_v48 }
 0xc51   : > { %v6841_v53 = vpop.eup %5226  ;;  %v2859_v20 = vsel %vm1010_vm2, %v6838_v62, 0.0 }
 0xc52   : > { %v6846_v5 = vpop.eup %5228  ;;  %2860 = vadd.xlane.f32.xlu1 %v2859_v20  ;;  %2851 = vadd.xlane.f32.xlu0 %v2850_v17  ;;  %v2868_v35 = vsel %vm1010_vm2, %v6841_v53, 0.0 }
 0xc53   : > { %4644 = vmatmul.mubr.msk.bf16.vlgmr.msra.gmra.mrb[48].mxu1 %vm1010_vm2, %v2904_v45  ;;  %v5231_v60 = vpop.eup %5230  ;;  %v2862_v2 = vsel %vm1010_vm2, %v6846_v5, 0.0 }
 0xc54   : > { %4647 = vmatprep.mubr.msk.bf16.mxu1 %vm1010_vm2, %v2905_v54  ;;  %v2893_v42 = vmul.f32 %v5231_v60, %v6768_v10  ;;  %v7448_v10 = vpack.i.bf16 %v6282_v31, %v6276_v41 }
 0xc56   : > { %2869 = vadd.xlane.f32.xlu1 %v2868_v35  ;;  %2863 = vadd.xlane.f32.xlu0 %v2862_v2  ;;  %v2906_v15 = vpack.c.bf16 %v2894_v25, %v2893_v42  ;;  %v7453_v25 = vpack.i.bf16 %v6306_v11, %v6300_v23  ;;  %v7456_v23 = vpack.i.bf16 %v6370_v59, %v6364_v61  ;;  %v7465_v59 = vld [vmem:[#allocation37_spill] sm:$0xff] }
 0xc57   : > { %v7458_v11 = vpack.i.bf16 %v6704_v29, %v6700_v16 }
 0xc5b   : > { %4648 = vmatmul.mubr.msk.bf16.gmra.mrb[52].mxu1 %vm1010_vm2, %v2906_v15 }
 0xc67   : > { %3002 = vrot.lane.b32.xlu1 %v5648_v7, %s5354_s13  ;;  %v7450_v7 = vpack.i.bf16 %v6623_v26, %v6617_v3 }
 0xc6b   : > { %3004 = vrot.lane.b32.xlu1 %v5660_v37, %s5354_s13 }
 0xc6c   : > { %3000 = vrot.lane.b32.xlu0 %v5650_v8, %s5354_s13  ;;  %v7451_v8 = vpack.i.bf16 %v6619_v49, %v6615_v12 }
 0xc6f   : > { %3006 = vrot.lane.b32.xlu1 %v5658_v36, %s5354_s13  ;;  %v4980_v36 = vld [vmem:[%s7350_s4] sm:$0xff]  }
 0xc70   : > { %4859 = vrot.lane.b32.xlu0 %v7448_v10, %s5355_s26  ;;  %4667 = vmatprep.subr.bf16.mxu1 %v4980_v36 }
 0xc71   : > { %4668 = vmatpush3.bf16.msra.mxu1 %v4980_v36  ;;  %v7466_v36 = vld [vmem:[#allocation35_spill] sm:$0xff] }
 0xc73   : > { %4864 = vrot.lane.b32.xlu1 %v7449_v63, %s5355_s26 }
 0xc74   : > { %4869 = vrot.lane.b32.xlu0 %v7450_v7, %s5356_s25  ;;  %v7454_v7 = vpack.i.bf16 %v6647_v9, %v6643_v28  ;;  %v7459_v28 = vld [vmem:[#allocation39_spill] sm:$0xff] }
 0xc77   : > { %4874 = vrot.lane.b32.xlu1 %v7451_v8, %s5356_s25  ;;  %v7463_v8 = vld [vmem:[#allocation34_spill] sm:$0xff] }
 0xcd3   : > { %v2855_v37 = vpop.xlane.xlu0 %2854 }
 0xcd7   : > { %v2849_v48 = vpop.xlane.xlu0 %2848 }
 0xcd8   : > { %5232 = vrcp.f32 %v2849_v48 }
 0xcdb   : > { %v2867_v41 = vpop.xlane.xlu1 %2866  ;;  %v2858_v44 = vpop.xlane.xlu0 %2857 }
 0xcdf   : > { %v2861_v31 = vpop.xlane.xlu1 %2860  ;;  %v2852_v39 = vpop.xlane.xlu0 %2851 }
 0xce0   : > { %5234 = vrcp.f32 %v2852_v39 }
 0xce1   : > { %5236 = vrcp.f32 %v2858_v44 }
 0xce2   : > { %v5233_v38 = vpop.eup %5232 }
 0xce3   : > { %v2870_v3 = vpop.xlane.xlu1 %2869  ;;  %v2864_v26 = vpop.xlane.xlu0 %2863  ;;  %v2895_v14 = vmul.f32 %v5233_v38, %v6825_v34 }
 0xce4   : > { %5238 = vrcp.f32 %v2864_v26 }
 0xce5   : > { %5240 = vrcp.f32 %v2855_v37 }
 0xce6   : > { %5242 = vrcp.f32 %v2861_v31 }
 0xce7   : > { %v3003_v12 = vpop.permute.xlu1 %3002  ;;  %v3001_v49 = vpop.permute.xlu0 %3000  ;;  %5244 = vrcp.f32 %v2870_v3 }
 0xce8   : > { %4651 = vmatprep.subr.bf16.mxu0 %v3001_v49  ;;  %5246 = vrcp.f32 %v2867_v41 }
 0xce9   : > { %4652 = vmatpush3.bf16.msra.mxu0 %v3001_v49  ;;  %v7468_v49 = vld [vmem:[#allocation21_spill] sm:$0xff] }
 0xcea   : > { %4653 = vmatprep.subr.bf16.mxu0 %v3003_v12  ;;  %v5235_v45 = vpop.eup %5234 }
 0xceb   : > { %v3005_v56 = vpop.permute.xlu1 %3004  ;;  %v2896_v0 = vmul.f32 %v5235_v45, %v5221_v40  ;;  %v5237_v4 = vpop.eup %5236  ;;  %v7469_v45 = vld [vmem:[#allocation19_spill] sm:$0xff] }
 0xcec   : > { %v2898_v30 = vmul.f32 %v5237_v4, %v6829_v18  ;;  %v4860_v37 = vpop.permute.xlu0 %4859  ;;  %v7471_v4 = vld [vmem:[#allocation18_spill] sm:$0xff] }
 0xced   : > { %4654 = vmatpush3.bf16.msra.mxu0 %v3003_v12  ;;  %v2907_v47 = vpack.c.bf16 %v2896_v0, %v2895_v14  ;;  %v4862_v16 = vunpack.i.h.bf16 %v4860_v37  ;;  %v4861_v29 = vunpack.i.l.bf16 %v4860_v37  ;;  %v7470_v0 = vld [vmem:[#allocation20_spill] sm:$0xff] }
 0xcee   : > { %4655 = vmatprep.subr.bf16.mxu0 %v3005_v56  ;;  %v5239_v46 = vpop.eup %5238 }
 0xcef   : > { %4659 = vmatprep.mubr.msk.bf16.mxu0 %vm1010_vm2, %v2907_v47  ;;  %v5241_v32 = vpop.eup %5240  ;;  %v3007_v43 = vpop.permute.xlu1 %3006  ;;  %v2900_v22 = vmul.f32 %v5239_v46, %v6846_v5  ;;  %v3282_v38 = vsel %vm819_vm1, %v7468_v49, %v4862_v16 }
 0xcf0   : > { %v5243_v33 = vpop.eup %5242  ;;  %v2897_v34 = vmul.f32 %v5241_v32, %v6820_v13  ;;  %v4981_v13 = vld [vmem:[%s7350_s4 + $0x8] sm:$0xff]   ;;  %v4870_v41 = vpop.permute.xlu0 %4869 }
 0xcf1   : > { %4656 = vmatpush3.bf16.msra.mxu0 %v3005_v56  ;;  %v2899_v58 = vmul.f32 %v5243_v33, %v6838_v62  ;;  %v5245_v40 = vpop.eup %5244  ;;  %4669 = vmatprep.subr.bf16.mxu1 %v4981_v13  ;;  %v4872_v26 = vunpack.i.h.bf16 %v4870_v41  ;;  %v4871_v12 = vunpack.i.l.bf16 %v4870_v41  ;;  %v3281_v56 = vsel %vm819_vm1, %v7469_v45, %v4861_v29 }
 0xcf2   : > { %4657 = vmatprep.subr.bf16.mxu0 %v3007_v43  ;;  %v2908_v19 = vpack.c.bf16 %v2898_v30, %v2897_v34  ;;  %v5247_v57 = vpop.eup %5246  ;;  %v2902_v21 = vmul.f32 %v5245_v40, %v6841_v53  ;;  %4670 = vmatpush3.bf16.msra.mxu1 %v4981_v13  ;;  %v7452_v53 = vpack.i.bf16 %v6302_v55, %v6298_v51 }
 0xcf3   : > { %v2909_v52 = vpack.c.bf16 %v2900_v22, %v2899_v58  ;;  %v2901_v18 = vmul.f32 %v5247_v57, %v6831_v50  ;;  %v7455_v51 = vpack.i.bf16 %v6651_v6, %v6645_v24  ;;  %v7457_v55 = vpack.i.bf16 %v6374_v27, %v6366_v1  ;;  %v7460_v24 = vld [vmem:[#allocation38_spill] sm:$0xff]  ;;  %v7462_v6 = vld [vmem:[#allocation36_spill] sm:$0xff]  ;;  %v4865_v27 = vpop.permute.xlu1 %4864 }
 0xcf4   : > { %v7461_v9 = vpack.i.bf16 %v7459_v28, %v7460_v24  ;;  %v7464_v61 = vpack.i.bf16 %v7462_v6, %v7463_v8  ;;  %v7467_v1 = vpack.i.bf16 %v7465_v59, %v7466_v36  ;;  %v4867_v44 = vunpack.i.h.bf16 %v4865_v27  ;;  %v7475_v28 = vld [vmem:[#allocation23_spill] sm:$0xff] }
 0xcf5   : > { %4658 = vmatpush3.bf16.msra.mxu0 %v3007_v43  ;;  %v2910_v20 = vpack.c.bf16 %v2902_v21, %v2901_v18  ;;  %v4866_v31 = vunpack.i.l.bf16 %v4865_v27  ;;  %v3299_v40 = vsel %vm3297_vm3, %v3282_v38, %v4872_v26 }
 0xcf6   : > { %v3284_v47 = vsel %vm819_vm1, %v7470_v0, %v4867_v44 }
 0xcf7   : > { %v4875_v48 = vpop.permute.xlu1 %4874  ;;  %v3283_v46 = vsel %vm819_vm1, %v7471_v4, %v4866_v31  ;;  %v7479_v4 = vld [vmem:[#allocation43_spill] sm:$0xff] }
 0xcf8   : > { %4660 = vmatmul.mubr.msk.bf16.vlgmr.msra.gmra.mrb[80].mxu0 %vm1010_vm2, %v2908_v19  ;;  %v4877_v39 = vunpack.i.h.bf16 %v4875_v48  ;;  %v4876_v3 = vunpack.i.l.bf16 %v4875_v48  ;;  %v3298_v19 = vsel %vm3297_vm3, %v3281_v56, %v4871_v12  ;;  %v7476_v56 = vld [vmem:[#allocation42_spill] sm:$0xff] }
 0xcf9   : > { %4663 = vmatprep.mubr.msk.bf16.mxu0 %vm1010_vm2, %v2909_v52 }
 0xcfa   : > { %v3300_v30 = vsel %vm3297_vm3, %v3283_v46, %v4876_v3  ;;  %v3301_v22 = vsel %vm3297_vm3, %v3284_v47, %v4877_v39  ;;  %v7480_v46 = vld [vmem:[#allocation41_spill] sm:$0xff] }
 0xd00   : > { %4664 = vmatmul.mubr.msk.bf16.gmra.mrb[84].mxu0 %vm1010_vm2, %v2910_v20 }
 0xd26   : > { %v4645_v62 = vpop.f32.mrb[48].mxu1 }
 0xd27   : > { %v2969_v17 = vpop.f32.mrb[49].mxu1 }
 0xd28   : > { %v4646_v5 = vpop.f32.mrb[50].mxu1 }
 0xd29   : > { %v4883_v54 = vpack.i.bf16 %v4646_v5, %v4645_v62  ;;  %v2972_v60 = vpop.f32.mrb[51].mxu1 }
 0xd2a   : > { %v4878_v35 = vpack.i.bf16 %v2972_v60, %v2969_v17 }
 0xd2b   : > { %4884 = vrot.lane.b32.xlu1 %v4883_v54, %s5357_s17 }
 0xd2c   : > { %4879 = vrot.lane.b32.xlu0 %v4878_v35, %s5357_s17 }
 0xd2e   : > { %v4649_v50 = vpop.f32.mrb[52].mxu1 }
 0xd2f   : > { %4894 = vrot.lane.b32.xlu1 %v7452_v53, %s5355_s26  ;;  %v2985_v2 = vpop.f32.mrb[53].mxu1 }
 0xd30   : > { %4889 = vrot.lane.b32.xlu0 %v7453_v25, %s5355_s26  ;;  %v4650_v42 = vpop.f32.mrb[54].mxu1 }
 0xd31   : > { %v4913_v15 = vpack.i.bf16 %v4650_v42, %v4649_v50  ;;  %v2988_v10 = vpop.f32.mrb[55].mxu1 }
 0xd32   : > { %v4908_v63 = vpack.i.bf16 %v2988_v10, %v2985_v2  ;;  %v7472_v10 = vld [vmem:[#allocation24_spill] sm:$0xff] }
 0xd33   : > { %4904 = vrot.lane.b32.xlu1 %v7454_v7, %s5356_s25  ;;  %v7473_v7 = vld [vmem:[#allocation22_spill] sm:$0xff] }
 0xd34   : > { %4899 = vrot.lane.b32.xlu0 %v7455_v51, %s5356_s25 }
 0xd37   : > { %4914 = vrot.lane.b32.xlu1 %v4913_v15, %s5357_s17 }
 0xd38   : > { %4909 = vrot.lane.b32.xlu0 %v4908_v63, %s5357_s17 }
 0xd3b   : > { %4924 = vrot.lane.b32.xlu1 %v7456_v23, %s5355_s26 }
 0xd3c   : > { %4919 = vrot.lane.b32.xlu0 %v7457_v55, %s5355_s26  ;;  %v7474_v55 = vld [vmem:[#allocation25_spill] sm:$0xff] }
 0xd3f   : > { %4934 = vrot.lane.b32.xlu1 %v7458_v11, %s5356_s25 }
 0xd40   : > { %4929 = vrot.lane.b32.xlu0 %v7461_v9, %s5356_s25 }
 0xd43   : > { %4944 = vrot.lane.b32.xlu1 %v7464_v61, %s5355_s26 }
 0xd44   : > { %4939 = vrot.lane.b32.xlu0 %v7467_v1, %s5355_s26 }
 0xd9d   : > { %v4885_v14 = vpop.permute.xlu1 %4884 }
 0xd9e   : > { %v4887_v32 = vunpack.i.h.bf16 %v4885_v14  ;;  %v4886_v43 = vunpack.i.l.bf16 %v4885_v14  ;;  %v4880_v33 = vpop.permute.xlu0 %4879  ;;  %v7477_v14 = vld [vmem:[#allocation40_spill] sm:$0xff] }
 0xd9f   : > { %v4882_v34 = vunpack.i.h.bf16 %v4880_v33  ;;  %v4881_v58 = vunpack.i.l.bf16 %v4880_v33  ;;  %v7478_v0 = vpack.i.bf16 %v7476_v56, %v7477_v14 }
 0xda0   : > { %v3318_v52 = vsel %vm3314_vm4, %v3301_v22, %v4887_v32  ;;  %v3317_v57 = vsel %vm3314_vm4, %v3300_v30, %v4886_v43  ;;  %v7481_v32 = vpack.i.bf16 %v7479_v4, %v7480_v46  ;;  %v7489_v4 = vld [vmem:[#allocation31_spill] sm:$0xff] }
 0xda1   : > { %v3332_v21 = vpack.c.bf16 %v3318_v52, %v3317_v57  ;;  %v3315_v18 = vsel %vm3314_vm4, %v3298_v19, %v4881_v58  ;;  %v3316_v20 = vsel %vm3314_vm4, %v3299_v40, %v4882_v34  ;;  %v4895_v13 = vpop.permute.xlu1 %4894  ;;  %v4982_v34 = vld [vmem:[%s7352_s6] sm:$0xff]   ;;  %v4983_v58 = vld [vmem:[%s7352_s6 + $0x8] sm:$0xff]  }
 0xda2   : > { %v3331_v62 = vpack.c.bf16 %v3316_v20, %v3315_v18  ;;  %v4890_v17 = vpop.permute.xlu0 %4889  ;;  %v4897_v5 = vunpack.i.h.bf16 %v4895_v13  ;;  %v4896_v54 = vunpack.i.l.bf16 %v4895_v13  ;;  %4687 = vmatprep.subr.bf16.mxu0 %v4982_v34 }
 0xda3   : > { %v4892_v35 = vunpack.i.h.bf16 %v4890_v17  ;;  %v4891_v50 = vunpack.i.l.bf16 %v4890_v17  ;;  %4688 = vmatpush3.bf16.msra.mxu0 %v4982_v34 }
 0xda4   : > { %4671 = vmatprep.mubr.msk.bf16.mxu1 %vm645_vm0, %v3331_v62  ;;  %v3288_v63 = vsel %vm819_vm1, %v7472_v10, %v4897_v5  ;;  %v3287_v51 = vsel %vm819_vm1, %v7473_v7, %v4896_v54  ;;  %4689 = vmatprep.subr.bf16.mxu0 %v4983_v58 }
 0xda5   : > { %v4905_v60 = vpop.permute.xlu1 %4904  ;;  %4672 = vmatmul.mubr.msk.bf16.vlgmr.msra.gmra.mrb[56].mxu1 %vm645_vm0, %v3332_v21  ;;  %v3286_v11 = vsel %vm819_vm1, %v7474_v55, %v4892_v35  ;;  %v3285_v24 = vsel %vm819_vm1, %v7475_v28, %v4891_v50  ;;  %v7482_v50 = vld [vmem:[#allocation28_spill] sm:$0xff] }
 0xda6   : > { %v4900_v53 = vpop.permute.xlu0 %4899  ;;  %v4907_v2 = vunpack.i.h.bf16 %v4905_v60  ;;  %v4906_v25 = vunpack.i.l.bf16 %v4905_v60 }
 0xda7   : > { %v4902_v42 = vunpack.i.h.bf16 %v4900_v53  ;;  %v4901_v15 = vunpack.i.l.bf16 %v4900_v53  ;;  %4690 = vmatpush3.bf16.msra.mxu0 %v4983_v58 }
 0xda8   : > { %v3304_v61 = vsel %vm3297_vm3, %v3287_v51, %v4906_v25  ;;  %v3305_v59 = vsel %vm3297_vm3, %v3288_v63, %v4907_v2  ;;  %v7483_v2 = vld [vmem:[#allocation26_spill] sm:$0xff]  ;;  %v7485_v63 = vld [vmem:[#allocation27_spill] sm:$0xff] }
 0xda9   : > { %v4915_v23 = vpop.permute.xlu1 %4914  ;;  %v3302_v27 = vsel %vm3297_vm3, %v3285_v24, %v4901_v15  ;;  %v3303_v37 = vsel %vm3297_vm3, %v3286_v11, %v4902_v42  ;;  %v7484_v42 = vld [vmem:[#allocation29_spill] sm:$0xff] }
 0xdaa   : > { %v4917_v9 = vunpack.i.h.bf16 %v4915_v23  ;;  %v4916_v6 = vunpack.i.l.bf16 %v4915_v23  ;;  %v4910_v8 = vpop.permute.xlu0 %4909 }
 0xdab   : > { %v4912_v36 = vunpack.i.h.bf16 %v4910_v8  ;;  %v4911_v1 = vunpack.i.l.bf16 %v4910_v8 }
 0xdac   : > { %v3322_v48 = vsel %vm3314_vm4, %v3305_v59, %v4917_v9  ;;  %v3321_v16 = vsel %vm3314_vm4, %v3304_v61, %v4916_v6 }
 0xdad   : > { %v3334_v29 = vpack.c.bf16 %v3322_v48, %v3321_v16  ;;  %v3319_v41 = vsel %vm3314_vm4, %v3302_v27, %v4911_v1  ;;  %v3320_v44 = vsel %vm3314_vm4, %v3303_v37, %v4912_v36  ;;  %v4925_v19 = vpop.permute.xlu1 %4924 }
 0xdae   : > { %v3333_v31 = vpack.c.bf16 %v3320_v44, %v3319_v41  ;;  %v4920_v40 = vpop.permute.xlu0 %4919  ;;  %v4927_v21 = vunpack.i.h.bf16 %v4925_v19  ;;  %v4926_v18 = vunpack.i.l.bf16 %v4925_v19 }
 0xdaf   : > { %v4922_v20 = vunpack.i.h.bf16 %v4920_v40  ;;  %v4921_v62 = vunpack.i.l.bf16 %v4920_v40 }
 0xdb0   : > { %4675 = vmatprep.mubr.msk.bf16.mxu1 %vm645_vm0, %v3333_v31  ;;  %v3292_v53 = vsel %vm819_vm1, %v7482_v50, %v4927_v21  ;;  %v3291_v25 = vsel %vm819_vm1, %v7483_v2, %v4926_v18 }
 0xdb1   : > { %4676 = vmatmul.mubr.msk.bf16.gmra.mrb[60].mxu1 %vm645_vm0, %v3334_v29  ;;  %v4935_v52 = vpop.permute.xlu1 %4934  ;;  %v3290_v15 = vsel %vm819_vm1, %v7484_v42, %v4922_v20  ;;  %v3289_v7 = vsel %vm819_vm1, %v7485_v63, %v4921_v62  ;;  %v7038_v62 = vld [vmem:[%s7351_s5] ss:$0 sm:$0xff] }
 0xdb2   : > { %v4930_v57 = vpop.permute.xlu0 %4929  ;;  %v4936_v17 = vunpack.i.l.bf16 %v4935_v52  ;;  %v4937_v54 = vunpack.i.h.bf16 %v4935_v52  ;;  %v7490_v63 = vld [vmem:[#allocation10_spill] sm:$0xff] }
 0xdb3   : > { %v4931_v60 = vunpack.i.l.bf16 %v4930_v57  ;;  %v4932_v35 = vunpack.i.h.bf16 %v4930_v57 }
 0xdb4   : > { %v3308_v51 = vsel %vm3297_vm3, %v3291_v25, %v4936_v17  ;;  %v3309_v28 = vsel %vm3297_vm3, %v3292_v53, %v4937_v54  ;;  %v7041_v17 = vld [vmem:[%s5564_s11 + $0x2] ss:$0 sm:$0xff] }
 0xdb5   : > { %v4945_v13 = vpop.permute.xlu1 %4944  ;;  %v3306_v24 = vsel %vm3297_vm3, %v3289_v7, %v4931_v60  ;;  %v3307_v8 = vsel %vm3297_vm3, %v3290_v15, %v4932_v35  ;;  %v7491_v7 = vunpack.c.l.bf16 %v7490_v63 }
 0xdb6   : > { %v4940_v5 = vpop.permute.xlu0 %4939  ;;  %v4947_v61 = vunpack.i.h.bf16 %v4945_v13  ;;  %v4946_v1 = vunpack.i.l.bf16 %v4945_v13 }
 0xdb7   : > { %v4942_v29 = vunpack.i.h.bf16 %v4940_v5  ;;  %v4941_v41 = vunpack.i.l.bf16 %v4940_v5 }
 0xdb9   : > { %v3293_v46 = vsel %vm819_vm1, %v7489_v4, %v4941_v41 }
 0xdcb   : > { %v4661_v39 = vpop.f32.mrb[80].mxu0 }
 0xdcc   : > { %v3058_v3 = vpop.f32.mrb[81].mxu0 }
 0xdcd   : > { %v4662_v26 = vpop.f32.mrb[82].mxu0 }
 0xdce   : > { %v4948_v12 = vpack.i.bf16 %v4662_v26, %v4661_v39  ;;  %v3061_v49 = vpop.f32.mrb[83].mxu0 }
 0xdcf   : > { %v4953_v38 = vpack.i.bf16 %v3061_v49, %v3058_v3  ;;  %v7486_v49 = vld [vmem:[#allocation32_spill] sm:$0xff] }
 0xdd0   : > { %4949 = vrot.lane.b32.xlu1 %v4948_v12, %s5357_s17 }
 0xdd1   : > { %4954 = vrot.lane.b32.xlu0 %v4953_v38, %s5357_s17  ;;  %v3296_v38 = vsel %vm819_vm1, %v7486_v49, %v4947_v61 }
 0xdd3   : > { %v4665_v45 = vpop.f32.mrb[84].mxu0 }
 0xdd4   : > { %4964 = vrot.lane.b32.xlu1 %v7478_v0, %s5356_s25  ;;  %v3074_v47 = vpop.f32.mrb[85].mxu0  ;;  %v7488_v0 = vld [vmem:[#allocation33_spill] sm:$0xff] }
 0xdd5   : > { %4959 = vrot.lane.b32.xlu0 %v7481_v32, %s5356_s25  ;;  %v4666_v43 = vpop.f32.mrb[86].mxu0 }
 0xdd6   : > { %v4973_v33 = vpack.i.bf16 %v4666_v43, %v4665_v45  ;;  %v3077_v30 = vpop.f32.mrb[87].mxu0  ;;  %v7487_v45 = vld [vmem:[#allocation30_spill] sm:$0xff] }
 0xdd7   : > { %v4968_v22 = vpack.i.bf16 %v3077_v30, %v3074_v47  ;;  %v3295_v56 = vsel %vm819_vm1, %v7487_v45, %v4946_v1  ;;  %v3294_v47 = vsel %vm819_vm1, %v7488_v0, %v4942_v29  ;;  %v7496_v45 = vld [vmem:[#allocation12_spill] sm:$0xff] }
 0xdd8   : > { %4974 = vrot.lane.b32.xlu1 %v4973_v33, %s5357_s17 }
 0xdd9   : > { %4969 = vrot.lane.b32.xlu0 %v4968_v22, %s5357_s17  ;;  %s7223_s17 = scalar_lea.vmem [#allocation3], %s5533_s16  ;;  %s4174_s16 = sshll.u32 %s5330_s21, 5 }
 0xdda   : > { %s3947_s13 = sadd.s32 %s5326_s20, %s4174_s16  ;;  %s3950_s20 = sshll.u32 %s7223_s17, 4  ;;  %s7283_s20 = int_to_ptr.vmem [resolvable:$true] %s3950_s20 }
 0xddb   : > { %s4175_s21 = sshll.u32 %s3947_s13, 6  ;;  %s5252_s16 = sshll.u32 %s5358_s30, 4  ;;  %s5253_s16 = int_to_ptr.vmem [resolvable:$false] %s5252_s16 }
 0xddc   : > { %s7281_s25 = scalar_lea.hbm %s7514_s29, %s4175_s21  ;;  %s5254_s13 = scalar_lea.vmem %s5253_s16, 2048 }
 0xddd   : > { %p5255_p5 = scmp.lt.s32.totalorder %s7283_s20, %s5253_s16 }
 0xe42   : > { %v4950_v10 = vpop.permute.xlu1 %4949 }
 0xe43   : > { %v4952_v23 = vunpack.i.h.bf16 %v4950_v10  ;;  %v4951_v55 = vunpack.i.l.bf16 %v4950_v10  ;;  %v4955_v11 = vpop.permute.xlu0 %4954 }
 0xe44   : > { %v4957_v9 = vunpack.i.h.bf16 %v4955_v11  ;;  %v4956_v6 = vunpack.i.l.bf16 %v4955_v11  ;;  %v7492_v11 = vld [vmem:[#allocation11_spill] sm:$0xff] }
 0xe45   : > { %v3326_v59 = vsel %vm3314_vm4, %v3309_v28, %v4952_v23  ;;  %v3325_v36 = vsel %vm3314_vm4, %v3308_v51, %v4951_v55  ;;  %v7054_v55 = vld [vmem:[%s5564_s11 + $0x3] ss:$0 sm:$0xff]  ;;  %v7493_v28 = vunpack.c.l.bf16 %v7492_v11  ;;  %s5248_s11 = scalar_lea.vmem %s7283_s20, 1024 }
 0xe46   : > { %v3336_v27 = vpack.c.bf16 %v3326_v59, %v3325_v36  ;;  %v3323_v37 = vsel %vm3314_vm4, %v3306_v24, %v4956_v6  ;;  %v3324_v48 = vsel %vm3314_vm4, %v3307_v8, %v4957_v9  ;;  %v4965_v16 = vpop.permute.xlu1 %4964  ;;  %v7494_v9 = vunpack.c.h.bf16 %v7492_v11  ;;  %p5249_p2 = scmp.ne.s32.totalorder %s7283_s20, %s5248_s11  ;;  %p5256_p6 = scmp.lt.s32.totalorder %s5254_s13, %s5248_s11 }
 0xe47   : > { %v3335_v44 = vpack.c.bf16 %v3324_v48, %v3323_v37  ;;  %v4960_v31 = vpop.permute.xlu0 %4959  ;;  %v4967_v39 = vunpack.i.h.bf16 %v4965_v16  ;;  %v4966_v3 = vunpack.i.l.bf16 %v4965_v16  ;;  %v7495_v8 = vunpack.c.h.bf16 %v7490_v63 }
 0xe48   : > { %v4962_v26 = vunpack.i.h.bf16 %v4960_v31  ;;  %v4961_v12 = vunpack.i.l.bf16 %v4960_v31  ;;  %p5250_p3 = pnand %p5249_p2, %p5481_p8  ;;  %p5257_p7 = por %p5256_p6, %p5255_p5 }
 0xe49   : > { %4679 = vmatprep.mubr.msk.bf16.mxu1 %vm645_vm0, %v3335_v44  ;;  %v3313_v30 = vsel %vm3297_vm3, %v3296_v38, %v4967_v39  ;;  %v3312_v22 = vsel %vm3297_vm3, %v3295_v56, %v4966_v3  ;;  %v7497_v56 = vunpack.c.l.bf16 %v7496_v45 }
 0xe4a   : > { %v4975_v14 = vpop.permute.xlu1 %4974  ;;  %4680 = vmatmul.mubr.msk.bf16.gmra.mrb[64].mxu1 %vm645_vm0, %v3336_v27  ;;  %v3310_v19 = vsel %vm3297_vm3, %v3293_v46, %v4961_v12  ;;  %v3311_v40 = vsel %vm3297_vm3, %v3294_v47, %v4962_v26  ;;  %v7498_v47 = vld [vmem:[#allocation13_spill] sm:$0xff]  ;;  %p5251_p4 = pneg %p5250_p3 }
 0xe4b   : > { %v4977_v32 = vunpack.i.h.bf16 %v4975_v14  ;;  %v4976_v43 = vunpack.i.l.bf16 %v4975_v14  ;;  %v4970_v33 = vpop.permute.xlu0 %4969  ;;  %v7499_v4 = vunpack.c.l.bf16 %v7498_v47 }
 0xe4c   : > { %v4972_v34 = vunpack.i.h.bf16 %v4970_v33  ;;  %v4971_v58 = vunpack.i.l.bf16 %v4970_v33  ;;  %v7501_v33 = vunpack.c.h.bf16 %v7496_v45  ;;  %p5258_p10 = pnand %p5257_p7, %p5251_p4 }
 0xe4d   : > { %v3330_v52 = vsel %vm3314_vm4, %v3313_v30, %v4977_v32  ;;  %v3329_v57 = vsel %vm3314_vm4, %v3312_v22, %v4976_v43  ;;  %v7500_v32 = vunpack.c.h.bf16 %v7498_v47 }
 0xe4e   : > { %v3338_v21 = vpack.c.bf16 %v3330_v52, %v3329_v57  ;;  %v3327_v18 = vsel %vm3314_vm4, %v3310_v19, %v4971_v58  ;;  %v3328_v20 = vsel %vm3314_vm4, %v3311_v40, %v4972_v34  ;;  %v4984_v57 = vld [vmem:[%s7354_s8] sm:$0xff]  }
 0xe4f   : > { %v3337_v13 = vpack.c.bf16 %v3328_v20, %v3327_v18  ;;  %4707 = vmatprep.subr.bf16.mxu1 %v4984_v57  ;;  %v4986_v18 = vld [vmem:[%s7354_s8 + $0x10] sm:$0xff]   ;;  %v4987_v20 = vld [vmem:[%s7354_s8 + $0x18] sm:$0xff]  }
 0xe50   : > { %4708 = vmatpush3.bf16.msra.mxu1 %v4984_v57 }
 0xe51   : > { %4683 = vmatprep.mubr.msk.bf16.mxu1 %vm645_vm0, %v3337_v13  ;;  %v4988_v13 = vld [vmem:[%s7354_s8 + $0x20] sm:$0xff]  }
 0xe52   : > { %4684 = vmatmul.mubr.msk.bf16.gmra.mrb[68].mxu1 %vm645_vm0, %v3338_v21  ;;  %v4985_v21 = vld [vmem:[%s7354_s8 + $0x8] sm:$0xff]  }
 0xe53   : > { %4709 = vmatprep.subr.bf16.mxu1 %v4985_v21 }
 0xe54   : > { %4710 = vmatpush3.bf16.msra.mxu1 %v4985_v21 }
 0xe55   : > { %4711 = vmatprep.subr.bf16.mxu1 %v4986_v18 }
 0xe58   : > { %4712 = vmatpush3.bf16.msra.mxu1 %v4986_v18 }
 0xe59   : > { %4713 = vmatprep.subr.bf16.mxu1 %v4987_v20 }
 0xe5c   : > { %4714 = vmatpush3.bf16.msra.mxu1 %v4987_v20 }
 0xe5d   : > { %4715 = vmatprep.subr.bf16.mxu1 %v4988_v13 }
 0xe60   : > { %4716 = vmatpush3.bf16.msra.mxu1 %v4988_v13 }
 0xe78   : > { %v4673_v5 = vpop.f32.mrb[56].mxu1 }
 0xe79   : > { %v3429_v54 = vadd.f32 %v4673_v5, %v7038_v62  ;;  %v3420_v60 = vpop.f32.mrb[57].mxu1  ;;  %v4989_v5 = vld [vmem:[%s7354_s8 + $0x28] sm:$0xff]  }
 0xe7a   : > { %v3421_v35 = vadd.f32 %v7038_v62, %v3420_v60  ;;  %v4674_v50 = vpop.f32.mrb[58].mxu1  ;;  %4717 = vmatprep.subr.bf16.mxu1 %v4989_v5  ;;  %v4991_v60 = vld [vmem:[%s7354_s8 + $0x38] sm:$0xff]  }
 0xe7b   : > { %v3489_v53 = vmul.f32 %v7041_v17, %v3429_v54  ;;  %v3432_v2 = vadd.f32 %v4674_v50, %v7038_v62  ;;  %v3423_v25 = vpop.f32.mrb[59].mxu1  ;;  %4718 = vmatpush3.bf16.msra.mxu1 %v4989_v5  ;;  %v4990_v54 = vld [vmem:[%s7354_s8 + $0x30] sm:$0xff]  }
 0xe7c   : > { %v3487_v42 = vmul.f32 %v7041_v17, %v3421_v35  ;;  %v3424_v15 = vadd.f32 %v7038_v62, %v3423_v25  ;;  %4719 = vmatprep.subr.bf16.mxu1 %v4990_v54 }
 0xe7d   : > { %v3490_v10 = vmul.f32 %v7041_v17, %v3432_v2  ;;  %v3505_v24 = vadd.f32 %v7493_v28, %v3489_v53 }
 0xe7e   : > { %v3503_v51 = vadd.f32 %v7491_v7, %v3487_v42  ;;  %v3488_v23 = vmul.f32 %v7041_v17, %v3424_v15 }
 0xe7f   : > { %v3506_v6 = vadd.f32 %v7494_v9, %v3490_v10  ;;  %v7072_v27 = vadd.f32 %v7054_v55, %v3505_v24  ;;  %4720 = vmatpush3.bf16.msra.mxu1 %v4990_v54  ;;  %v7504_v9 = vld [vmem:[#allocation15_spill] sm:$0xff] }
 0xe80   : > { %v3504_v61 = vadd.f32 %v7495_v8, %v3488_v23  ;;  %v7066_v36 = vadd.f32 %v7054_v55, %v3503_v51  ;;  %4721 = vmatprep.subr.bf16.mxu1 %v4991_v60  ;;  %v7502_v23 = vld [vmem:[#allocation14_spill] sm:$0xff] }
 0xe81   : > { %v7063_v59 = vadd.f32 %v7054_v55, %v3506_v6  ;;  %v7503_v11 = vunpack.c.l.bf16 %v7502_v23  ;;  %v7505_v6 = vunpack.c.l.bf16 %v7504_v9 }
 0xe82   : > { %v7069_v1 = vadd.f32 %v7054_v55, %v3504_v61  ;;  %v7506_v61 = vunpack.c.h.bf16 %v7504_v9 }
 0xe83   : > { %v3540_v16 = vpack.c.bf16 %v7063_v59, %v7072_v27  ;;  %4722 = vmatpush3.bf16.msra.mxu1 %v4991_v60 }
 0xe84   : > { %v4677_v37 = vpop.f32.mrb[60].mxu1  ;;  %v3539_v48 = vpack.c.bf16 %v7069_v1, %v7066_v36 }
 0xe85   : > { %v3445_v29 = vadd.f32 %v4677_v37, %v7038_v62  ;;  %v3436_v41 = vpop.f32.mrb[61].mxu1 }
 0xe86   : > { %v3437_v44 = vadd.f32 %v7038_v62, %v3436_v41  ;;  %v4678_v31 = vpop.f32.mrb[62].mxu1  ;;  %4691 = vmatprep.mubr.msk.bf16.mxu0 %vm645_vm0, %v3539_v48  ;;  %v7507_v48 = vunpack.c.h.bf16 %v7502_v23 }
 0xe87   : > { %v3493_v39 = vmul.f32 %v7041_v17, %v3445_v29  ;;  %v3448_v3 = vadd.f32 %v4678_v31, %v7038_v62  ;;  %v3439_v26 = vpop.f32.mrb[63].mxu1  ;;  %4692 = vmatmul.mubr.msk.bf16.vlgmr.msra.gmra.mrb[88].mxu0 %vm645_vm0, %v3540_v16 }
 0xe88   : > { %v3491_v12 = vmul.f32 %v7041_v17, %v3437_v44  ;;  %v3440_v49 = vadd.f32 %v7038_v62, %v3439_v26 }
 0xe89   : > { %v3494_v38 = vmul.f32 %v7041_v17, %v3448_v3  ;;  %v3509_v46 = vadd.f32 %v7499_v4, %v3493_v39 }
 0xe8a   : > { %v3507_v14 = vadd.f32 %v7497_v56, %v3491_v12  ;;  %v3492_v0 = vmul.f32 %v7041_v17, %v3440_v49 }
 0xe8b   : > { %v3510_v43 = vadd.f32 %v7500_v32, %v3494_v38  ;;  %v7106_v19 = vadd.f32 %v7054_v55, %v3509_v46  ;;  %v7508_v32 = vld [vmem:[#allocation16_spill] sm:$0xff] }
 0xe8c   : > { %v3508_v30 = vadd.f32 %v7501_v33, %v3492_v0  ;;  %v7100_v34 = vadd.f32 %v7054_v55, %v3507_v14  ;;  %v7513_v18 = vunpack.c.h.bf16 %v7508_v32 }
 0xe8d   : > { %v7097_v22 = vadd.f32 %v7054_v55, %v3510_v43  ;;  %v7509_v43 = vunpack.c.l.bf16 %v7508_v32 }
 0xe8e   : > { %v7103_v58 = vadd.f32 %v7054_v55, %v3508_v30 }
 0xe8f   : > { %v3542_v52 = vpack.c.bf16 %v7097_v22, %v7106_v19 }
 0xe90   : > { %v3541_v40 = vpack.c.bf16 %v7103_v58, %v7100_v34 }
 0xe92   : > { %4695 = vmatprep.mubr.msk.bf16.mxu0 %vm645_vm0, %v3541_v40  ;;  %v7510_v40 = vld [vmem:[#allocation17_spill] sm:$0xff] }
 0xe93   : > { %4696 = vmatmul.mubr.msk.bf16.gmra.mrb[92].mxu0 %vm645_vm0, %v3542_v52  ;;  %v7511_v52 = vunpack.c.l.bf16 %v7510_v40 }
 0xf1d   : > { %v4681_v35 = vpop.f32.mrb[64].mxu1 }
 0xf1e   : > { %v3461_v50 = vadd.f32 %v4681_v35, %v7038_v62  ;;  %v3452_v53 = vpop.f32.mrb[65].mxu1 }
 0xf1f   : > { %v3453_v2 = vadd.f32 %v7038_v62, %v3452_v53  ;;  %v4682_v25 = vpop.f32.mrb[66].mxu1 }
 0xf20   : > { %v3497_v42 = vmul.f32 %v7041_v17, %v3461_v50  ;;  %v3464_v15 = vadd.f32 %v4682_v25, %v7038_v62  ;;  %v3455_v10 = vpop.f32.mrb[67].mxu1  ;;  %v4153_v50 = vld [vmem:[%s7353_s7] ss:$0 sm:$0xff] }
 0xf21   : > { %v3495_v63 = vmul.f32 %v7041_v17, %v3453_v2  ;;  %v3456_v7 = vadd.f32 %v7038_v62, %v3455_v10 }
 0xf22   : > { %v3498_v51 = vmul.f32 %v7041_v17, %v3464_v15  ;;  %v3513_v8 = vadd.f32 %v7505_v6, %v3497_v42 }
 0xf23   : > { %v3511_v28 = vadd.f32 %v7503_v11, %v3495_v63  ;;  %v3496_v24 = vmul.f32 %v7041_v17, %v3456_v7 }
 0xf24   : > { %v3514_v37 = vadd.f32 %v7506_v61, %v3498_v51  ;;  %v7166_v49 = vadd.f32 %v7054_v55, %v3513_v8 }
 0xf25   : > { %v3512_v16 = vadd.f32 %v7507_v48, %v3496_v24  ;;  %v4685_v29 = vpop.f32.mrb[68].mxu1  ;;  %v7159_v39 = vadd.f32 %v7054_v55, %v3511_v28 }
 0xf26   : > { %v7155_v41 = vadd.f32 %v7054_v55, %v3514_v37  ;;  %v3477_v44 = vadd.f32 %v4685_v29, %v7038_v62  ;;  %v3468_v31 = vpop.f32.mrb[69].mxu1 }
 0xf27   : > { %v7162_v3 = vadd.f32 %v7054_v55, %v3512_v16  ;;  %v3469_v26 = vadd.f32 %v7038_v62, %v3468_v31  ;;  %v4686_v12 = vpop.f32.mrb[70].mxu1 }
 0xf28   : > { %v3501_v38 = vmul.f32 %v7041_v17, %v3477_v44  ;;  %v3480_v45 = vadd.f32 %v4686_v12, %v7038_v62  ;;  %v3471_v56 = vpop.f32.mrb[71].mxu1  ;;  %v3544_v46 = vpack.c.bf16 %v7155_v41, %v7166_v49 }
 0xf29   : > { %v3499_v14 = vmul.f32 %v7041_v17, %v3469_v26  ;;  %v3472_v0 = vadd.f32 %v7038_v62, %v3471_v56  ;;  %v3543_v47 = vpack.c.bf16 %v7162_v3, %v7159_v39  ;;  %v7512_v62 = vunpack.c.h.bf16 %v7510_v40 }
 0xf2a   : > { %v3502_v4 = vmul.f32 %v7041_v17, %v3480_v45  ;;  %v3517_v57 = vadd.f32 %v7511_v52, %v3501_v38 }
 0xf2b   : > { %v3515_v33 = vadd.f32 %v7509_v43, %v3499_v14  ;;  %v3500_v30 = vmul.f32 %v7041_v17, %v3472_v0  ;;  %4699 = vmatprep.mubr.msk.bf16.mxu0 %vm645_vm0, %v3543_v47 }
 0xf2c   : > { %v3518_v21 = vadd.f32 %v7512_v62, %v3502_v4  ;;  %4700 = vmatmul.mubr.msk.bf16.gmra.mrb[96].mxu0 %vm645_vm0, %v3544_v46  ;;  %v7198_v54 = vadd.f32 %v7054_v55, %v3517_v57 }
 0xf2d   : > { %v3516_v20 = vadd.f32 %v7513_v18, %v3500_v30  ;;  %v7192_v5 = vadd.f32 %v7054_v55, %v3515_v33 }
 0xf2e   : > { %v7189_v13 = vadd.f32 %v7054_v55, %v3518_v21 }
 0xf2f   : > { %v7195_v17 = vadd.f32 %v7054_v55, %v3516_v20 }
 0xf30   : > { %v3546_v35 = vpack.c.bf16 %v7189_v13, %v7198_v54 }
 0xf31   : > { %v3545_v60 = vpack.c.bf16 %v7195_v17, %v7192_v5 }
 0xf33   : > { %4703 = vmatprep.mubr.msk.bf16.mxu0 %vm645_vm0, %v3545_v60 }
 0xf34   : > { %4704 = vmatmul.mubr.msk.bf16.gmra.mrb[100].mxu0 %vm645_vm0, %v3546_v35 }
 0xf5a   : > { %v4693_v53 = vpop.f32.mrb[88].mxu0 }
 0xf5b   : > { %v3637_v2 = vadd.f32 %v4693_v53, %v4153_v50  ;;  %v3628_v25 = vpop.f32.mrb[89].mxu0 }
 0xf5c   : > { %v3629_v42 = vadd.f32 %v4153_v50, %v3628_v25  ;;  %v4694_v55 = vpop.f32.mrb[90].mxu0 }
 0xf5d   : > { %v3640_v15 = vadd.f32 %v4694_v55, %v4153_v50  ;;  %v3631_v10 = vpop.f32.mrb[91].mxu0  ;;  %v3693_v7 = vmax.f32 %v3637_v2, 0.0 }
 0xf5e   : > { %v3632_v63 = vadd.f32 %v4153_v50, %v3631_v10  ;;  %v3691_v23 = vmax.f32 %v3629_v42, 0.0 }
 0xf5f   : > { %v3694_v51 = vmax.f32 %v3640_v15, 0.0 }
 0xf60   : > { %v3692_v11 = vmax.f32 %v3632_v63, 0.0 }
 0xf61   : > { %v3708_v28 = vpack.c.bf16 %v3694_v51, %v3693_v7  ;;  %v7212_v51 = vld [vmem:[%s7355_s9] ss:$0 sm:$0xff] }
 0xf62   : > { %v3707_v24 = vpack.c.bf16 %v3692_v11, %v3691_v23 }
 0xf64   : > { %4723 = vmatprep.mubr.bf16.mxu1 %v3707_v24 }
 0xf65   : > { %4724 = vmatmul.mubr.bf16.vlgmr.msra.gmra.mrb[72].mxu1 %v3708_v28 }
 0xf66   : > { %v4697_v9 = vpop.f32.mrb[92].mxu0 }
 0xf67   : > { %v3653_v6 = vadd.f32 %v4697_v9, %v4153_v50  ;;  %v3644_v8 = vpop.f32.mrb[93].mxu0 }
 0xf68   : > { %v3645_v61 = vadd.f32 %v4153_v50, %v3644_v8  ;;  %v4698_v37 = vpop.f32.mrb[94].mxu0 }
 0xf69   : > { %v3656_v48 = vadd.f32 %v4698_v37, %v4153_v50  ;;  %v3647_v16 = vpop.f32.mrb[95].mxu0  ;;  %v3697_v44 = vmax.f32 %v3653_v6, 0.0 }
 0xf6a   : > { %v3648_v29 = vadd.f32 %v4153_v50, %v3647_v16  ;;  %v3695_v26 = vmax.f32 %v3645_v61, 0.0 }
 0xf6b   : > { %v3698_v31 = vmax.f32 %v3656_v48, 0.0 }
 0xf6c   : > { %v3696_v12 = vmax.f32 %v3648_v29, 0.0 }
 0xf6d   : > { %v3710_v38 = vpack.c.bf16 %v3698_v31, %v3697_v44 }
 0xf6e   : > { %v3709_v45 = vpack.c.bf16 %v3696_v12, %v3695_v26 }
 0xf70   : > { %4727 = vmatprep.mubr.bf16.mxu1 %v3709_v45 }
 0xf71   : > { %4728 = vmatmul.mubr.bf16.gmra.mrb[76].mxu1 %v3710_v38 }
 0xfff   : > { %v4701_v56 = vpop.f32.mrb[96].mxu0 }
0x1000   : > { %v3669_v14 = vadd.f32 %v4701_v56, %v4153_v50  ;;  %v3660_v0 = vpop.f32.mrb[97].mxu0 }
0x1001   : > { %v3661_v47 = vadd.f32 %v4153_v50, %v3660_v0  ;;  %v4702_v4 = vpop.f32.mrb[98].mxu0 }
0x1002   : > { %v3672_v46 = vadd.f32 %v4702_v4, %v4153_v50  ;;  %v3663_v32 = vpop.f32.mrb[99].mxu0  ;;  %v3701_v33 = vmax.f32 %v3669_v14, 0.0 }
0x1003   : > { %v3664_v43 = vadd.f32 %v4153_v50, %v3663_v32  ;;  %v3699_v40 = vmax.f32 %v3661_v47, 0.0 }
0x1004   : > { %v3702_v30 = vmax.f32 %v3672_v46, 0.0 }
0x1005   : > { %v3700_v52 = vmax.f32 %v3664_v43, 0.0 }
0x1006   : > { %v3712_v57 = vpack.c.bf16 %v3702_v30, %v3701_v33 }
0x1007   : > { %v3711_v62 = vpack.c.bf16 %v3700_v52, %v3699_v40  ;;  %v4705_v21 = vpop.f32.mrb[100].mxu0 }
0x1008   : > { %v3685_v18 = vadd.f32 %v4705_v21, %v4153_v50  ;;  %v3676_v20 = vpop.f32.mrb[101].mxu0 }
0x1009   : > { %v3677_v60 = vadd.f32 %v4153_v50, %v3676_v20  ;;  %v4706_v35 = vpop.f32.mrb[102].mxu0  ;;  %4731 = vmatprep.mubr.bf16.mxu1 %v3711_v62 }
0x100a   : > { %v3688_v53 = vadd.f32 %v4706_v35, %v4153_v50  ;;  %v3679_v2 = vpop.f32.mrb[103].mxu0  ;;  %4732 = vmatmul.mubr.bf16.gmra.mrb[80].mxu1 %v3712_v57  ;;  %v3705_v42 = vmax.f32 %v3685_v18, 0.0 }
0x100b   : > { %v3680_v25 = vadd.f32 %v4153_v50, %v3679_v2  ;;  %v3703_v15 = vmax.f32 %v3677_v60, 0.0 }
0x100c   : > { %v3706_v55 = vmax.f32 %v3688_v53, 0.0 }
0x100d   : > { %v3704_v10 = vmax.f32 %v3680_v25, 0.0 }
0x100e   : > { %v3714_v63 = vpack.c.bf16 %v3706_v55, %v3705_v42 }
0x100f   : > { %v3713_v7 = vpack.c.bf16 %v3704_v10, %v3703_v15 }
0x1011   : > { %4735 = vmatprep.mubr.bf16.mxu1 %v3713_v7 }
0x1012   : > { %4736 = vmatmul.mubr.bf16.gmra.mrb[84].mxu1 %v3714_v63 }
0x1038   : > { %v4725_v23 = vpop.f32.mrb[72].mxu1 }
0x1039   : > { %v3829_v11 = vadd.f32 %v4725_v23, %v7212_v51  ;;  %v3820_v28 = vpop.f32.mrb[73].mxu1 }
0x103a   : > { %v3821_v50 = vadd.f32 %v7212_v51, %v3820_v28  ;;  %v4726_v24 = vpop.f32.mrb[74].mxu1 }
0x103b   : > { %v3885_v9 = vadd.f32 %v3829_v11, %v7072_v27  ;;  %v3832_v6 = vadd.f32 %v4726_v24, %v7212_v51  ;;  %v3823_v8 = vpop.f32.mrb[75].mxu1 }
0x103c   : > { %v3883_v61 = vadd.f32 %v3821_v50, %v7066_v36  ;;  %v3824_v37 = vadd.f32 %v7212_v51, %v3823_v8 }
0x103d   : > { %v3901_v48 = vpack.c.bf16 %v3885_v9, %v3885_v9  ;;  %v3886_v16 = vadd.f32 %v3832_v6, %v7063_v59 }
0x103e   : > { %v3899_v29 = vpack.c.bf16 %v3883_v61, %v3883_v61  ;;  %v3884_v44 = vadd.f32 %v3824_v37, %v7069_v1 }
0x103f   : > { %3918 = vst.msk [vmem:[%s7223_s17 + $0x8] sm:$0xf] %vm3915_vm5, %v3901_v48  ;;  %v3902_v27 = vpack.c.bf16 %v3886_v16, %v3886_v16 }
0x1040   : > { %3916 = vst.msk [vmem:[%s7223_s17] sm:$0xf] %vm3915_vm5, %v3899_v29  ;;  %v3900_v36 = vpack.c.bf16 %v3884_v44, %v3884_v44 }
0x1041   : > { %3919 = vst.msk [vmem:[%s7223_s17 + $0xc] sm:$0xf] %vm3915_vm5, %v3902_v27 }
0x1042   : > { %3917 = vst.msk [vmem:[%s7223_s17 + $0x4] sm:$0xf] %vm3915_vm5, %v3900_v36 }
0x1044   : > { %v4729_v59 = vpop.f32.mrb[76].mxu1 }
0x1045   : > { %v3845_v1 = vadd.f32 %v4729_v59, %v7212_v51  ;;  %v3836_v31 = vpop.f32.mrb[77].mxu1 }
0x1046   : > { %v3837_v26 = vadd.f32 %v7212_v51, %v3836_v31  ;;  %v4730_v12 = vpop.f32.mrb[78].mxu1 }
0x1047   : > { %v3889_v38 = vadd.f32 %v3845_v1, %v7106_v19  ;;  %v3848_v45 = vadd.f32 %v4730_v12, %v7212_v51  ;;  %v3839_v56 = vpop.f32.mrb[79].mxu1 }
0x1048   : > { %v3887_v14 = vadd.f32 %v3837_v26, %v7100_v34  ;;  %v3840_v0 = vadd.f32 %v7212_v51, %v3839_v56 }
0x1049   : > { %v3905_v47 = vpack.c.bf16 %v3889_v38, %v3889_v38  ;;  %v3890_v4 = vadd.f32 %v3848_v45, %v7097_v22 }
0x104a   : > { %v3903_v46 = vpack.c.bf16 %v3887_v14, %v3887_v14  ;;  %v3888_v32 = vadd.f32 %v3840_v0, %v7103_v58 }
0x104b   : > { %3922 = vst.msk [vmem:[%s7223_s17 + $0x18] sm:$0xf] %vm3915_vm5, %v3905_v47  ;;  %v3906_v43 = vpack.c.bf16 %v3890_v4, %v3890_v4 }
0x104c   : > { %3920 = vst.msk [vmem:[%s7223_s17 + $0x10] sm:$0xf] %vm3915_vm5, %v3903_v46  ;;  %v3904_v33 = vpack.c.bf16 %v3888_v32, %v3888_v32 }
0x104d   : > { %3923 = vst.msk [vmem:[%s7223_s17 + $0x1c] sm:$0xf] %vm3915_vm5, %v3906_v43 }
0x104e   : > { %3921 = vst.msk [vmem:[%s7223_s17 + $0x14] sm:$0xf] %vm3915_vm5, %v3904_v33 }
0x10dd   : > { %v4733_v34 = vpop.f32.mrb[80].mxu1 }
0x10de   : > { %v3861_v19 = vadd.f32 %v4733_v34, %v7212_v51  ;;  %v3852_v22 = vpop.f32.mrb[81].mxu1 }
0x10df   : > { %v3853_v30 = vadd.f32 %v7212_v51, %v3852_v22  ;;  %v4734_v58 = vpop.f32.mrb[82].mxu1 }
0x10e0   : > { %v3893_v40 = vadd.f32 %v3861_v19, %v7166_v49  ;;  %v3864_v52 = vadd.f32 %v4734_v58, %v7212_v51  ;;  %v3855_v57 = vpop.f32.mrb[83].mxu1 }
0x10e1   : > { %v3891_v62 = vadd.f32 %v3853_v30, %v7159_v39  ;;  %v3856_v21 = vadd.f32 %v7212_v51, %v3855_v57 }
0x10e2   : > { %v3909_v18 = vpack.c.bf16 %v3893_v40, %v3893_v40  ;;  %v3894_v20 = vadd.f32 %v3864_v52, %v7155_v41 }
0x10e3   : > { %v3907_v60 = vpack.c.bf16 %v3891_v62, %v3891_v62  ;;  %v3892_v35 = vadd.f32 %v3856_v21, %v7162_v3 }
0x10e4   : > { %3926 = vst.msk [vmem:[%s7223_s17 + $0x28] sm:$0xf] %vm3915_vm5, %v3909_v18  ;;  %v3910_v53 = vpack.c.bf16 %v3894_v20, %v3894_v20 }
0x10e5   : > { %3924 = vst.msk [vmem:[%s7223_s17 + $0x20] sm:$0xf] %vm3915_vm5, %v3907_v60  ;;  %v3908_v49 = vpack.c.bf16 %v3892_v35, %v3892_v35  ;;  %v4737_v2 = vpop.f32.mrb[84].mxu1 }
0x10e6   : > { %3927 = vst.msk [vmem:[%s7223_s17 + $0x2c] sm:$0xf] %vm3915_vm5, %v3910_v53  ;;  %v3877_v39 = vadd.f32 %v4737_v2, %v7212_v51  ;;  %v3868_v25 = vpop.f32.mrb[85].mxu1 }
0x10e7   : > { %3925 = vst.msk [vmem:[%s7223_s17 + $0x24] sm:$0xf] %vm3915_vm5, %v3908_v49  ;;  %v3869_v41 = vadd.f32 %v7212_v51, %v3868_v25  ;;  %v4738_v3 = vpop.f32.mrb[86].mxu1 }
0x10e8   : > { %v3897_v42 = vadd.f32 %v3877_v39, %v7198_v54  ;;  %v3880_v55 = vadd.f32 %v4738_v3, %v7212_v51  ;;  %v3871_v15 = vpop.f32.mrb[87].mxu1 }
0x10e9   : > { %v3895_v10 = vadd.f32 %v3869_v41, %v7192_v5  ;;  %v3872_v63 = vadd.f32 %v7212_v51, %v3871_v15 }
0x10ea   : > { %v3913_v7 = vpack.c.bf16 %v3897_v42, %v3897_v42  ;;  %v3898_v23 = vadd.f32 %v3880_v55, %v7189_v13 }
0x10eb   : > { %v3911_v11 = vpack.c.bf16 %v3895_v10, %v3895_v10  ;;  %v3896_v28 = vadd.f32 %v3872_v63, %v7195_v17 }
0x10ec   : > { %3930 = vst.msk [vmem:[%s7223_s17 + $0x38] sm:$0xf] %vm3915_vm5, %v3913_v7  ;;  %v3914_v54 = vpack.c.bf16 %v3898_v23, %v3898_v23 }
0x10ed   : > { %3928 = vst.msk [vmem:[%s7223_s17 + $0x30] sm:$0xf] %vm3915_vm5, %v3911_v11  ;;  %v3912_v5 = vpack.c.bf16 %v3896_v28, %v3896_v28 }
0x10ee   : > { %3931 = vst.msk [vmem:[%s7223_s17 + $0x3c] sm:$0xf] %vm3915_vm5, %v3914_v54 }
0x10ef   : > { %3929 = vst.msk [vmem:[%s7223_s17 + $0x34] sm:$0xf] %vm3915_vm5, %v3912_v5 }
0x10f0   : > { %5261 = shalt.err (!%p5258_p10)
}
0x10f1   : > { %s5262_s28 = scalar_lea.hbm %s7281_s25, 1024  ;;  %s5266_s26 = scalar_lea.hbm %s7514_s29, 4096 }
0x10f2   : > { %p5263_p11 = scmp.ne.s32.totalorder %s7281_s25, %s5262_s28  ;;  %p5267_p0 = scmp.lt.u32.totalorder %s7281_s25, %s7514_s29 }
0x10f3   : > { %p5268_p1 = scmp.lt.u32.totalorder %s5266_s26, %s5262_s28  ;;  %p5270_p3 = scmp.lt.u32.totalorder %s5262_s28, %s7281_s25 }
0x10f4   : > { %p5264_p12 = pnand %p5263_p11, %p5481_p8 }
0x10f5   : > { %p5269_p2 = por %p5268_p1, %p5267_p0 }
0x10f6   : > { %p5265_p13 = pneg %p5264_p12 }
0x10f7   : > { %p5271_p4 = por %p5270_p3, %p5269_p2 }
0x10f9   : > { %p5272_p5 = pnand %p5271_p4, %p5265_p13 }
0x10fb   : > { %5275 = shalt.err (!%p5272_p5)
}
0x10fc   : > { %s5359_s11 = smov 128   ;;  %s5360_s16 = smov 4  }
0x10fd   : > { %s7515_s13 = smov 64  }
0x10fe   : > { %4771 = dma.vmem_to_hbm [thread:$0]  (%p5481_p8), %s7283_s20, 1024, %s7281_s25, %s7293_s14, %s7515_s13, %s5359_s11, %s5360_s16  }
0x10ff PF: > { %s7516_s17 = sld [smem:[#allocation6_spill]]  ;;  %p4777_p6 = scmp.ge.s32.totalorder %s5342_s24, 2 }
0x1101   : > { %p4774_p7 = pnand %p4777_p6, %p5485_p9 }
0x1105   : > { %s3965_s26 = sand.u32 1, %s7516_s17  }
0x1106   : > { %s3966_s28 = scalar_lea.sflag [#allocation4], %s3965_s26 }
0x1107   : > { %5309 = dma.done.wait (!%p4774_p7), %s3966_s28, 1024  }
0x1108   : > { %5311 = vsyncadd (!%p4774_p7), %s3966_s28, 4294966272  ;;  %s24_s24 = sadd.s32 1, %s5342_s24   ;;  %s7518_s12 = sld [smem:[#allocation7_spill]] }
0x1109   : > { %p21_p10 = scmp.ge.s32.totalorder %s24_s24, 6   ;;  %s7519_s25 = sld [smem:[#allocation8_spill]] }
0x110a   : > { %s7520_s17 = smov %s5318_s18  ;;  %s7521_s18 = smov %s5322_s19 }
0x110b   : > { %s7522_s19 = smov %s5493_s27  ;;  %s7523_s20 = smov %s5334_s22 }
0x110c   : > { %s7524_s21 = smov %s5338_s23  ;;  %23 = sbr.rel (!%p21_p10) target bundleno = 7 (0x7), region = 148 }
0x110e   : > { %s7525_s22 = smov %s7518_s12 }
0x110f   : > { %s7526_s23 = smov %s7519_s25 }
0x1113   :  { %3971 = vsyncpa [#allocation4], 1 }
0x1114   :  { %3973 = vsyncpa [#allocation4 + $0x1], 1 }

</bundles_post_ra>
